<compile_context>
chip_gen: v7x
topology: tpu7x:2x2x1
jax: 0.10.0
libtpu: 0.0.40
codegen_flags: <defaults>
</compile_context>

<pallas_src>
import functools

import numpy as np
import jax
import jax.numpy as jnp
from jax import lax
from jax.experimental import pallas as pl
from jax.experimental.pallas import tpu as pltpu


# ---------------------------------------------------------------------------
# Host-side parameter construction (mirrors the PyTorch __init__ plus the
# deterministic per-forward clamps / filter builds).  Complex gabor filters
# are materialized as stacked real/imag parts (2F, K).
# ---------------------------------------------------------------------------
def mel_filter_params(n_filters, min_freq, max_freq, sample_rate):
    min_mel = 1127.0 * np.log1p(min_freq / 700.0)
    max_mel = 1127.0 * np.log1p(max_freq / 700.0)
    peaks_mel = np.linspace(min_mel, max_mel, n_filters + 2)
    peaks_hz = 700.0 * np.expm1(peaks_mel / 1127.0)
    center_freqs = peaks_hz[1:-1] * (2.0 * np.pi / sample_rate)
    bandwidths = peaks_hz[2:] - peaks_hz[:-2]
    sigmas = sample_rate / 2.0 / bandwidths
    return center_freqs.astype(np.float32), sigmas.astype(np.float32)


def build_gabor_filters(filter_size, center_freqs, sigmas):
    t = np.arange(-(filter_size // 2), (filter_size + 1) // 2, dtype=np.float32)
    denom = 1.0 / (np.sqrt(2.0 * np.pi) * sigmas)                    # (F,)
    gauss = np.exp(np.outer(1.0 / (2.0 * sigmas ** 2), -t ** 2))     # (F, K)
    phase = np.outer(center_freqs, t)                                # (F, K)
    real = denom[:, None] * np.cos(phase) * gauss
    imag = denom[:, None] * np.sin(phase) * gauss
    return np.concatenate([real, imag], axis=0).astype(np.float32)   # (2F, K)


def build_gauss_windows(pool_size, sigmas):
    t = np.arange(pool_size, dtype=np.float32)
    numerator = t * (2.0 / (pool_size - 1)) - 1.0
    return np.exp(-0.5 * (numerator[None, :] / sigmas[:, None]) ** 2).astype(np.float32)


def build_leaf_params(n_filters, min_freq, max_freq, sample_rate,
                      window_len_ms, window_stride_ms, T, eps=1e-12):
    filter_size = int(sample_rate * window_len_ms / 1000)
    filter_size += 1 - filter_size % 2
    pool_stride = int(sample_rate * window_stride_ms / 1000)
    pool_size = filter_size
    K, S = filter_size, pool_stride
    P = K // 2
    T_out = (T + 2 * P - K) // S + 1
    T_dec = T_out * S
    K_pad = -(-K // 8) * 8
    T_out_pad = max(128, -(-T_out // 128) * 128)      # lane-dense output frames

    center_freqs, bandwidths = mel_filter_params(
        n_filters, min_freq, max_freq, sample_rate)
    pooling_widths = np.full((n_filters,), 0.4, dtype=np.float32)

    # forward-time clamps (GaborFilterbank.forward)
    cf = np.clip(center_freqs, 0.0, np.pi)
    z = np.sqrt(2.0 * np.log(2.0)) / np.pi
    bw = np.clip(bandwidths, 4.0 * z, K * z)
    pw = np.clip(pooling_widths, 2.0 / pool_size, 0.5)

    gabor = build_gabor_filters(K, cf, bw)                 # (2F, K)
    windows = build_gauss_windows(pool_size, pw)           # (F, K)
    # All pooling widths are identical after init + clamp, so one shared
    # lowpass window can be folded (window x stride decimation) into a single
    # banded pooling matrix applied on the MXU.
    # TODO(synk): per-filter pooling widths need a low-rank window
    # factorization (R rank-1 pooling matmuls) instead of this fold.
    assert np.allclose(windows, windows[0:1]), \
        "per-filter pooling widths not supported by the folded pooling matmul"
    window = windows[0].copy()                             # (K,)

    gabor_pad = np.zeros((2 * n_filters, K_pad), np.float32)
    gabor_pad[:, :K] = gabor

    # PCEN params (LeafIs defaults: s=0.04, alpha=0.96, delta=2, r=0.5,
    # learn_logs=False -> stored r = 1/r = 2.0), with forward-time transforms.
    s = np.full((n_filters,), 0.04, np.float32)
    alpha = np.minimum(np.full((n_filters,), 0.96, np.float32), 1.0)
    delta = np.maximum(np.full((n_filters,), 2.0, np.float32), 0.0)
    r_eff = 1.0 / np.maximum(np.full((n_filters,), 1.0 / 0.5, np.float32), 1.0)

    # PCEN IIR smoother  M_t = (1-s) M_{t-1} + s x_t  (M_0 = x_0) rewritten as
    #   M[f,t] = g[f,t] * sum_{u<=t} h[f,u] * x[f,u]
    # with g[f,t] = (1-s)^t, h[f,0] = 1, h[f,u>0] = s (1-s)^{-u}.
    tri = np.triu(np.ones((T_out_pad, T_out_pad), np.float32))   # tri[u,t]=1, u<=t
    t_idx = np.arange(T_out_pad, dtype=np.float64)[None, :]
    one_m_s = (1.0 - s.astype(np.float64))[:, None]
    g = (one_m_s ** t_idx).astype(np.float32)                    # (F, T_out_pad)
    h = (s.astype(np.float64)[:, None] * one_m_s ** (-t_idx)).astype(np.float32)
    h[:, 0] = 1.0

    # fold constant transcendentals into the parameter table
    pcen = np.zeros((n_filters, 8), np.float32)
    pcen[:, 0] = alpha
    pcen[:, 1] = delta
    pcen[:, 2] = delta ** r_eff                            # delta ** r
    pcen[:, 3] = r_eff
    pcen[:, 4] = np.exp(-alpha * np.log(eps))              # eps ** (-alpha)
    use_sqrt = bool(np.allclose(r_eff, 0.5))

    return dict(n_filters=n_filters, gabor=gabor, gabor_pad=gabor_pad,
                windows=windows, window=window, tri=tri, g=g, h=h, pcen=pcen,
                s=s, alpha=alpha, delta=delta, r=r_eff, eps=eps,
                K=K, K_pad=K_pad, S=S, P=P, T_out=T_out, T_dec=T_dec,
                T_out_pad=T_out_pad, use_sqrt=use_sqrt)


# ---------------------------------------------------------------------------
# Probe the per-sublane strided roll (support + sign convention) once.
# ---------------------------------------------------------------------------
@functools.lru_cache(maxsize=1)
def _strided_roll_mode():
    """Returns "sub" if roll(x, shift=0, axis=1, stride=1, stride_axis=0)
    gives out[k, c] = x[k, c - k], "add" if out[k, c] = x[k, c + k], and None
    if the strided roll is unsupported (fall back to a roll cascade)."""
    def probe(o_ref):
        x = lax.broadcasted_iota(jnp.int32, (8, 128), 1)
        o_ref[...] = pltpu.roll(x, shift=0, axis=1, stride=1, stride_axis=0)

    try:
        got = np.asarray(jax.block_until_ready(
            pl.pallas_call(
                probe,
                out_shape=jax.ShapeDtypeStruct((8, 128), jnp.int32))()))
    except Exception:
        return None
    lanes = np.arange(128)[None, :]
    rows = np.arange(8)[:, None]
    if np.array_equal(got, (lanes - rows) % 128):
        return "sub"
    if np.array_equal(got, (lanes + rows) % 128):
        return "add"
    return None


# ---------------------------------------------------------------------------
# Pallas kernel: per grid step, a block of BB waveforms goes through
#   gabor conv (one bf16 MXU Toeplitz matmul) -> squared modulus ->
#   gaussian pooling + decimation (one MXU matmul) -> PCEN (prefix-sum matmul
#   + compression).
# ---------------------------------------------------------------------------
def _make_leaf_kernel(BB, F, K_pad, T, L, P, delta_col,
                      inv_eps, clamp_min, use_sqrt, roll_mode):
    n_bits = max(1, (K_pad - 1).bit_length())

    def kernel(xp_ref, w_ref, pool_ref, tri_ref, g_ref, h_ref, pcen_ref,
               out_ref, sqpad_ref, x2_ref):
        # ---- Toeplitz build: one per-sublane strided roll per waveform -----
        if roll_mode is None:
            row_id = lax.broadcasted_iota(jnp.int32, (K_pad, L), 0)
            bit_masks = [(row_id & (1 << i)) != 0 for i in range(n_bits)]
        for b in range(BB):
            slab = jnp.broadcast_to(xp_ref[b], (K_pad, L))       # (K_pad, L) f32
            if roll_mode is not None:
                # row k is rolled by +/- k in a single XLU op sequence
                slab = pltpu.roll(slab, shift=0, axis=1, stride=1, stride_axis=0)
            else:
                # fallback: centered log2(K_pad) conditional-roll cascade
                slab = pltpu.roll(slab, shift=P, axis=1)
                for i in range(n_bits):
                    amt = 1 << i
                    rolled = pltpu.roll(slab, shift=(L - amt) % L, axis=1)
                    slab = jnp.where(bit_masks[i], rolled, slab)
            x2_ref[:, b * L:(b + 1) * L] = slab.astype(jnp.bfloat16)

        # ---- Gabor conv: single (2F, K_pad) @ (K_pad, BB*L) bf16 matmul ----
        conv = jnp.dot(w_ref[...], x2_ref[...],
                       preferred_element_type=jnp.float32)       # (2F, BB*L)
        # squared modulus; zero everything outside the T valid samples so the
        # scratch rows double as the zero-padded pooling input.
        sq = conv[:F, :] ** 2 + conv[F:, :] ** 2                 # (F, BB*L)
        col = lax.broadcasted_iota(jnp.int32, (F, L), 1)
        valid = (col >= delta_col) & (col < delta_col + T)
        for b in range(BB):
            sqpad_ref[b * F:(b + 1) * F, :] = jnp.where(
                valid, sq[:, b * L:(b + 1) * L], 0.0)

        # ---- gaussian lowpass pooling + stride decimation: one MXU matmul --
        pooled = jnp.dot(sqpad_ref[...], pool_ref[...],
                         preferred_element_type=jnp.float32)     # (BB*F, T_out_pad)

        # ---- PCEN -----------------------------------------------------------
        xx = jnp.maximum(pooled, clamp_min)                      # clamp = 1e-5
        # IIR smoother as geometric-weight prefix sum: M = g * ((h * xx) @ tri)
        cum = jnp.dot(h_ref[...] * xx, tri_ref[...],
                      preferred_element_type=jnp.float32)
        m = g_ref[...] * cum

        alpha = pcen_ref[:, 0:1]                                 # (BB*F, 1)
        delta = pcen_ref[:, 1:2]
        delta_r = pcen_ref[:, 2:3]                               # delta ** r (host)
        r = pcen_ref[:, 3:4]
        eps_neg_alpha = pcen_ref[:, 4:5]                         # eps ** (-alpha)
        # (eps + M)^(-alpha) == eps^(-alpha) * exp(-alpha * log1p(M / eps))
        smoother = eps_neg_alpha * jnp.exp(-alpha * jnp.log1p(m * inv_eps))
        base = xx * smoother + delta                             # strictly positive
        if use_sqrt:                                             # r == 0.5 -> sqrt
            out = jnp.sqrt(base) - delta_r
        else:
            out = jnp.exp(r * jnp.log(base)) - delta_r
        out_ref[...] = out                                       # lane-dense store

    return kernel


def _leaf_pallas_call(kernel, B, BB, F, L, K_pad, T_out_pad, single_buffer_consts):
    def const_spec(shape):
        n = len(shape)

        def index_map(i):
            return (0,) * n

        if single_buffer_consts:
            # grid-invariant operand: single buffering halves its VMEM cost
            return pl.BlockSpec(shape, index_map, pipeline_mode=pl.Buffered(1))
        return pl.BlockSpec(shape, index_map)

    return pl.pallas_call(
        kernel,
        out_shape=jax.ShapeDtypeStruct((B * F, T_out_pad), jnp.float32),
        grid=(B // BB,),
        in_specs=[
            pl.BlockSpec((BB, 1, L), lambda i: (i, 0, 0)),       # waveform block
            const_spec((2 * F, K_pad)),                          # gabor taps (bf16)
            const_spec((L, T_out_pad)),                          # pooling+decimation
            const_spec((T_out_pad, T_out_pad)),                  # prefix-sum tri
            const_spec((BB * F, T_out_pad)),                     # (1-s)^t
            const_spec((BB * F, T_out_pad)),                     # s (1-s)^-u
            const_spec((BB * F, 8)),                             # PCEN scalar table
        ],
        out_specs=pl.BlockSpec((BB * F, T_out_pad), lambda i: (i, 0)),
        scratch_shapes=[
            pltpu.VMEM((BB * F, L), jnp.float32),                # masked |gabor|^2
            pltpu.VMEM((K_pad, BB * L), jnp.bfloat16),           # Toeplitz slab
        ],
        compiler_params=pltpu.CompilerParams(
            dimension_semantics=("parallel",),
            vmem_limit_bytes=48 * 1024 * 1024),
    )


def _round_up(v, m):
    return -(-v // m) * m


def _pick_block_b(B):
    """Largest divisor of B that is <= 8 while keeping >= 2 grid steps."""
    best = 1
    for bb in range(1, min(8, B) + 1):
        if B % bb == 0 and (B // bb) >= 2:
            best = bb
    return best


def leaf_is_forward(x, prm, *, block_b=None, clamp_min=1e-5):
    B, T = x.shape
    F = prm["n_filters"]
    K, K_pad, S, P = prm["K"], prm["K_pad"], prm["S"], prm["P"]
    T_out, T_dec, T_out_pad = prm["T_out"], prm["T_dec"], prm["T_out_pad"]
    eps = prm["eps"]

    roll_mode = _strided_roll_mode()
    # column of the conv output holding the filterbank response for time 0
    delta_col = {"sub": 2 * P, "add": 0, None: P}[roll_mode]

    BB = block_b if block_b is not None else _pick_block_b(B)
    assert B % BB == 0, (B, BB)

    # lane-aligned working length: covers the conv reads and the pooling band
    L = _round_up(max(T + 2 * P, T_dec - S + K + delta_col - P), 128)

    # gaussian window x stride-S decimation folded into one banded matrix:
    # pooled[f, j] = sum_k win[k] * sqpad[f, j*S + k + delta_col - P]
    win = prm["window"]
    pool = np.zeros((L, T_out_pad), np.float32)
    for j in range(T_out):
        l0 = j * S + delta_col - P
        k0 = max(0, -l0)            # dropped entries hit the pooling zero-pad
        pool[l0 + k0:l0 + K, j] = win[k0:]

    # padded waveform: xp[i] = x[i - P] for P <= i < P + T, zero elsewhere
    xp = jnp.pad(x.astype(jnp.float32), ((0, 0), (P, L - T - P)))[:, None, :]

    g = np.tile(prm["g"], (BB, 1))
    h = np.tile(prm["h"], (BB, 1))
    pcen = np.tile(prm["pcen"], (BB, 1))

    kernel = _make_leaf_kernel(BB, F, K_pad, T, L, P, delta_col,
                               1.0 / eps, clamp_min, prm["use_sqrt"], roll_mode)

    args = (xp,
            jnp.asarray(prm["gabor_pad"], dtype=jnp.bfloat16),
            jnp.asarray(pool),
            jnp.asarray(prm["tri"]),
            jnp.asarray(g), jnp.asarray(h), jnp.asarray(pcen))

    out2d = None
    for single_buf in (True, False):
        try:
            out2d = _leaf_pallas_call(kernel, B, BB, F, L, K_pad, T_out_pad,
                                      single_buf)(*args)
            break
        except Exception:
            # pl.Buffered(1) not supported in this JAX build -> plain specs
            if not single_buf:
                raise
    return out2d.reshape(B, F, T_out_pad)[:, :, :T_out]


# ---------------------------------------------------------------------------
# Pure-JAX reference (straightforward f32 formulation) for a correctness check.
# ---------------------------------------------------------------------------
def leaf_is_reference(x, gabor, windows, s, alpha, delta, r, K, S,
                      eps=1e-12, clamp_min=1e-5):
    B, T = x.shape
    F = windows.shape[0]
    P = K // 2
    T_out = (T + 2 * P - K) // S + 1
    xp = jnp.pad(x.astype(jnp.float32), ((0, 0), (P, P)))
    conv = jnp.zeros((B, 2 * F, T), jnp.float32)
    for k in range(K):
        conv = conv + gabor[None, :, k:k + 1] * xp[:, None, k:k + T]
    sq = conv[:, :F] ** 2 + conv[:, F:] ** 2
    sqp = jnp.pad(sq, ((0, 0), (0, 0), (P, P)))
    pooled = jnp.stack(
        [jnp.sum(sqp[:, :, j * S:j * S + K] * windows[None], axis=-1)
         for j in range(T_out)], axis=-1)
    xx = jnp.maximum(pooled, clamp_min)
    s_ = jnp.asarray(s)[None, :]
    alpha_ = jnp.asarray(alpha)[None, :, None]
    delta_ = jnp.asarray(delta)[None, :, None]
    r_ = jnp.asarray(r)[None, :, None]
    ms = [xx[..., 0]]
    for t in range(1, T_out):
        ms.append((1.0 - s_) * ms[-1] + s_ * xx[..., t])
    m = jnp.stack(ms, axis=-1)
    smoother = jnp.exp(-alpha_ * (float(np.log(eps)) + jnp.log1p(m / eps)))
    return (xx * smoother + delta_) ** r_ - delta_ ** r_


if __name__ == "__main__":
    # Small, consistent configuration (same structure as the PyTorch defaults,
    # scaled down: 8 filters, 1.6 kHz sample rate -> 41-tap filters, stride 16).
    n_filters = 8
    sample_rate = 1600
    min_freq, max_freq = 60.0, 780.0
    window_len_ms, window_stride_ms = 25.0, 10.0
    B, T = 4, 256

    prm = build_leaf_params(n_filters, min_freq, max_freq, sample_rate,
                            window_len_ms, window_stride_ms, T)

    key = jax.random.PRNGKey(0)
    x = jax.random.normal(key, (B, T), dtype=jnp.float32)

    out = jax.block_until_ready(leaf_is_forward(x, prm))
    ref = jax.block_until_ready(
        leaf_is_reference(x, jnp.asarray(prm["gabor"]), jnp.asarray(prm["windows"]),
                          prm["s"], prm["alpha"], prm["delta"], prm["r"],
                          prm["K"], prm["S"], eps=prm["eps"]))

    assert out.shape == (B, n_filters, prm["T_out"]), out.shape
    # Tolerance accounts for the bf16 Gabor-conv operands (f32 accumulation);
    # structural errors produce discrepancies orders of magnitude larger.
    np.testing.assert_allclose(np.asarray(out), np.asarray(ref),
                               rtol=3e-2, atol=2e-3)
    print("KERNEL_OK")
</pallas_src>

<mosaic_0001>
module attributes {stable_mosaic.version = 11 : i64} {
  func.func @kernel(%arg0: i32, %arg1: memref<2x1x384xf32, #tpu.memory_space<vmem>>, %arg2: memref<16x48xbf16, #tpu.memory_space<vmem>>, %arg3: memref<384x128xf32, #tpu.memory_space<vmem>>, %arg4: memref<128x128xf32, #tpu.memory_space<vmem>>, %arg5: memref<16x128xf32, #tpu.memory_space<vmem>>, %arg6: memref<16x128xf32, #tpu.memory_space<vmem>>, %arg7: memref<16x8xf32, #tpu.memory_space<vmem>>, %arg8: memref<16x128xf32, #tpu.memory_space<vmem>>, %arg9: memref<16x384xf32, #tpu.memory_space<vmem>>, %arg10: memref<48x768xbf16, #tpu.memory_space<vmem>>) attributes {dimension_semantics = [#tpu.dimension_semantics<parallel>], iteration_bounds = array<i64: 2>, scalar_prefetch = 0 : i64, scratch_operands = 2 : i64, tpu.core_type = #tpu.core_type<tc>, window_params = [{transform_indices = @transform_0, window_bounds = array<i64: 2, 1, 384>}, {pipeline_mode = #tpu.pipeline_mode<synchronous>, transform_indices = @transform_1, window_bounds = array<i64: 16, 48>}, {pipeline_mode = #tpu.pipeline_mode<synchronous>, transform_indices = @transform_2, window_bounds = array<i64: 384, 128>}, {pipeline_mode = #tpu.pipeline_mode<synchronous>, transform_indices = @transform_3, window_bounds = array<i64: 128, 128>}, {pipeline_mode = #tpu.pipeline_mode<synchronous>, transform_indices = @transform_4, window_bounds = array<i64: 16, 128>}, {pipeline_mode = #tpu.pipeline_mode<synchronous>, transform_indices = @transform_5, window_bounds = array<i64: 16, 128>}, {pipeline_mode = #tpu.pipeline_mode<synchronous>, transform_indices = @transform_6, window_bounds = array<i64: 16, 8>}, {transform_indices = @transform_7, window_bounds = array<i64: 16, 128>}]} {
    %0 = tpu.iota {dimensions = array<i32: 0>} : vector<48x384xi32>
    %c1_i32 = arith.constant 1 : i32
    %1 = vector.broadcast %c1_i32 : i32 to vector<48x384xi32>
    %2 = arith.andi %0, %1 : vector<48x384xi32>
    %c0_i32 = arith.constant 0 : i32
    %3 = vector.broadcast %c0_i32 : i32 to vector<48x384xi32>
    %4 = arith.cmpi ne, %2, %3 : vector<48x384xi32>
    %c2_i32 = arith.constant 2 : i32
    %5 = vector.broadcast %c2_i32 : i32 to vector<48x384xi32>
    %6 = arith.andi %0, %5 : vector<48x384xi32>
    %c0_i32_0 = arith.constant 0 : i32
    %7 = vector.broadcast %c0_i32_0 : i32 to vector<48x384xi32>
    %8 = arith.cmpi ne, %6, %7 : vector<48x384xi32>
    %c4_i32 = arith.constant 4 : i32
    %9 = vector.broadcast %c4_i32 : i32 to vector<48x384xi32>
    %10 = arith.andi %0, %9 : vector<48x384xi32>
    %c0_i32_1 = arith.constant 0 : i32
    %11 = vector.broadcast %c0_i32_1 : i32 to vector<48x384xi32>
    %12 = arith.cmpi ne, %10, %11 : vector<48x384xi32>
    %c8_i32 = arith.constant 8 : i32
    %13 = vector.broadcast %c8_i32 : i32 to vector<48x384xi32>
    %14 = arith.andi %0, %13 : vector<48x384xi32>
    %c0_i32_2 = arith.constant 0 : i32
    %15 = vector.broadcast %c0_i32_2 : i32 to vector<48x384xi32>
    %16 = arith.cmpi ne, %14, %15 : vector<48x384xi32>
    %c16_i32 = arith.constant 16 : i32
    %17 = vector.broadcast %c16_i32 : i32 to vector<48x384xi32>
    %18 = arith.andi %0, %17 : vector<48x384xi32>
    %c0_i32_3 = arith.constant 0 : i32
    %19 = vector.broadcast %c0_i32_3 : i32 to vector<48x384xi32>
    %20 = arith.cmpi ne, %18, %19 : vector<48x384xi32>
    %c32_i32 = arith.constant 32 : i32
    %21 = vector.broadcast %c32_i32 : i32 to vector<48x384xi32>
    %22 = arith.andi %0, %21 : vector<48x384xi32>
    %c0_i32_4 = arith.constant 0 : i32
    %23 = vector.broadcast %c0_i32_4 : i32 to vector<48x384xi32>
    %24 = arith.cmpi ne, %22, %23 : vector<48x384xi32>
    %c0 = arith.constant 0 : index
    %c0_5 = arith.constant 0 : index
    %c0_6 = arith.constant 0 : index
    %25 = vector.load %arg1[%c0, %c0_5, %c0_6] : memref<2x1x384xf32, #tpu.memory_space<vmem>>, vector<1x1x384xf32>
    %26 = vector.shape_cast %25 : vector<1x1x384xf32> to vector<1x384xf32>
    %27 = vector.shape_cast %26 : vector<1x384xf32> to vector<1x384xf32>
    %28 = vector.broadcast %27 : vector<1x384xf32> to vector<48x384xf32>
    %c20_i32 = arith.constant 20 : i32
    %29 = tpu.dynamic_rotate %28 by %c20_i32 dim 1 : vector<48x384xf32>, i32 -> vector<48x384xf32>
    %c383_i32 = arith.constant 383 : i32
    %30 = tpu.dynamic_rotate %29 by %c383_i32 dim 1 : vector<48x384xf32>, i32 -> vector<48x384xf32>
    %31 = arith.select %4, %30, %29 : vector<48x384xi1>, vector<48x384xf32>
    %c382_i32 = arith.constant 382 : i32
    %32 = tpu.dynamic_rotate %31 by %c382_i32 dim 1 : vector<48x384xf32>, i32 -> vector<48x384xf32>
    %33 = arith.select %8, %32, %31 : vector<48x384xi1>, vector<48x384xf32>
    %c380_i32 = arith.constant 380 : i32
    %34 = tpu.dynamic_rotate %33 by %c380_i32 dim 1 : vector<48x384xf32>, i32 -> vector<48x384xf32>
    %35 = arith.select %12, %34, %33 : vector<48x384xi1>, vector<48x384xf32>
    %c376_i32 = arith.constant 376 : i32
    %36 = tpu.dynamic_rotate %35 by %c376_i32 dim 1 : vector<48x384xf32>, i32 -> vector<48x384xf32>
    %37 = arith.select %16, %36, %35 : vector<48x384xi1>, vector<48x384xf32>
    %c368_i32 = arith.constant 368 : i32
    %38 = tpu.dynamic_rotate %37 by %c368_i32 dim 1 : vector<48x384xf32>, i32 -> vector<48x384xf32>
    %39 = arith.select %20, %38, %37 : vector<48x384xi1>, vector<48x384xf32>
    %c352_i32 = arith.constant 352 : i32
    %40 = tpu.dynamic_rotate %39 by %c352_i32 dim 1 : vector<48x384xf32>, i32 -> vector<48x384xf32>
    %41 = arith.select %24, %40, %39 : vector<48x384xi1>, vector<48x384xf32>
    %42 = arith.truncf %41 : vector<48x384xf32> to vector<48x384xbf16>
    %c0_7 = arith.constant 0 : index
    %c0_8 = arith.constant 0 : index
    %43 = vector.load %arg10[%c0_7, %c0_8] : memref<48x768xbf16, #tpu.memory_space<vmem>>, vector<48x384xbf16>
    tpu.vector_store %arg10[%c0_7, %c0_8], %42 {strides = array<i32>} : memref<48x768xbf16, #tpu.memory_space<vmem>>, vector<48x384xbf16>,
    %c1 = arith.constant 1 : index
    %c0_9 = arith.constant 0 : index
    %c0_10 = arith.constant 0 : index
    %44 = vector.load %arg1[%c1, %c0_9, %c0_10] : memref<2x1x384xf32, #tpu.memory_space<vmem>>, vector<1x1x384xf32>
    %45 = vector.shape_cast %44 : vector<1x1x384xf32> to vector<1x384xf32>
    %46 = vector.shape_cast %45 : vector<1x384xf32> to vector<1x384xf32>
    %47 = vector.broadcast %46 : vector<1x384xf32> to vector<48x384xf32>
    %c20_i32_11 = arith.constant 20 : i32
    %48 = tpu.dynamic_rotate %47 by %c20_i32_11 dim 1 : vector<48x384xf32>, i32 -> vector<48x384xf32>
    %c383_i32_12 = arith.constant 383 : i32
    %49 = tpu.dynamic_rotate %48 by %c383_i32_12 dim 1 : vector<48x384xf32>, i32 -> vector<48x384xf32>
    %50 = arith.select %4, %49, %48 : vector<48x384xi1>, vector<48x384xf32>
    %c382_i32_13 = arith.constant 382 : i32
    %51 = tpu.dynamic_rotate %50 by %c382_i32_13 dim 1 : vector<48x384xf32>, i32 -> vector<48x384xf32>
    %52 = arith.select %8, %51, %50 : vector<48x384xi1>, vector<48x384xf32>
    %c380_i32_14 = arith.constant 380 : i32
    %53 = tpu.dynamic_rotate %52 by %c380_i32_14 dim 1 : vector<48x384xf32>, i32 -> vector<48x384xf32>
    %54 = arith.select %12, %53, %52 : vector<48x384xi1>, vector<48x384xf32>
    %c376_i32_15 = arith.constant 376 : i32
    %55 = tpu.dynamic_rotate %54 by %c376_i32_15 dim 1 : vector<48x384xf32>, i32 -> vector<48x384xf32>
    %56 = arith.select %16, %55, %54 : vector<48x384xi1>, vector<48x384xf32>
    %c368_i32_16 = arith.constant 368 : i32
    %57 = tpu.dynamic_rotate %56 by %c368_i32_16 dim 1 : vector<48x384xf32>, i32 -> vector<48x384xf32>
    %58 = arith.select %20, %57, %56 : vector<48x384xi1>, vector<48x384xf32>
    %c352_i32_17 = arith.constant 352 : i32
    %59 = tpu.dynamic_rotate %58 by %c352_i32_17 dim 1 : vector<48x384xf32>, i32 -> vector<48x384xf32>
    %60 = arith.select %24, %59, %58 : vector<48x384xi1>, vector<48x384xf32>
    %61 = arith.truncf %60 : vector<48x384xf32> to vector<48x384xbf16>
    %c0_18 = arith.constant 0 : index
    %c384 = arith.constant 384 : index
    %62 = vector.load %arg10[%c0_18, %c384] : memref<48x768xbf16, #tpu.memory_space<vmem>>, vector<48x384xbf16>
    tpu.vector_store %arg10[%c0_18, %c384], %61 {strides = array<i32>} : memref<48x768xbf16, #tpu.memory_space<vmem>>, vector<48x384xbf16>,
    %c0_19 = arith.constant 0 : index
    %c0_20 = arith.constant 0 : index
    %63 = vector.load %arg2[%c0_19, %c0_20] : memref<16x48xbf16, #tpu.memory_space<vmem>>, vector<16x48xbf16>
    %c0_21 = arith.constant 0 : index
    %c0_22 = arith.constant 0 : index
    %64 = vector.load %arg10[%c0_21, %c0_22] : memref<48x768xbf16, #tpu.memory_space<vmem>>, vector<48x768xbf16>
    %cst = arith.constant dense<0.000000e+00> : vector<16x768xf32>
    %65 = tpu.matmul %63, %64, %cst {dimension_numbers = #tpu.dot_dimension_numbers<[1], [0], [0], [1], [0, 0, 1, 1], [], []>} : vector<16x48xbf16>, vector<48x768xbf16>, vector<16x768xf32> -> vector<16x768xf32>
    %66 = vector.extract_strided_slice %65 {offsets = [0, 0], sizes = [8, 768], strides = [1, 1]} : vector<16x768xf32> to vector<8x768xf32>
    %67 = arith.mulf %66, %66 : vector<8x768xf32>
    %68 = vector.extract_strided_slice %65 {offsets = [8, 0], sizes = [8, 768], strides = [1, 1]} : vector<16x768xf32> to vector<8x768xf32>
    %69 = arith.mulf %68, %68 : vector<8x768xf32>
    %70 = arith.addf %67, %69 : vector<8x768xf32>
    %71 = tpu.iota {dimensions = array<i32: 1>} : vector<8x384xi32>
    %c20_i32_23 = arith.constant 20 : i32
    %72 = vector.broadcast %c20_i32_23 : i32 to vector<8x384xi32>
    %73 = arith.cmpi sge, %71, %72 : vector<8x384xi32>
    %c276_i32 = arith.constant 276 : i32
    %74 = vector.broadcast %c276_i32 : i32 to vector<8x384xi32>
    %75 = arith.cmpi slt, %71, %74 : vector<8x384xi32>
    %76 = arith.andi %73, %75 : vector<8x384xi1>
    %77 = vector.extract_strided_slice %70 {offsets = [0, 0], sizes = [8, 384], strides = [1, 1]} : vector<8x768xf32> to vector<8x384xf32>
    %cst_24 = arith.constant 0.000000e+00 : f32
    %78 = vector.broadcast %cst_24 : f32 to vector<8x384xf32>
    %79 = arith.select %76, %77, %78 : vector<8x384xi1>, vector<8x384xf32>
    %c0_25 = arith.constant 0 : index
    %c0_26 = arith.constant 0 : index
    %80 = vector.load %arg9[%c0_25, %c0_26] : memref<16x384xf32, #tpu.memory_space<vmem>>, vector<8x384xf32>
    tpu.vector_store %arg9[%c0_25, %c0_26], %79 {strides = array<i32>} : memref<16x384xf32, #tpu.memory_space<vmem>>, vector<8x384xf32>,
    %81 = vector.extract_strided_slice %70 {offsets = [0, 384], sizes = [8, 384], strides = [1, 1]} : vector<8x768xf32> to vector<8x384xf32>
    %cst_27 = arith.constant 0.000000e+00 : f32
    %82 = vector.broadcast %cst_27 : f32 to vector<8x384xf32>
    %83 = arith.select %76, %81, %82 : vector<8x384xi1>, vector<8x384xf32>
    %c8 = arith.constant 8 : index
    %c0_28 = arith.constant 0 : index
    %84 = vector.load %arg9[%c8, %c0_28] : memref<16x384xf32, #tpu.memory_space<vmem>>, vector<8x384xf32>
    tpu.vector_store %arg9[%c8, %c0_28], %83 {strides = array<i32>} : memref<16x384xf32, #tpu.memory_space<vmem>>, vector<8x384xf32>,
    %c0_29 = arith.constant 0 : index
    %c0_30 = arith.constant 0 : index
    %85 = vector.load %arg9[%c0_29, %c0_30] : memref<16x384xf32, #tpu.memory_space<vmem>>, vector<16x384xf32>
    %c0_31 = arith.constant 0 : index
    %c0_32 = arith.constant 0 : index
    %86 = vector.load %arg3[%c0_31, %c0_32] : memref<384x128xf32, #tpu.memory_space<vmem>>, vector<384x128xf32>
    %cst_33 = arith.constant dense<0.000000e+00> : vector<16x128xf32>
    %87 = tpu.matmul %85, %86, %cst_33 {dimension_numbers = #tpu.dot_dimension_numbers<[1], [0], [0], [1], [0, 0, 1, 1], [], []>} : vector<16x384xf32>, vector<384x128xf32>, vector<16x128xf32> -> vector<16x128xf32>
    %cst_34 = arith.constant 9.99999974E-6 : f32
    %88 = vector.broadcast %cst_34 : f32 to vector<16x128xf32>
    %89 = arith.maximumf %87, %88 : vector<16x128xf32>
    %c0_35 = arith.constant 0 : index
    %c0_36 = arith.constant 0 : index
    %90 = vector.load %arg6[%c0_35, %c0_36] : memref<16x128xf32, #tpu.memory_space<vmem>>, vector<16x128xf32>
    %91 = arith.mulf %90, %89 : vector<16x128xf32>
    %c0_37 = arith.constant 0 : index
    %c0_38 = arith.constant 0 : index
    %92 = vector.load %arg4[%c0_37, %c0_38] : memref<128x128xf32, #tpu.memory_space<vmem>>, vector<128x128xf32>
    %cst_39 = arith.constant dense<0.000000e+00> : vector<16x128xf32>
    %93 = tpu.matmul %91, %92, %cst_39 {dimension_numbers = #tpu.dot_dimension_numbers<[1], [0], [0], [1], [0, 0, 1, 1], [], []>} : vector<16x128xf32>, vector<128x128xf32>, vector<16x128xf32> -> vector<16x128xf32>
    %c0_40 = arith.constant 0 : index
    %c0_41 = arith.constant 0 : index
    %94 = vector.load %arg5[%c0_40, %c0_41] : memref<16x128xf32, #tpu.memory_space<vmem>>, vector<16x128xf32>
    %95 = arith.mulf %94, %93 : vector<16x128xf32>
    %c0_42 = arith.constant 0 : index
    %c0_43 = arith.constant 0 : index
    %96 = vector.load %arg7[%c0_42, %c0_43] : memref<16x8xf32, #tpu.memory_space<vmem>>, vector<16x1xf32>
    %c0_44 = arith.constant 0 : index
    %c1_45 = arith.constant 1 : index
    %97 = vector.load %arg7[%c0_44, %c1_45] : memref<16x8xf32, #tpu.memory_space<vmem>>, vector<16x1xf32>
    %c0_46 = arith.constant 0 : index
    %c2 = arith.constant 2 : index
    %98 = vector.load %arg7[%c0_46, %c2] : memref<16x8xf32, #tpu.memory_space<vmem>>, vector<16x1xf32>
    %c0_47 = arith.constant 0 : index
    %c4 = arith.constant 4 : index
    %99 = vector.load %arg7[%c0_47, %c4] : memref<16x8xf32, #tpu.memory_space<vmem>>, vector<16x1xf32>
    %cst_48 = arith.constant 0.000000e+00 : f32
    %100 = vector.broadcast %cst_48 : f32 to vector<16x1xf32>
    %101 = arith.subf %100, %96 : vector<16x1xf32>
    %cst_49 = arith.constant 9.99999995E+11 : f32
    %102 = vector.broadcast %cst_49 : f32 to vector<16x128xf32>
    %103 = arith.mulf %95, %102 : vector<16x128xf32>
    %104 = math.log1p %103 : vector<16x128xf32>
    %105 = vector.broadcast %101 : vector<16x1xf32> to vector<16x128xf32>
    %106 = arith.mulf %105, %104 : vector<16x128xf32>
    %107 = math.exp %106 : vector<16x128xf32>
    %108 = vector.broadcast %99 : vector<16x1xf32> to vector<16x128xf32>
    %109 = arith.mulf %108, %107 : vector<16x128xf32>
    %110 = arith.mulf %89, %109 : vector<16x128xf32>
    %111 = vector.broadcast %97 : vector<16x1xf32> to vector<16x128xf32>
    %112 = arith.addf %110, %111 : vector<16x128xf32>
    %113 = math.sqrt %112 : vector<16x128xf32>
    %114 = vector.broadcast %98 : vector<16x1xf32> to vector<16x128xf32>
    %115 = arith.subf %113, %114 : vector<16x128xf32>
    %c0_50 = arith.constant 0 : index
    %c0_51 = arith.constant 0 : index
    %116 = vector.load %arg8[%c0_50, %c0_51] : memref<16x128xf32, #tpu.memory_space<vmem>>, vector<16x128xf32>
    tpu.vector_store %arg8[%c0_50, %c0_51], %115 {strides = array<i32>} : memref<16x128xf32, #tpu.memory_space<vmem>>, vector<16x128xf32>,
    return
  }
  func.func @transform_0(%arg0: i32) -> (i32, i32, i32) {
    %c0_i32 = arith.constant 0 : i32
    %c0_i32_0 = arith.constant 0 : i32
    %c0_i32_1 = arith.constant 0 : i32
    return %arg0, %c0_i32, %c0_i32_0 : i32, i32, i32
  }
  func.func @transform_1(%arg0: i32) -> (i32, i32) {
    %c0_i32 = arith.constant 0 : i32
    %c0_i32_0 = arith.constant 0 : i32
    %c0_i32_1 = arith.constant 0 : i32
    return %c0_i32, %c0_i32_0 : i32, i32
  }
  func.func @transform_2(%arg0: i32) -> (i32, i32) {
    %c0_i32 = arith.constant 0 : i32
    %c0_i32_0 = arith.constant 0 : i32
    %c0_i32_1 = arith.constant 0 : i32
    return %c0_i32, %c0_i32_0 : i32, i32
  }
  func.func @transform_3(%arg0: i32) -> (i32, i32) {
    %c0_i32 = arith.constant 0 : i32
    %c0_i32_0 = arith.constant 0 : i32
    %c0_i32_1 = arith.constant 0 : i32
    return %c0_i32, %c0_i32_0 : i32, i32
  }
  func.func @transform_4(%arg0: i32) -> (i32, i32) {
    %c0_i32 = arith.constant 0 : i32
    %c0_i32_0 = arith.constant 0 : i32
    %c0_i32_1 = arith.constant 0 : i32
    return %c0_i32, %c0_i32_0 : i32, i32
  }
  func.func @transform_5(%arg0: i32) -> (i32, i32) {
    %c0_i32 = arith.constant 0 : i32
    %c0_i32_0 = arith.constant 0 : i32
    %c0_i32_1 = arith.constant 0 : i32
    return %c0_i32, %c0_i32_0 : i32, i32
  }
  func.func @transform_6(%arg0: i32) -> (i32, i32) {
    %c0_i32 = arith.constant 0 : i32
    %c0_i32_0 = arith.constant 0 : i32
    %c0_i32_1 = arith.constant 0 : i32
    return %c0_i32, %c0_i32_0 : i32, i32
  }
  func.func @transform_7(%arg0: i32) -> (i32, i32) {
    %c0_i32 = arith.constant 0 : i32
    %c0_i32_0 = arith.constant 0 : i32
    return %arg0, %c0_i32 : i32, i32
  }
}

module attributes {stable_mosaic.version = 11 : i64} {
  func.func @kernel(%arg0: i32, %arg1: memref<2x1x384xf32, #tpu.memory_space<vmem>>, %arg2: memref<16x48xbf16, #tpu.memory_space<vmem>>, %arg3: memref<384x128xf32, #tpu.memory_space<vmem>>, %arg4: memref<128x128xf32, #tpu.memory_space<vmem>>, %arg5: memref<16x128xf32, #tpu.memory_space<vmem>>, %arg6: memref<16x128xf32, #tpu.memory_space<vmem>>, %arg7: memref<16x8xf32, #tpu.memory_space<vmem>>, %arg8: memref<16x128xf32, #tpu.memory_space<vmem>>, %arg9: memref<16x384xf32, #tpu.memory_space<vmem>>, %arg10: memref<48x768xbf16, #tpu.memory_space<vmem>>) attributes {dimension_semantics = [#tpu.dimension_semantics<parallel>], iteration_bounds = array<i64: 2>, scalar_prefetch = 0 : i64, scratch_operands = 2 : i64, tpu.core_type = #tpu.core_type<tc>, window_params = [{transform_indices = @transform_0, window_bounds = array<i64: 2, 1, 384>}, {pipeline_mode = #tpu.pipeline_mode<synchronous>, transform_indices = @transform_1, window_bounds = array<i64: 16, 48>}, {pipeline_mode = #tpu.pipeline_mode<synchronous>, transform_indices = @transform_2, window_bounds = array<i64: 384, 128>}, {pipeline_mode = #tpu.pipeline_mode<synchronous>, transform_indices = @transform_3, window_bounds = array<i64: 128, 128>}, {pipeline_mode = #tpu.pipeline_mode<synchronous>, transform_indices = @transform_4, window_bounds = array<i64: 16, 128>}, {pipeline_mode = #tpu.pipeline_mode<synchronous>, transform_indices = @transform_5, window_bounds = array<i64: 16, 128>}, {pipeline_mode = #tpu.pipeline_mode<synchronous>, transform_indices = @transform_6, window_bounds = array<i64: 16, 8>}, {transform_indices = @transform_7, window_bounds = array<i64: 16, 128>}]} {
    %0 = tpu.iota {dimensions = array<i32: 0>} : vector<48x384xi32>
    %c1_i32 = arith.constant 1 : i32
    %1 = vector.broadcast %c1_i32 : i32 to vector<48x384xi32>
    %2 = arith.andi %0, %1 : vector<48x384xi32>
    %c0_i32 = arith.constant 0 : i32
    %3 = vector.broadcast %c0_i32 : i32 to vector<48x384xi32>
    %4 = arith.cmpi ne, %2, %3 : vector<48x384xi32>
    %c2_i32 = arith.constant 2 : i32
    %5 = vector.broadcast %c2_i32 : i32 to vector<48x384xi32>
    %6 = arith.andi %0, %5 : vector<48x384xi32>
    %c0_i32_0 = arith.constant 0 : i32
    %7 = vector.broadcast %c0_i32_0 : i32 to vector<48x384xi32>
    %8 = arith.cmpi ne, %6, %7 : vector<48x384xi32>
    %c4_i32 = arith.constant 4 : i32
    %9 = vector.broadcast %c4_i32 : i32 to vector<48x384xi32>
    %10 = arith.andi %0, %9 : vector<48x384xi32>
    %c0_i32_1 = arith.constant 0 : i32
    %11 = vector.broadcast %c0_i32_1 : i32 to vector<48x384xi32>
    %12 = arith.cmpi ne, %10, %11 : vector<48x384xi32>
    %c8_i32 = arith.constant 8 : i32
    %13 = vector.broadcast %c8_i32 : i32 to vector<48x384xi32>
    %14 = arith.andi %0, %13 : vector<48x384xi32>
    %c0_i32_2 = arith.constant 0 : i32
    %15 = vector.broadcast %c0_i32_2 : i32 to vector<48x384xi32>
    %16 = arith.cmpi ne, %14, %15 : vector<48x384xi32>
    %c16_i32 = arith.constant 16 : i32
    %17 = vector.broadcast %c16_i32 : i32 to vector<48x384xi32>
    %18 = arith.andi %0, %17 : vector<48x384xi32>
    %c0_i32_3 = arith.constant 0 : i32
    %19 = vector.broadcast %c0_i32_3 : i32 to vector<48x384xi32>
    %20 = arith.cmpi ne, %18, %19 : vector<48x384xi32>
    %c32_i32 = arith.constant 32 : i32
    %21 = vector.broadcast %c32_i32 : i32 to vector<48x384xi32>
    %22 = arith.andi %0, %21 : vector<48x384xi32>
    %c0_i32_4 = arith.constant 0 : i32
    %23 = vector.broadcast %c0_i32_4 : i32 to vector<48x384xi32>
    %24 = arith.cmpi ne, %22, %23 : vector<48x384xi32>
    %c0 = arith.constant 0 : index
    %c0_5 = arith.constant 0 : index
    %c0_6 = arith.constant 0 : index
    %25 = vector.load %arg1[%c0, %c0_5, %c0_6] : memref<2x1x384xf32, #tpu.memory_space<vmem>>, vector<1x1x384xf32>
    %26 = vector.shape_cast %25 : vector<1x1x384xf32> to vector<1x384xf32>
    %27 = vector.shape_cast %26 : vector<1x384xf32> to vector<1x384xf32>
    %28 = vector.broadcast %27 : vector<1x384xf32> to vector<48x384xf32>
    %c20_i32 = arith.constant 20 : i32
    %29 = tpu.dynamic_rotate %28 by %c20_i32 dim 1 : vector<48x384xf32>, i32 -> vector<48x384xf32>
    %c383_i32 = arith.constant 383 : i32
    %30 = tpu.dynamic_rotate %29 by %c383_i32 dim 1 : vector<48x384xf32>, i32 -> vector<48x384xf32>
    %31 = arith.select %4, %30, %29 : vector<48x384xi1>, vector<48x384xf32>
    %c382_i32 = arith.constant 382 : i32
    %32 = tpu.dynamic_rotate %31 by %c382_i32 dim 1 : vector<48x384xf32>, i32 -> vector<48x384xf32>
    %33 = arith.select %8, %32, %31 : vector<48x384xi1>, vector<48x384xf32>
    %c380_i32 = arith.constant 380 : i32
    %34 = tpu.dynamic_rotate %33 by %c380_i32 dim 1 : vector<48x384xf32>, i32 -> vector<48x384xf32>
    %35 = arith.select %12, %34, %33 : vector<48x384xi1>, vector<48x384xf32>
    %c376_i32 = arith.constant 376 : i32
    %36 = tpu.dynamic_rotate %35 by %c376_i32 dim 1 : vector<48x384xf32>, i32 -> vector<48x384xf32>
    %37 = arith.select %16, %36, %35 : vector<48x384xi1>, vector<48x384xf32>
    %c368_i32 = arith.constant 368 : i32
    %38 = tpu.dynamic_rotate %37 by %c368_i32 dim 1 : vector<48x384xf32>, i32 -> vector<48x384xf32>
    %39 = arith.select %20, %38, %37 : vector<48x384xi1>, vector<48x384xf32>
    %c352_i32 = arith.constant 352 : i32
    %40 = tpu.dynamic_rotate %39 by %c352_i32 dim 1 : vector<48x384xf32>, i32 -> vector<48x384xf32>
    %41 = arith.select %24, %40, %39 : vector<48x384xi1>, vector<48x384xf32>
    %42 = arith.truncf %41 : vector<48x384xf32> to vector<48x384xbf16>
    %c0_7 = arith.constant 0 : index
    %c0_8 = arith.constant 0 : index
    %43 = vector.load %arg10[%c0_7, %c0_8] : memref<48x768xbf16, #tpu.memory_space<vmem>>, vector<48x384xbf16>
    tpu.vector_store %arg10[%c0_7, %c0_8], %42 {strides = array<i32>} : memref<48x768xbf16, #tpu.memory_space<vmem>>, vector<48x384xbf16>,
    %c1 = arith.constant 1 : index
    %c0_9 = arith.constant 0 : index
    %c0_10 = arith.constant 0 : index
    %44 = vector.load %arg1[%c1, %c0_9, %c0_10] : memref<2x1x384xf32, #tpu.memory_space<vmem>>, vector<1x1x384xf32>
    %45 = vector.shape_cast %44 : vector<1x1x384xf32> to vector<1x384xf32>
    %46 = vector.shape_cast %45 : vector<1x384xf32> to vector<1x384xf32>
    %47 = vector.broadcast %46 : vector<1x384xf32> to vector<48x384xf32>
    %c20_i32_11 = arith.constant 20 : i32
    %48 = tpu.dynamic_rotate %47 by %c20_i32_11 dim 1 : vector<48x384xf32>, i32 -> vector<48x384xf32>
    %c383_i32_12 = arith.constant 383 : i32
    %49 = tpu.dynamic_rotate %48 by %c383_i32_12 dim 1 : vector<48x384xf32>, i32 -> vector<48x384xf32>
    %50 = arith.select %4, %49, %48 : vector<48x384xi1>, vector<48x384xf32>
    %c382_i32_13 = arith.constant 382 : i32
    %51 = tpu.dynamic_rotate %50 by %c382_i32_13 dim 1 : vector<48x384xf32>, i32 -> vector<48x384xf32>
    %52 = arith.select %8, %51, %50 : vector<48x384xi1>, vector<48x384xf32>
    %c380_i32_14 = arith.constant 380 : i32
    %53 = tpu.dynamic_rotate %52 by %c380_i32_14 dim 1 : vector<48x384xf32>, i32 -> vector<48x384xf32>
    %54 = arith.select %12, %53, %52 : vector<48x384xi1>, vector<48x384xf32>
    %c376_i32_15 = arith.constant 376 : i32
    %55 = tpu.dynamic_rotate %54 by %c376_i32_15 dim 1 : vector<48x384xf32>, i32 -> vector<48x384xf32>
    %56 = arith.select %16, %55, %54 : vector<48x384xi1>, vector<48x384xf32>
    %c368_i32_16 = arith.constant 368 : i32
    %57 = tpu.dynamic_rotate %56 by %c368_i32_16 dim 1 : vector<48x384xf32>, i32 -> vector<48x384xf32>
    %58 = arith.select %20, %57, %56 : vector<48x384xi1>, vector<48x384xf32>
    %c352_i32_17 = arith.constant 352 : i32
    %59 = tpu.dynamic_rotate %58 by %c352_i32_17 dim 1 : vector<48x384xf32>, i32 -> vector<48x384xf32>
    %60 = arith.select %24, %59, %58 : vector<48x384xi1>, vector<48x384xf32>
    %61 = arith.truncf %60 : vector<48x384xf32> to vector<48x384xbf16>
    %c0_18 = arith.constant 0 : index
    %c384 = arith.constant 384 : index
    %62 = vector.load %arg10[%c0_18, %c384] : memref<48x768xbf16, #tpu.memory_space<vmem>>, vector<48x384xbf16>
    tpu.vector_store %arg10[%c0_18, %c384], %61 {strides = array<i32>} : memref<48x768xbf16, #tpu.memory_space<vmem>>, vector<48x384xbf16>,
    %c0_19 = arith.constant 0 : index
    %c0_20 = arith.constant 0 : index
    %63 = vector.load %arg2[%c0_19, %c0_20] : memref<16x48xbf16, #tpu.memory_space<vmem>>, vector<16x48xbf16>
    %c0_21 = arith.constant 0 : index
    %c0_22 = arith.constant 0 : index
    %64 = vector.load %arg10[%c0_21, %c0_22] : memref<48x768xbf16, #tpu.memory_space<vmem>>, vector<48x768xbf16>
    %cst = arith.constant dense<0.000000e+00> : vector<16x768xf32>
    %65 = tpu.matmul %63, %64, %cst {dimension_numbers = #tpu.dot_dimension_numbers<[1], [0], [0], [1], [0, 0, 1, 1], [], []>} : vector<16x48xbf16>, vector<48x768xbf16>, vector<16x768xf32> -> vector<16x768xf32>
    %66 = vector.extract_strided_slice %65 {offsets = [0, 0], sizes = [8, 768], strides = [1, 1]} : vector<16x768xf32> to vector<8x768xf32>
    %67 = arith.mulf %66, %66 : vector<8x768xf32>
    %68 = vector.extract_strided_slice %65 {offsets = [8, 0], sizes = [8, 768], strides = [1, 1]} : vector<16x768xf32> to vector<8x768xf32>
    %69 = arith.mulf %68, %68 : vector<8x768xf32>
    %70 = arith.addf %67, %69 : vector<8x768xf32>
    %71 = tpu.iota {dimensions = array<i32: 1>} : vector<8x384xi32>
    %c20_i32_23 = arith.constant 20 : i32
    %72 = vector.broadcast %c20_i32_23 : i32 to vector<8x384xi32>
    %73 = arith.cmpi sge, %71, %72 : vector<8x384xi32>
    %c276_i32 = arith.constant 276 : i32
    %74 = vector.broadcast %c276_i32 : i32 to vector<8x384xi32>
    %75 = arith.cmpi slt, %71, %74 : vector<8x384xi32>
    %76 = arith.andi %73, %75 : vector<8x384xi1>
    %77 = vector.extract_strided_slice %70 {offsets = [0, 0], sizes = [8, 384], strides = [1, 1]} : vector<8x768xf32> to vector<8x384xf32>
    %cst_24 = arith.constant 0.000000e+00 : f32
    %78 = vector.broadcast %cst_24 : f32 to vector<8x384xf32>
    %79 = arith.select %76, %77, %78 : vector<8x384xi1>, vector<8x384xf32>
    %c0_25 = arith.constant 0 : index
    %c0_26 = arith.constant 0 : index
    %80 = vector.load %arg9[%c0_25, %c0_26] : memref<16x384xf32, #tpu.memory_space<vmem>>, vector<8x384xf32>
    tpu.vector_store %arg9[%c0_25, %c0_26], %79 {strides = array<i32>} : memref<16x384xf32, #tpu.memory_space<vmem>>, vector<8x384xf32>,
    %81 = vector.extract_strided_slice %70 {offsets = [0, 384], sizes = [8, 384], strides = [1, 1]} : vector<8x768xf32> to vector<8x384xf32>
    %cst_27 = arith.constant 0.000000e+00 : f32
    %82 = vector.broadcast %cst_27 : f32 to vector<8x384xf32>
    %83 = arith.select %76, %81, %82 : vector<8x384xi1>, vector<8x384xf32>
    %c8 = arith.constant 8 : index
    %c0_28 = arith.constant 0 : index
    %84 = vector.load %arg9[%c8, %c0_28] : memref<16x384xf32, #tpu.memory_space<vmem>>, vector<8x384xf32>
    tpu.vector_store %arg9[%c8, %c0_28], %83 {strides = array<i32>} : memref<16x384xf32, #tpu.memory_space<vmem>>, vector<8x384xf32>,
    %c0_29 = arith.constant 0 : index
    %c0_30 = arith.constant 0 : index
    %85 = vector.load %arg9[%c0_29, %c0_30] : memref<16x384xf32, #tpu.memory_space<vmem>>, vector<16x384xf32>
    %c0_31 = arith.constant 0 : index
    %c0_32 = arith.constant 0 : index
    %86 = vector.load %arg3[%c0_31, %c0_32] : memref<384x128xf32, #tpu.memory_space<vmem>>, vector<384x128xf32>
    %cst_33 = arith.constant dense<0.000000e+00> : vector<16x128xf32>
    %87 = tpu.matmul %85, %86, %cst_33 {dimension_numbers = #tpu.dot_dimension_numbers<[1], [0], [0], [1], [0, 0, 1, 1], [], []>} : vector<16x384xf32>, vector<384x128xf32>, vector<16x128xf32> -> vector<16x128xf32>
    %cst_34 = arith.constant 9.99999974E-6 : f32
    %88 = vector.broadcast %cst_34 : f32 to vector<16x128xf32>
    %89 = arith.maximumf %87, %88 : vector<16x128xf32>
    %c0_35 = arith.constant 0 : index
    %c0_36 = arith.constant 0 : index
    %90 = vector.load %arg6[%c0_35, %c0_36] : memref<16x128xf32, #tpu.memory_space<vmem>>, vector<16x128xf32>
    %91 = arith.mulf %90, %89 : vector<16x128xf32>
    %c0_37 = arith.constant 0 : index
    %c0_38 = arith.constant 0 : index
    %92 = vector.load %arg4[%c0_37, %c0_38] : memref<128x128xf32, #tpu.memory_space<vmem>>, vector<128x128xf32>
    %cst_39 = arith.constant dense<0.000000e+00> : vector<16x128xf32>
    %93 = tpu.matmul %91, %92, %cst_39 {dimension_numbers = #tpu.dot_dimension_numbers<[1], [0], [0], [1], [0, 0, 1, 1], [], []>} : vector<16x128xf32>, vector<128x128xf32>, vector<16x128xf32> -> vector<16x128xf32>
    %c0_40 = arith.constant 0 : index
    %c0_41 = arith.constant 0 : index
    %94 = vector.load %arg5[%c0_40, %c0_41] : memref<16x128xf32, #tpu.memory_space<vmem>>, vector<16x128xf32>
    %95 = arith.mulf %94, %93 : vector<16x128xf32>
    %c0_42 = arith.constant 0 : index
    %c0_43 = arith.constant 0 : index
    %96 = vector.load %arg7[%c0_42, %c0_43] : memref<16x8xf32, #tpu.memory_space<vmem>>, vector<16x1xf32>
    %c0_44 = arith.constant 0 : index
    %c1_45 = arith.constant 1 : index
    %97 = vector.load %arg7[%c0_44, %c1_45] : memref<16x8xf32, #tpu.memory_space<vmem>>, vector<16x1xf32>
    %c0_46 = arith.constant 0 : index
    %c2 = arith.constant 2 : index
    %98 = vector.load %arg7[%c0_46, %c2] : memref<16x8xf32, #tpu.memory_space<vmem>>, vector<16x1xf32>
    %c0_47 = arith.constant 0 : index
    %c4 = arith.constant 4 : index
    %99 = vector.load %arg7[%c0_47, %c4] : memref<16x8xf32, #tpu.memory_space<vmem>>, vector<16x1xf32>
    %cst_48 = arith.constant 0.000000e+00 : f32
    %100 = vector.broadcast %cst_48 : f32 to vector<16x1xf32>
    %101 = arith.subf %100, %96 : vector<16x1xf32>
    %cst_49 = arith.constant 9.99999995E+11 : f32
    %102 = vector.broadcast %cst_49 : f32 to vector<16x128xf32>
    %103 = arith.mulf %95, %102 : vector<16x128xf32>
    %104 = math.log1p %103 : vector<16x128xf32>
    %105 = vector.broadcast %101 : vector<16x1xf32> to vector<16x128xf32>
    %106 = arith.mulf %105, %104 : vector<16x128xf32>
    %107 = math.exp %106 : vector<16x128xf32>
    %108 = vector.broadcast %99 : vector<16x1xf32> to vector<16x128xf32>
    %109 = arith.mulf %108, %107 : vector<16x128xf32>
    %110 = arith.mulf %89, %109 : vector<16x128xf32>
    %111 = vector.broadcast %97 : vector<16x1xf32> to vector<16x128xf32>
    %112 = arith.addf %110, %111 : vector<16x128xf32>
    %113 = math.sqrt %112 : vector<16x128xf32>
    %114 = vector.broadcast %98 : vector<16x1xf32> to vector<16x128xf32>
    %115 = arith.subf %113, %114 : vector<16x128xf32>
    %c0_50 = arith.constant 0 : index
    %c0_51 = arith.constant 0 : index
    %116 = vector.load %arg8[%c0_50, %c0_51] : memref<16x128xf32, #tpu.memory_space<vmem>>, vector<16x128xf32>
    tpu.vector_store %arg8[%c0_50, %c0_51], %115 {strides = array<i32>} : memref<16x128xf32, #tpu.memory_space<vmem>>, vector<16x128xf32>,
    return
  }
  func.func @transform_0(%arg0: i32) -> (i32, i32, i32) {
    %c0_i32 = arith.constant 0 : i32
    %c0_i32_0 = arith.constant 0 : i32
    %c0_i32_1 = arith.constant 0 : i32
    return %arg0, %c0_i32, %c0_i32_0 : i32, i32, i32
  }
  func.func @transform_1(%arg0: i32) -> (i32, i32) {
    %c0_i32 = arith.constant 0 : i32
    %c0_i32_0 = arith.constant 0 : i32
    %c0_i32_1 = arith.constant 0 : i32
    return %c0_i32, %c0_i32_0 : i32, i32
  }
  func.func @transform_2(%arg0: i32) -> (i32, i32) {
    %c0_i32 = arith.constant 0 : i32
    %c0_i32_0 = arith.constant 0 : i32
    %c0_i32_1 = arith.constant 0 : i32
    return %c0_i32, %c0_i32_0 : i32, i32
  }
  func.func @transform_3(%arg0: i32) -> (i32, i32) {
    %c0_i32 = arith.constant 0 : i32
    %c0_i32_0 = arith.constant 0 : i32
    %c0_i32_1 = arith.constant 0 : i32
    return %c0_i32, %c0_i32_0 : i32, i32
  }
  func.func @transform_4(%arg0: i32) -> (i32, i32) {
    %c0_i32 = arith.constant 0 : i32
    %c0_i32_0 = arith.constant 0 : i32
    %c0_i32_1 = arith.constant 0 : i32
    return %c0_i32, %c0_i32_0 : i32, i32
  }
  func.func @transform_5(%arg0: i32) -> (i32, i32) {
    %c0_i32 = arith.constant 0 : i32
    %c0_i32_0 = arith.constant 0 : i32
    %c0_i32_1 = arith.constant 0 : i32
    return %c0_i32, %c0_i32_0 : i32, i32
  }
  func.func @transform_6(%arg0: i32) -> (i32, i32) {
    %c0_i32 = arith.constant 0 : i32
    %c0_i32_0 = arith.constant 0 : i32
    %c0_i32_1 = arith.constant 0 : i32
    return %c0_i32, %c0_i32_0 : i32, i32
  }
  func.func @transform_7(%arg0: i32) -> (i32, i32) {
    %c0_i32 = arith.constant 0 : i32
    %c0_i32_0 = arith.constant 0 : i32
    return %arg0, %c0_i32 : i32, i32
  }
}

</mosaic_0001>

<bundles_post_ra>
// kernel: tpu_custom_call.1
= control target key start
LH: loop header
LB: loop body
LE: loop exit
PB: predicated region body
PF: predicated region fallthrough
CT: control target
= control target key end

     0   :  { %s4428_s0 = inlined_call_operand.hbm [shape: f32[4,1,384], index: 0, kind: input, shape index: {}]   ;;  %s4429_s1 = inlined_call_operand.hbm [shape: bf16[16,48], index: 1, kind: input, shape index: {}]   ;;  %s4430_s2 = inlined_call_operand.hbm [shape: f32[384,128], index: 2, kind: input, shape index: {}]   ;;  %s4431_s3 = inlined_call_operand.hbm [shape: f32[128,128], index: 3, kind: input, shape index: {}]   ;;  %s4432_s4 = inlined_call_operand.vmem [shape: f32[16,128], index: 4, kind: input, shape index: {}]   ;;  %s4433_s5 = inlined_call_operand.vmem [shape: f32[16,128], index: 5, kind: input, shape index: {}]   ;;  %s4434_s6 = inlined_call_operand.vmem [shape: f32[16,8], index: 6, kind: input, shape index: {}]   ;;  %s4435_s7 = inlined_call_operand.hbm [shape: f32[32,128], index: 7, kind: output, shape index: {}]  }
   0x1   :  { %4446 = sst [smem:[#allocation23_spill]] %s4429_s1 }
   0x2   :  { %12 = vsyncpa [#allocation5], 0 }
   0x3   :  { %14 = vsyncpa [#allocation5 + $0x1], 0 }
   0x4   :  { %15 = vsyncpa [#allocation8], 0 }
   0x5   :  { %16 = vsyncpa [#allocation11], 0 }
   0x6   :  { %17 = vsyncpa [#allocation6], 0 }
   0x7   :  { %19 = vsyncpa [#allocation6 + $0x1], 0  ;;  %s2943_s24 = smov 0   ;;  %s2945_s25 = smov 0  }
   0x8   :  { %s2947_s26 = smov 0   ;;  %s2949_s27 = smov 0  }
   0x9 LB: > { %s2964_s28 = sadd.s32 4294967295, %s2877_s27   ;;  %s2006_s29 = sadd.s32 4294967294, %s2877_s27   ;;  %s2877_s27 = sphi %s2949_s27, %s4515_s27   ;;  %s2873_s26 = sphi %s2947_s26, %s4514_s26   ;;  %s2869_s25 = sphi %s2945_s25, %s4513_s25   ;;  %s2865_s24 = sphi %s2943_s24, %s4512_s24  }
   0xa   : > { %p45_p0 = scmp.ne.s32.totalorder %s2869_s25, %s2865_s24  ;;  %p4436_p1 = scmp.eq.s32.totalorder %s2964_s28, 0 }
   0xb   : > { %p201_p3 = scmp.eq.s32.totalorder %s2006_s29, 1  ;;  %p2007_p5 = scmp.ge.s32.totalorder %s2877_s27, 1 }
   0xc   : > { %p2973_p4 = por %p4436_p1, %p45_p0  ;;  %p208_p7 = scmp.lt.s32.totalorder %s2877_s27, 3 }
   0xd   : > { %p2978_p6 = por %p201_p3, %p45_p0  ;;  %s2879_s10 = smov [#allocation7]  }
   0xe   : > { %s4447_s30 = scalar_select %p2973_p4, 1, 0 }
   0xf   : > { %s4448_s8 = scalar_select %p2978_p6, 1, 0 }
  0x10   : > { %p2983_p8 = pnand %p2007_p5, %p208_p7  ;;  %s220_s11 = sshll.u32 %s2879_s10, 4  ;;  %s2987_s11 = int_to_ptr.vmem [resolvable:$true] %s220_s11 }
  0x11   : > { %4449 = sst [smem:[#allocation17_spill]] %s4448_s8  ;;  %s2880_s13 = smov [#allocation9]  }
  0x12   : > { %s4450_s9 = scalar_select %p2983_p8, 1, 0 }
  0x13   : > { %p2294_p9 = pneg %p2983_p8  ;;  %s233_s14 = sshll.u32 %s2880_s13, 4  ;;  %s2998_s14 = int_to_ptr.vmem [resolvable:$true] %s233_s14 }
  0x14   : > { %s4452_s1 = sld [smem:[#allocation23_spill]] }
  0x15   : > { %p2994_p11 = pnand %p2294_p9, %p4436_p1 }
  0x17   : > { %p3008_p13 = pneg %p2994_p11 }
  0x1a   : > { %s2689_s17 = scalar_lea.hbm %s4452_s1, 128 }
  0x1b   : > { %p2690_p12 = scmp.ne.s32.totalorder %s4452_s1, %s2689_s17  ;;  %p2696_p5 = scmp.lt.u32.totalorder %s2689_s17, %s4452_s1 }
  0x1d   : > { %p2692_p0 = pnand %p3008_p13, %p2690_p12 }
  0x1f   : > { %p2693_p3 = pneg %p2692_p0 }
  0x21   : > { %p2698_p7 = pnand %p2696_p5, %p2693_p3 }
  0x23   : > { %2701 = shalt.err (!%p2698_p7)
}
  0x24   : > { %s2702_s23 = scalar_lea.vmem %s2987_s11, 128  ;;  %p2710_p2 = scmp.lt.s32.totalorder %s2987_s11, %s2987_s11 }
  0x25   : > { %p2703_p9 = scmp.ne.s32.totalorder %s2987_s11, %s2702_s23  ;;  %p2711_p6 = scmp.lt.s32.totalorder %s2702_s23, %s2702_s23 }
  0x27   : > { %p2705_p10 = pnand %p2703_p9, %p3008_p13  ;;  %p2712_p12 = por %p2711_p6, %p2710_p2 }
  0x29   : > { %p2706_p1 = pneg %p2705_p10 }
  0x2b   : > { %p2713_p0 = pnand %p2712_p12, %p2706_p1 }
  0x2d   : > { %2716 = shalt.err (!%p2713_p0)
}
  0x2e   : > { %s2881_s29 = smov 64   ;;  %s2882_s10 = smov 4  }
  0x2f   : > { %2297 = dma.hbm_to_vmem [thread:$0]  (!%p2994_p11), %s4452_s1, 128, %s2987_s11, [#allocation8], %s2881_s29, %s2881_s29, %s2882_s10  }
  0x30   : > { %s2717_s18 = scalar_lea.hbm %s4430_s2, 6144 }
  0x31   : > { %p2718_p2 = scmp.ne.s32.totalorder %s4430_s2, %s2717_s18  ;;  %p2724_p10 = scmp.lt.u32.totalorder %s2717_s18, %s4430_s2 }
  0x33   : > { %p2720_p1 = pnand %p2718_p2, %p3008_p13 }
  0x35   : > { %p2721_p6 = pneg %p2720_p1 }
  0x37   : > { %p2726_p3 = pnand %p2724_p10, %p2721_p6 }
  0x39   : > { %2729 = shalt.err (!%p2726_p3)
}
  0x3a   : > { %s2730_s11 = scalar_lea.vmem %s2998_s14, 6144  ;;  %p2738_p12 = scmp.lt.s32.totalorder %s2998_s14, %s2998_s14 }
  0x3b   : > { %p2731_p5 = scmp.ne.s32.totalorder %s2998_s14, %s2730_s11  ;;  %p2739_p0 = scmp.lt.s32.totalorder %s2730_s11, %s2730_s11 }
  0x3d   : > { %p2733_p7 = pnand %p2731_p5, %p3008_p13  ;;  %p2740_p2 = por %p2739_p0, %p2738_p12 }
  0x3f   : > { %p2734_p9 = pneg %p2733_p7 }
  0x41   : > { %p2741_p1 = pnand %p2740_p2, %p2734_p9 }
  0x43   : > { %2744 = shalt.err (!%p2741_p1)
}
  0x44   : > { %s2883_s29 = smov 128   ;;  %s2884_s10 = smov 8  }
  0x45   : > { %2300 = dma.hbm_to_vmem [thread:$0]  (!%p2994_p11), %s4430_s2, 6144, %s2998_s14, [#allocation8], %s2883_s29, %s2883_s29, %s2884_s10  }
  0x46   : > { %s2885_s16 = smov [#allocation10]   ;;  %s3053_s18 = sadd.s32 1, %s2877_s27  }
  0x47   : > { %s246_s17 = sshll.u32 %s2885_s16, 4  ;;  %s2745_s22 = scalar_lea.hbm %s4431_s3, 2048  ;;  %s247_s17 = int_to_ptr.vmem [resolvable:$true] %s246_s17 }
  0x48   : > { %p2746_p6 = scmp.ne.s32.totalorder %s4431_s3, %s2745_s22  ;;  %p2752_p5 = scmp.lt.u32.totalorder %s2745_s22, %s4431_s3 }
  0x4a   : > { %p2748_p10 = pnand %p2746_p6, %p3008_p13 }
  0x4c   : > { %p2749_p3 = pneg %p2748_p10 }
  0x4e   : > { %p2754_p7 = pnand %p2752_p5, %p2749_p3 }
  0x50   : > { %2757 = shalt.err (!%p2754_p7)
}
  0x51   : > { %s2758_s14 = scalar_lea.vmem %s247_s17, 2048  ;;  %p2766_p2 = scmp.lt.s32.totalorder %s247_s17, %s247_s17 }
  0x52   : > { %p2759_p9 = scmp.ne.s32.totalorder %s247_s17, %s2758_s14  ;;  %p2767_p1 = scmp.lt.s32.totalorder %s2758_s14, %s2758_s14 }
  0x54   : > { %p2761_p12 = pnand %p2759_p9, %p3008_p13  ;;  %p2768_p4 = por %p2767_p1, %p2766_p2 }
  0x56   : > { %p2762_p0 = pneg %p2761_p12 }
  0x58   : > { %p2769_p8 = pnand %p2768_p4, %p2762_p0 }
  0x5a   : > { %2772 = shalt.err (!%p2769_p8)
}
  0x5b   : > { %2303 = dma.hbm_to_vmem [thread:$0]  (!%p2994_p11), %s4431_s3, 2048, %s247_s17, [#allocation11], %s2883_s29, %s2883_s29, %s2884_s10  }
  0x5c   : > { %s29_s1 = ssub.s32 %s2877_s27, %s3053_s18  ;;  %s32_s8 = sadd.s32 1, %s2873_s26 }
  0x5d   : > { %p30_p4 = scmp.eq.s32.totalorder %s29_s1, 0  ;;  %p39_p8 = scmp.ne.s32.totalorder %s2873_s26, %s2869_s25 }
  0x5e   : > { %p40_p13 = scmp.eq.s32.totalorder %s2877_s27, 0  ;;  %p2315_p6 = scmp.lt.s32.totalorder %s2877_s27, 2 }
  0x5f   : > { %s3081_s12 = scalar_select %p30_p4, %s2873_s26, %s32_s8  }
  0x60   : > { %p41_p10 = por %p40_p13, %p39_p8  ;;  %p4454_p3 = scmp.eq.s32.totalorder %s2964_s28, 1 }
  0x61   : > { %s269_s16 = sand.u32 1, %s2873_s26   ;;  %s2276_s19 = smul.u32 96, %s2877_s27 }
  0x62   : > { %p3085_p5 = por %p4454_p3, %p39_p8  ;;  %s2275_s21 = smul.u32 6, %s269_s16 }
  0x63   : > { %s3094_s29 = scalar_lea.hbm %s4428_s0, %s2276_s19  ;;  %p3096_p11 = pnand %p2315_p6, %p41_p10 }
  0x64   : > { %s273_s17 = scalar_lea.vmem [#allocation4], %s2275_s21  ;;  %s3102_s14 = scalar_lea.sflag [#allocation5], %s269_s16 }
  0x65   : > { %s281_s11 = sshll.u32 %s273_s17, 4  ;;  %s2773_s13 = scalar_lea.hbm %s3094_s29, 96  ;;  %s3100_s11 = int_to_ptr.vmem [resolvable:$true] %s281_s11 }
  0x66   : > { %p2774_p7 = scmp.ne.s32.totalorder %s3094_s29, %s2773_s13  ;;  %p2775_p9 = pneg %p3096_p11 }
  0x67   : > { %s2778_s8 = scalar_lea.hbm %s4428_s0, 192  ;;  %p2779_p2 = scmp.lt.u32.totalorder %s3094_s29, %s4428_s0 }
  0x68   : > { %p2776_p12 = pnand %p2775_p9, %p2774_p7  ;;  %p2780_p1 = scmp.lt.u32.totalorder %s2778_s8, %s2773_s13 }
  0x69   : > { %p2782_p8 = scmp.lt.u32.totalorder %s2773_s13, %s3094_s29 }
  0x6a   : > { %p2777_p0 = pneg %p2776_p12  ;;  %p2781_p4 = por %p2780_p1, %p2779_p2 }
  0x6c   : > { %p2783_p13 = por %p2782_p8, %p2781_p4 }
  0x6e   : > { %p2784_p6 = pnand %p2783_p13, %p2777_p0 }
  0x70   : > { %2787 = shalt.err (!%p2784_p6)
}
  0x71   : > { %s2788_s16 = scalar_lea.vmem %s3100_s11, 96  ;;  %s2886_s21 = smov [#allocation4]  }
  0x72   : > { %p2789_p10 = scmp.ne.s32.totalorder %s3100_s11, %s2788_s16  ;;  %s2793_s23 = sshll.u32 %s2886_s21, 4  ;;  %s2794_s23 = int_to_ptr.vmem [resolvable:$false] %s2793_s23 }
  0x73   : > { %s2795_s17 = scalar_lea.vmem %s2794_s23, 192  ;;  %p2796_p12 = scmp.lt.s32.totalorder %s3100_s11, %s2794_s23 }
  0x74   : > { %p2791_p3 = pnand %p2789_p10, %p2775_p9  ;;  %p2797_p2 = scmp.lt.s32.totalorder %s2795_s17, %s2788_s16 }
  0x76   : > { %p2792_p7 = pneg %p2791_p3  ;;  %p2798_p1 = por %p2797_p2, %p2796_p12 }
  0x78   : > { %p2799_p4 = pnand %p2798_p1, %p2792_p7 }
  0x7a   : > { %2802 = shalt.err (!%p2799_p4)
}
  0x7b   : > { %s2887_s13 = smov 48   ;;  %s2888_s15 = smov 3  }
  0x7c   : > { %2307 = dma.hbm_to_vmem [thread:$0]  (!%p3096_p11), %s3094_s29, 96, %s3100_s11, %s3102_s14, %s2887_s13, %s2887_s13, %s2888_s15  }
  0x7d   : > { %p4457_p9 = scmp.ne.s32.totalorder %s4450_s9, 0 }
  0x7f   : > { %293 = sbr.rel (%p4457_p9) target bundleno = 1667 (0x683), region = 48 }
  0x86   : > { %s3133_s1 = sand.u32 1, %s2869_s25   ;;  %p4458_p0 = scmp.ne.s32.totalorder %s4447_s30, 0 }
  0x87   : > { %s2277_s8 = smul.u32 6, %s3133_s1  ;;  %s296_s19 = scalar_lea.sflag [#allocation5], %s3133_s1 }
  0x89   : > { %s299_s22 = scalar_lea.vmem [#allocation4], %s2277_s8 }
  0x8a   : > { %2848 = dma.done.wait (%p4458_p0), %s296_s19, 96  }
  0x8b   : > { %2850 = vsyncadd (%p4458_p0), %s296_s19, 4294967200  ;;  %p4459_p8 = scmp.eq.s32.totalorder %s2964_s28, 0 }
  0x8d   : > { %2852 = dma.done.wait (%p4459_p8), [#allocation8], 6272   ;;  %p4460_p11 = pmov %p4459_p8 }
  0x8e   : > { %p4461_p13 = pmov %p4459_p8 }
  0x8f   : > { %2854 = vsyncadd (%p4460_p11), [#allocation8], 4294961024 }
  0x90   : > { %2856 = dma.done.wait (%p4461_p13), [#allocation11], 2048   ;;  %p4462_p6 = pmov %p4459_p8 }
  0x91   : > { %v345_v0 = vlaneseq  ;;  %v424_v5 = vld [vmem:[%s299_s22] sm:$0x7]  ;;  %v2020_v6 = vld [vmem:[%s299_s22 + $0x3] sm:$0x7]  ;;  %s2889_s30 = smov 20   ;;  %s2890_s9 = smov 127  }
  0x92   : > { %2858 = vsyncadd (%p4462_p6), [#allocation11], 4294965248  ;;  %s2891_s29 = smov 126   ;;  %s2892_s10 = smov 124  }
  0x93   : > { %v3149_v1 = vshrl.u32 %v345_v0, 7  ;;  %v3154_v15 = vand.u32 127, %v345_v0  ;;  %s2893_s11 = smov 120   ;;  %s2894_s14 = smov 112  }
  0x94   : > { %s2895_s16 = smov 96   ;;  %s2030_s21 = sshll.u32 %s2964_s28, 8 }
  0x95   : > { %4463 = vst [vmem:[#allocation18_spill] sm:$0xff] %v3149_v1  ;;  %v428_v2 = vsub.s32 0, %v3149_v1  ;;  %v432_v3 = vsub.s32 1, %v3149_v1  ;;  %v436_v4 = vsub.s32 2, %v3149_v1  ;;  %vm449_vm0 = vcmp.lt.s32.totalorder %v3154_v15, 20  ;;  %s4384_s28 = scalar_lea.hbm %s4435_s7, %s2030_s21  ;;  %s1891_s13 = scalar_lea.sflag [#allocation6], %s3133_s1 }
  0x96   : > { %v3188_v32 = vadd.s32 24, %v3149_v1  ;;  %v3191_v33 = vadd.s32 40, %v3149_v1  ;;  %v3196_v36 = vadd.s32 8, %v3149_v1  ;;  %v3199_v37 = vadd.s32 16, %v3149_v1  ;;  %s2900_s8 = smov [#allocation12]  }
  0x97   : > { %v429_v7 = vrot.slane %v424_v5, %v428_v2  ;;  %v433_v8 = vrot.slane %v424_v5, %v432_v3  ;;  %v870_v9 = vrot.slane %v2020_v6, %v428_v2  ;;  %v874_v10 = vrot.slane %v2020_v6, %v432_v3  ;;  %s2807_s19 = sshll.u32 %s2900_s8, 4  ;;  %s2808_s19 = int_to_ptr.vmem [resolvable:$false] %s2807_s19 }
  0x98   : > { %v437_v13 = vrot.slane %v424_v5, %v436_v4  ;;  %v878_v14 = vrot.slane %v2020_v6, %v436_v4  ;;  %v355_v34 = vand.u32 1, %v3188_v32  ;;  %v357_v35 = vand.u32 1, %v3191_v33  ;;  %s2809_s22 = scalar_lea.vmem %s2808_s19, 512 }
  0x99   : > { %v2374_v11 = vpack.i.bf16 %v433_v8, %v429_v7  ;;  %v2379_v12 = vpack.i.bf16 %v874_v10, %v870_v9  ;;  %vm459_vm1 = vcmp.lt.s32.totalorder %v3154_v15, 127  ;;  %v353_v44 = vand.u32 1, %v3196_v36 }
  0x9a   : > { %vm3202_vm2 = vcmp.ne.s32.totalorder %v355_v34, 0  ;;  %vm3206_vm3 = vcmp.ne.s32.totalorder %v357_v35, 0  ;;  %v354_v45 = vand.u32 1, %v3199_v37  ;;  %v3225_v49 = vadd.s32 32, %v3149_v1 }
  0x9b   : > { %2375 = vrot.lane.b32.xlu0 %v2374_v11, %s2889_s30  ;;  %2380 = vrot.lane.b32.xlu1 %v2379_v12, %s2889_s30  ;;  %vm3293_vm4 = vcmp.ne.s32.totalorder %v353_v44, 0  ;;  %vm517_vm8 = vcmp.lt.s32.totalorder %v3154_v15, 126  ;;  %vm590_vm14 = vcmp.lt.s32.totalorder %v3154_v15, 124 }
  0x9c   : > { %v356_v4 = vand.u32 1, %v3225_v49  ;;  %vm3297_vm5 = vcmp.ne.s32.totalorder %v354_v45, 0 }
  0x9e   : > { %vm3336_vm6 = vcmp.ne.s32.totalorder %v356_v4, 0 }
  0x9f   : > { %445 = vrot.lane.b32.xlu0 %v437_v13, %s2889_s30  ;;  %886 = vrot.lane.b32.xlu1 %v878_v14, %s2889_s30 }
 0x10d   : > { %v2376_v16 = vpop.permute.xlu0 %2375  ;;  %v2381_v17 = vpop.permute.xlu1 %2380 }
 0x10e   : > { %v2378_v18 = vunpack.i.h.bf16 %v2376_v16  ;;  %v2377_v19 = vunpack.i.l.bf16 %v2376_v16  ;;  %v2383_v20 = vunpack.i.h.bf16 %v2381_v17  ;;  %v2382_v21 = vunpack.i.l.bf16 %v2381_v17 }
 0x10f   : > { %v352_v17 = vand.u32 1, %v3149_v1  ;;  %v369_v16 = vand.u32 2, %v3191_v33 }
 0x110   : > { %v3159_v22 = vsel %vm449_vm0, %v2377_v19, %v2378_v18  ;;  %v3163_v25 = vsel %vm449_vm0, %v2382_v21, %v2383_v20 }
 0x111   : > { %v446_v23 = vpop.permute.xlu0 %445  ;;  %v887_v24 = vpop.permute.xlu1 %886  ;;  %vm3401_vm7 = vcmp.ne.s32.totalorder %v352_v17, 0  ;;  %vm3487_vm10 = vcmp.ne.s32.totalorder %v369_v16, 0 }
 0x112   : > { %v3167_v26 = vsel %vm449_vm0, %v2378_v18, %v446_v23  ;;  %v3171_v27 = vsel %vm449_vm0, %v446_v23, %v2377_v19  ;;  %v3175_v28 = vsel %vm449_vm0, %v887_v24, %v2382_v21  ;;  %v3182_v30 = vsel %vm449_vm0, %v2383_v20, %v887_v24 }
 0x113   : > { %457 = vrot.lane.b32.xlu1 %v3167_v26, %s2890_s9  ;;  %v2384_v29 = vpack.i.bf16 %v3159_v22, %v3171_v27  ;;  %v2389_v31 = vpack.i.bf16 %v3163_v25, %v3175_v28 }
 0x115   : > { %2385 = vrot.lane.b32.xlu0 %v2384_v29, %s2890_s9 }
 0x117   : > { %895 = vrot.lane.b32.xlu1 %v3182_v30, %s2890_s9 }
 0x119   : > { %2390 = vrot.lane.b32.xlu0 %v2389_v31, %s2890_s9 }
 0x185   : > { %v458_v38 = vpop.permute.xlu1 %457 }
 0x187   : > { %v2386_v39 = vpop.permute.xlu0 %2385 }
 0x188   : > { %v2388_v40 = vunpack.i.h.bf16 %v2386_v39  ;;  %v2387_v41 = vunpack.i.l.bf16 %v2386_v39 }
 0x189   : > { %v896_v51 = vpop.permute.xlu1 %895 }
 0x18a   : > { %v3214_v46 = vsel %vm459_vm1, %v2388_v40, %v458_v38  ;;  %v3218_v47 = vsel %vm459_vm1, %v2387_v41, %v2388_v40  ;;  %v3222_v48 = vsel %vm459_vm1, %v458_v38, %v2387_v41 }
 0x18b   : > { %v2391_v50 = vpop.permute.xlu0 %2390  ;;  %v3231_v52 = vsel %vm3202_vm2, %v3222_v48, %v3167_v26  ;;  %v3237_v53 = vsel %vm3206_vm3, %v3218_v47, %v3171_v27  ;;  %v3243_v54 = vsel %vm3202_vm2, %v3218_v47, %v3171_v27  ;;  %v3249_v55 = vsel %vm3202_vm2, %v3214_v46, %v3159_v22 }
 0x18c   : > { %v2393_v56 = vunpack.i.h.bf16 %v2391_v50  ;;  %v2392_v57 = vunpack.i.l.bf16 %v2391_v50  ;;  %v2399_v58 = vpack.i.bf16 %v3237_v53, %v3231_v52  ;;  %v2394_v59 = vpack.i.bf16 %v3249_v55, %v3243_v54 }
 0x18d   : > { %v3259_v60 = vsel %vm3206_vm3, %v3214_v46, %v3159_v22  ;;  %v3265_v61 = vsel %vm3206_vm3, %v3222_v48, %v3167_v26  ;;  %v3328_v13 = vsel %vm3293_vm4, %v3222_v48, %v3167_v26  ;;  %v3334_v14 = vsel %vm3297_vm5, %v3218_v47, %v3171_v27 }
 0x18e   : > { %v3269_v62 = vsel %vm459_vm1, %v2392_v57, %v2393_v56  ;;  %v897_v63 = vsel %vm459_vm1, %v2393_v56, %v896_v51  ;;  %v899_v0 = vsel %vm459_vm1, %v896_v51, %v2392_v57  ;;  %2400 = vrot.lane.b32.xlu1 %v2399_v58, %s2891_s29  ;;  %2395 = vrot.lane.b32.xlu0 %v2394_v59, %s2891_s29 }
 0x18f   : > { %v3281_v2 = vsel %vm3202_vm2, %v3269_v62, %v3175_v28  ;;  %v3286_v3 = vsel %vm3202_vm2, %v897_v63, %v3163_v25  ;;  %v2404_v6 = vpack.i.bf16 %v3265_v61, %v3259_v60  ;;  %v3304_v9 = vsel %vm3206_vm3, %v897_v63, %v3163_v25 }
 0x190   : > { %v2409_v5 = vpack.i.bf16 %v3286_v3, %v3281_v2  ;;  %v3309_v10 = vsel %vm3206_vm3, %v899_v0, %v3182_v30  ;;  %v3314_v11 = vsel %vm3202_vm2, %v899_v0, %v3182_v30  ;;  %v3320_v12 = vsel %vm3206_vm3, %v3269_v62, %v3175_v28 }
 0x191   : > { %v2419_v18 = vpack.i.bf16 %v3309_v10, %v3304_v9  ;;  %v2414_v19 = vpack.i.bf16 %v3320_v12, %v3314_v11  ;;  %v3349_v20 = vsel %vm3293_vm4, %v3218_v47, %v3171_v27  ;;  %v3355_v21 = vsel %vm3297_vm5, %v3269_v62, %v3175_v28 }
 0x192   : > { %2410 = vrot.lane.b32.xlu1 %v2409_v5, %s2891_s29  ;;  %2405 = vrot.lane.b32.xlu0 %v2404_v6, %s2891_s29  ;;  %4474 = vst [vmem:[#allocation19_spill] sm:$0xff] %v3355_v21  ;;  %v3361_v23 = vsel %vm3293_vm4, %v3214_v46, %v3159_v22  ;;  %v3366_v24 = vsel %vm3297_vm5, %v897_v63, %v3163_v25 }
 0x193   : > { %4475 = vst [vmem:[#allocation20_spill] sm:$0xff] %v3366_v24  ;;  %v3371_v29 = vsel %vm3293_vm4, %v897_v63, %v3163_v25  ;;  %v3376_v31 = vsel %vm3293_vm4, %v899_v0, %v3182_v30  ;;  %v3383_v34 = vsel %vm3297_vm5, %v899_v0, %v3182_v30  ;;  %v3389_v35 = vsel %vm3336_vm6, %v3269_v62, %v3175_v28 }
 0x194   : > { %v3394_v38 = vsel %vm3336_vm6, %v897_v63, %v3163_v25  ;;  %v3399_v39 = vsel %vm3336_vm6, %v899_v0, %v3182_v30  ;;  %v2429_v41 = vpack.i.bf16 %v3334_v14, %v3328_v13  ;;  %v2424_v42 = vpack.i.bf16 %v3361_v23, %v3349_v20 }
 0x195   : > { %v3413_v43 = vsel %vm3336_vm6, %v3218_v47, %v3171_v27  ;;  %v3419_v44 = vsel %vm3336_vm6, %v3214_v46, %v3159_v22  ;;  %v3425_v45 = vsel %vm3297_vm5, %v3214_v46, %v3159_v22  ;;  %v3431_v50 = vsel %vm3297_vm5, %v3222_v48, %v3167_v26 }
 0x196   : > { %2420 = vrot.lane.b32.xlu1 %v2419_v18, %s2891_s29  ;;  %2415 = vrot.lane.b32.xlu0 %v2414_v19, %s2891_s29  ;;  %v3436_v51 = vsel %vm3401_vm7, %v897_v63, %v3163_v25  ;;  %v3441_v56 = vsel %vm3401_vm7, %v899_v0, %v3182_v30  ;;  %v2439_v57 = vpack.i.bf16 %v3419_v44, %v3413_v43  ;;  %v367_v63 = vand.u32 2, %v3188_v32 }
 0x197   : > { %4478 = vst [vmem:[#allocation21_spill] sm:$0xff] %v3441_v56  ;;  %v2434_v58 = vpack.i.bf16 %v3431_v50, %v3425_v45  ;;  %v3453_v25 = vsel %vm3293_vm4, %v3269_v62, %v3175_v28  ;;  %v3461_v30 = vsel %vm3336_vm6, %v3222_v48, %v3167_v26  ;;  %vm663_vm4 = vcmp.lt.s32.totalorder %v3154_v15, 120 }
 0x198   : > { %v2444_v59 = vpack.i.bf16 %v3453_v25, %v3461_v30  ;;  %vm3468_vm9 = vcmp.ne.s32.totalorder %v367_v63, 0 }
 0x19a   : > { %2430 = vrot.lane.b32.xlu1 %v2429_v41, %s2891_s29  ;;  %2425 = vrot.lane.b32.xlu0 %v2424_v42, %s2891_s29 }
 0x19e   : > { %2440 = vrot.lane.b32.xlu1 %v2439_v57, %s2891_s29  ;;  %2435 = vrot.lane.b32.xlu0 %v2434_v58, %s2891_s29 }
 0x1a2   : > { %2445 = vrot.lane.b32.xlu0 %v2444_v59, %s2891_s29 }
 0x200   : > { %v2401_v0 = vpop.permute.xlu1 %2400  ;;  %v2396_v4 = vpop.permute.xlu0 %2395 }
 0x201   : > { %v2402_v6 = vunpack.i.l.bf16 %v2401_v0  ;;  %v2398_v7 = vunpack.i.h.bf16 %v2396_v4  ;;  %v2397_v8 = vunpack.i.l.bf16 %v2396_v4  ;;  %v2403_v58 = vunpack.i.h.bf16 %v2401_v0 }
 0x203   : > { %v521_v17 = vsel %vm517_vm8, %v2398_v7, %v2402_v6  ;;  %v527_v18 = vsel %vm517_vm8, %v2397_v8, %v2398_v7  ;;  %v533_v7 = vsel %vm517_vm8, %v2402_v6, %v2397_v8 }
 0x204   : > { %v2411_v19 = vpop.permute.xlu1 %2410  ;;  %v2406_v41 = vpop.permute.xlu0 %2405  ;;  %v3480_v42 = vsel %vm3468_vm9, %v527_v18, %v3243_v54  ;;  %v3485_v57 = vsel %vm3468_vm9, %v521_v17, %v3249_v55 }
 0x205   : > { %v2408_v59 = vunpack.i.h.bf16 %v2406_v41  ;;  %v2407_v63 = vunpack.i.l.bf16 %v2406_v41  ;;  %v2449_v1 = vpack.i.bf16 %v3485_v57, %v3480_v42 }
 0x207   : > { %v535_v54 = vsel %vm517_vm8, %v2408_v59, %v2403_v58  ;;  %v523_v55 = vsel %vm517_vm8, %v2407_v63, %v2408_v59  ;;  %v529_v0 = vsel %vm517_vm8, %v2403_v58, %v2407_v63  ;;  %2450 = vrot.lane.b32.xlu1 %v2449_v1, %s2892_s10  ;;  %v3520_v1 = vsel %vm3468_vm9, %v533_v7, %v3231_v52 }
 0x208   : > { %v2421_v16 = vpop.permute.xlu1 %2420  ;;  %v2416_v17 = vpop.permute.xlu0 %2415  ;;  %v3505_v6 = vsel %vm3487_vm10, %v523_v55, %v3259_v60  ;;  %v3510_v8 = vsel %vm3487_vm10, %v535_v54, %v3265_v61  ;;  %v3515_v18 = vsel %vm3487_vm10, %v529_v0, %v3237_v53  ;;  %v2413_v58 = vunpack.i.h.bf16 %v2411_v19 }
 0x209   : > { %v2417_v41 = vunpack.i.l.bf16 %v2416_v17  ;;  %v2412_v59 = vunpack.i.l.bf16 %v2411_v19  ;;  %v2464_v60 = vpack.i.bf16 %v3510_v8, %v3505_v6  ;;  %v2454_v61 = vpack.i.bf16 %v3515_v18, %v3520_v1 }
 0x20a   : > { %v2422_v63 = vunpack.i.l.bf16 %v2421_v16  ;;  %v2418_v54 = vunpack.i.h.bf16 %v2416_v17  ;;  %v2469_v7 = vpack.i.bf16 %v3366_v24, %v3355_v21  ;;  %v2459_v0 = vpack.i.bf16 %v3376_v31, %v3371_v29 }
 0x20b   : > { %v957_v53 = vsel %vm517_vm8, %v2413_v58, %v2417_v41  ;;  %2465 = vrot.lane.b32.xlu1 %v2464_v60, %s2892_s10  ;;  %2455 = vrot.lane.b32.xlu0 %v2454_v61, %s2892_s10  ;;  %v963_v19 = vsel %vm517_vm8, %v2412_v59, %v2413_v58  ;;  %v2423_v56 = vunpack.i.h.bf16 %v2421_v16  ;;  %v969_v61 = vsel %vm517_vm8, %v2417_v41, %v2412_v59 }
 0x20c   : > { %v2431_v55 = vpop.permute.xlu1 %2430  ;;  %v2426_v52 = vpop.permute.xlu0 %2425  ;;  %v3539_v17 = vsel %vm3468_vm9, %v957_v53, %v3286_v3  ;;  %v965_v60 = vsel %vm517_vm8, %v2418_v54, %v2422_v63  ;;  %v3550_v16 = vsel %vm3468_vm9, %v963_v19, %v3281_v2  ;;  %v2474_v53 = vpack.i.bf16 %v3389_v35, %v3383_v34 }
 0x20d   : > { %4483 = vst [vmem:[#allocation22_spill] sm:$0xff] %v3550_v16  ;;  %v2479_v3 = vpack.i.bf16 %v3539_v17, %v3550_v16  ;;  %v365_v24 = vand.u32 2, %v3196_v36  ;;  %v959_v41 = vsel %vm517_vm8, %v2422_v63, %v2423_v56  ;;  %v3562_v59 = vsel %vm3468_vm9, %v969_v61, %v3314_v11 }
 0x20e   : > { %v3567_v2 = vsel %vm3487_vm10, %v965_v60, %v3320_v12  ;;  %v971_v19 = vsel %vm517_vm8, %v2423_v56, %v2418_v54  ;;  %v2427_v16 = vunpack.i.l.bf16 %v2426_v52  ;;  %v3580_v12 = vsel %vm3401_vm7, %v3218_v47, %v3171_v27 }
 0x20f   : > { %2470 = vrot.lane.b32.xlu1 %v2469_v7, %s2891_s29  ;;  %2460 = vrot.lane.b32.xlu0 %v2459_v0, %s2891_s29  ;;  %v2432_v7 = vunpack.i.l.bf16 %v2431_v55  ;;  %v2428_v0 = vunpack.i.h.bf16 %v2426_v52  ;;  %v2484_v56 = vpack.i.bf16 %v3399_v39, %v3394_v38  ;;  %v2489_v54 = vpack.i.bf16 %v3567_v2, %v3562_v59 }
 0x210   : > { %v2436_v58 = vpop.permute.xlu0 %2435  ;;  %v2441_v21 = vpop.permute.xlu1 %2440  ;;  %v3590_v52 = vsel %vm3401_vm7, %v3214_v46, %v3159_v22  ;;  %vm3592_vm11 = vcmp.ne.s32.totalorder %v365_v24, 0  ;;  %v3603_v47 = vsel %vm3487_vm10, %v959_v41, %v3304_v9  ;;  %v3608_v61 = vsel %vm3487_vm10, %v971_v19, %v3309_v10 }
 0x211   : > { %v2442_v5 = vunpack.i.l.bf16 %v2441_v21  ;;  %v366_v22 = vand.u32 2, %v3199_v37  ;;  %v519_v46 = vsel %vm517_vm8, %v2428_v0, %v2432_v7  ;;  %v525_v24 = vsel %vm517_vm8, %v2427_v16, %v2428_v0 }
 0x212   : > { %v2433_v9 = vunpack.i.h.bf16 %v2431_v55  ;;  %v2494_v4 = vpack.i.bf16 %v3608_v61, %v3603_v47  ;;  %v2499_v10 = vpack.i.bf16 %v3590_v52, %v3580_v12  ;;  %v3625_v41 = vsel %vm3401_vm7, %v3269_v62, %v3175_v28 }
 0x213   : > { %2480 = vrot.lane.b32.xlu1 %v2479_v3, %s2892_s10  ;;  %2475 = vrot.lane.b32.xlu0 %v2474_v53, %s2891_s29  ;;  %v2438_v3 = vunpack.i.h.bf16 %v2436_v58  ;;  %v2437_v53 = vunpack.i.l.bf16 %v2436_v58  ;;  %v3631_v58 = vsel %vm3401_vm7, %v3222_v48, %v3167_v26  ;;  %v3636_v55 = vsel %vm3592_vm11, %v525_v24, %v3349_v20 }
 0x214   : > { %v3573_v63 = vpop.permute.xlu0 %2445  ;;  %v3641_v19 = vsel %vm3592_vm11, %v519_v46, %v3361_v23  ;;  %vm3651_vm12 = vcmp.ne.s32.totalorder %v366_v22, 0  ;;  %v2504_v20 = vpack.i.bf16 %v3625_v41, %v3631_v58  ;;  %v531_v23 = vsel %vm517_vm8, %v2432_v7, %v2427_v16 }
 0x215   : > { %v2447_v11 = vunpack.i.l.bf16 %v3573_v63  ;;  %v532_v28 = vsel %vm517_vm8, %v2438_v3, %v2433_v9  ;;  %v520_v62 = vsel %vm517_vm8, %v2437_v53, %v2438_v3  ;;  %v526_v26 = vsel %vm517_vm8, %v2433_v9, %v2437_v53 }
 0x216   : > { %v2443_v40 = vunpack.i.h.bf16 %v2441_v21  ;;  %v2509_v0 = vpack.i.bf16 %v3641_v19, %v3636_v55  ;;  %v3670_v22 = vsel %vm3651_vm12, %v520_v62, %v3425_v45  ;;  %v3675_v16 = vsel %vm3651_vm12, %v532_v28, %v3431_v50 }
 0x217   : > { %v3598_v27 = vsel %vm517_vm8, %v2447_v11, %v2442_v5  ;;  %2485 = vrot.lane.b32.xlu1 %v2484_v56, %s2891_s29  ;;  %2490 = vrot.lane.b32.xlu0 %v2489_v54, %s2892_s10  ;;  %v368_v56 = vand.u32 2, %v3225_v49  ;;  %v3665_v54 = vsel %vm3651_vm12, %v526_v26, %v3334_v14  ;;  %v3684_v14 = vsel %vm3592_vm11, %v531_v23, %v3328_v13 }
 0x218   : > { %v522_v21 = vsel %vm517_vm8, %v2443_v40, %v2447_v11  ;;  %v528_v45 = vsel %vm517_vm8, %v2442_v5, %v2443_v40  ;;  %v2514_v7 = vpack.i.bf16 %v3665_v54, %v3684_v14  ;;  %v2519_v50 = vpack.i.bf16 %v3675_v16, %v3670_v22 }
 0x219   : > { %vm3692_vm13 = vcmp.ne.s32.totalorder %v368_v56, 0  ;;  %v379_v3 = vand.u32 4, %v3188_v32  ;;  %vm736_vm7 = vcmp.lt.s32.totalorder %v3154_v15, 112  ;;  %vm1321_vm9 = vcmask 392192  }
 0x21a   : > { %v3699_v46 = vsel %vm3692_vm13, %v522_v21, %v3419_v44  ;;  %v3706_v13 = vsel %vm3692_vm13, %v528_v45, %v3413_v43  ;;  %v381_v43 = vand.u32 4, %v3191_v33  ;;  %v2448_v21 = vunpack.i.h.bf16 %v3573_v63 }
 0x21b   : > { %2495 = vrot.lane.b32.xlu0 %v2494_v4, %s2892_s10  ;;  %2500 = vrot.lane.b32.xlu1 %v2499_v10, %s2891_s29  ;;  %v2524_v5 = vpack.i.bf16 %v3699_v46, %v3706_v13  ;;  %vm3713_vm15 = vcmp.ne.s32.totalorder %v379_v3, 0  ;;  %v4497_v3 = vld [vmem:[#allocation22_spill] sm:$0xff]  ;;  %vm1474_vm10 = vcmp.ge.s32.totalorder %v3154_v15, 20 }
 0x21c   : > { %vm3733_vm0 = vcmp.ne.s32.totalorder %v381_v43, 0 }
 0x21f   : > { %2505 = vrot.lane.b32.xlu0 %v2504_v20, %s2891_s29  ;;  %2510 = vrot.lane.b32.xlu1 %v2509_v0, %s2892_s10 }
 0x223   : > { %2515 = vrot.lane.b32.xlu0 %v2514_v7, %s2892_s10  ;;  %2520 = vrot.lane.b32.xlu1 %v2519_v50, %s2892_s10 }
 0x227   : > { %2525 = vrot.lane.b32.xlu0 %v2524_v5, %s2892_s10 }
 0x279   : > { %v2451_v24 = vpop.permute.xlu1 %2450 }
 0x27a   : > { %v2453_v53 = vunpack.i.h.bf16 %v2451_v24  ;;  %v2452_v44 = vunpack.i.l.bf16 %v2451_v24 }
 0x27c   : > { %v600_v62 = vsel %vm590_vm14, %v2452_v44, %v2453_v53 }
 0x27d   : > { %v2466_v9 = vpop.permute.xlu1 %2465  ;;  %v2456_v4 = vpop.permute.xlu0 %2455  ;;  %v618_v33 = vsel %vm3713_vm15, %v600_v62, %v3480_v42 }
 0x27e   : > { %v2457_v10 = vunpack.i.l.bf16 %v2456_v4  ;;  %v2468_v26 = vunpack.i.h.bf16 %v2466_v9  ;;  %v2467_v20 = vunpack.i.l.bf16 %v2466_v9  ;;  %v2458_v23 = vunpack.i.h.bf16 %v2456_v4 }
 0x280   : > { %v594_v32 = vsel %vm590_vm14, %v2453_v53, %v2457_v10  ;;  %v596_v50 = vsel %vm590_vm14, %v2467_v20, %v2468_v26  ;;  %v602_v5 = vsel %vm590_vm14, %v2458_v23, %v2467_v20  ;;  %v606_v9 = vsel %vm590_vm14, %v2457_v10, %v2452_v44 }
 0x281   : > { %v2471_v40 = vpop.permute.xlu1 %2470  ;;  %v2461_v0 = vpop.permute.xlu0 %2460  ;;  %v619_v56 = vsel %vm3713_vm15, %v594_v32, %v3485_v57  ;;  %v608_v57 = vsel %vm590_vm14, %v2468_v26, %v2458_v23  ;;  %v3770_v20 = vsel %vm3692_vm13, %v3598_v27, %v3461_v30  ;;  %v625_v60 = vsel %vm3733_vm0, %v596_v50, %v3505_v6 }
 0x282   : > { %v2463_v45 = vunpack.i.h.bf16 %v2461_v0  ;;  %v2462_v7 = vunpack.i.l.bf16 %v2461_v0  ;;  %v2534_v24 = vpack.i.bf16 %v619_v56, %v618_v33  ;;  %v626_v23 = vsel %vm3733_vm0, %v608_v57, %v3510_v8 }
 0x283   : > { %v620_v30 = vsel %vm3713_vm15, %v606_v9, %v3520_v1  ;;  %v624_v27 = vsel %vm3733_vm0, %v602_v5, %v3515_v18 }
 0x284   : > { %v955_v63 = vsel %vm517_vm8, %v2462_v7, %v2463_v45  ;;  %v961_v42 = vsel %vm517_vm8, %v2448_v21, %v2462_v7  ;;  %v967_v53 = vsel %vm517_vm8, %v2463_v45, %v2448_v21  ;;  %2535 = vrot.lane.b32.xlu0 %v2534_v24, %s2893_s11  ;;  %v2473_v21 = vunpack.i.h.bf16 %v2471_v40 }
 0x285   : > { %v2481_v4 = vpop.permute.xlu1 %2480  ;;  %v3748_v43 = vpop.permute.xlu0 %2475  ;;  %v3753_v62 = vsel %vm3592_vm11, %v955_v63, %v3371_v29  ;;  %v3758_v26 = vsel %vm3592_vm11, %v967_v53, %v3376_v31  ;;  %v3763_v44 = vsel %vm3592_vm11, %v961_v42, %v3453_v25  ;;  %v2472_v25 = vunpack.i.l.bf16 %v2471_v40 }
 0x286   : > { %v2477_v10 = vunpack.i.l.bf16 %v3748_v43  ;;  %v2549_v29 = vpack.i.bf16 %v3758_v26, %v3753_v62  ;;  %v2529_v31 = vpack.i.bf16 %v3763_v44, %v3770_v20  ;;  %v2478_v6 = vunpack.i.h.bf16 %v3748_v43 }
 0x287   : > { %v2559_v7 = vpack.i.bf16 %v626_v23, %v625_v60  ;;  %v2539_v1 = vpack.i.bf16 %v624_v27, %v620_v30  ;;  %v2483_v33 = vunpack.i.h.bf16 %v2481_v4  ;;  %v2482_v50 = vunpack.i.l.bf16 %v2481_v4 }
 0x288   : > { %2550 = vrot.lane.b32.xlu0 %v2549_v29, %s2892_s10  ;;  %2530 = vrot.lane.b32.xlu1 %v2529_v31, %s2892_s10  ;;  %v968_v56 = vsel %vm517_vm8, %v2477_v10, %v2472_v25  ;;  %v956_v5 = vsel %vm517_vm8, %v2473_v21, %v2477_v10  ;;  %v962_v10 = vsel %vm517_vm8, %v2472_v25, %v2473_v21  ;;  %v4495_v25 = vld [vmem:[#allocation20_spill] sm:$0xff] }
 0x289   : > { %v2486_v32 = vpop.permute.xlu1 %2485  ;;  %v2491_v0 = vpop.permute.xlu0 %2490  ;;  %v3802_v40 = vsel %vm3651_vm12, %v968_v56, %v3383_v34  ;;  %v4494_v34 = vld [vmem:[#allocation21_spill] sm:$0xff]  ;;  %v3828_v27 = vsel %vm3651_vm12, %v956_v5, %v4495_v25 }
 0x28a   : > { %v2487_v8 = vunpack.i.l.bf16 %v2486_v32  ;;  %v2492_v45 = vunpack.i.l.bf16 %v2491_v0  ;;  %v2493_v24 = vunpack.i.h.bf16 %v2491_v0  ;;  %v2544_v60 = vpack.i.bf16 %v4494_v34, %v3436_v51 }
 0x28b   : > { %v2488_v0 = vunpack.i.h.bf16 %v2486_v32 }
 0x28c   : > { %v964_v18 = vsel %vm517_vm8, %v2478_v6, %v2487_v8  ;;  %2560 = vrot.lane.b32.xlu0 %v2559_v7, %s2893_s11  ;;  %2540 = vrot.lane.b32.xlu1 %v2539_v1, %s2893_s11  ;;  %v1041_v29 = vsel %vm590_vm14, %v2492_v45, %v2482_v50 }
 0x28d   : > { %v2496_v57 = vpop.permute.xlu0 %2495  ;;  %v2501_v63 = vpop.permute.xlu1 %2500  ;;  %v3807_v42 = vsel %vm3692_vm13, %v964_v18, %v3389_v35  ;;  %v1029_v35 = vsel %vm590_vm14, %v2483_v33, %v2492_v45  ;;  %v1055_v32 = vsel %vm3713_vm15, %v1041_v29, %v3562_v59 }
 0x28e   : > { %v2498_v53 = vunpack.i.h.bf16 %v2496_v57  ;;  %v2497_v9 = vunpack.i.l.bf16 %v2496_v57  ;;  %v2503_v4 = vunpack.i.h.bf16 %v2501_v63  ;;  %v2502_v43 = vunpack.i.l.bf16 %v2501_v63  ;;  %v4496_v57 = vld [vmem:[#allocation19_spill] sm:$0xff] }
 0x28f   : > { %v2564_v31 = vpack.i.bf16 %v3807_v42, %v3802_v40  ;;  %v1035_v63 = vsel %vm590_vm14, %v2482_v50, %v2483_v33  ;;  %v1054_v33 = vsel %vm3713_vm15, %v1029_v35, %v3539_v17  ;;  %v958_v50 = vsel %vm517_vm8, %v2487_v8, %v2488_v0 }
 0x290   : > { %v1037_v23 = vsel %vm590_vm14, %v2493_v24, %v2497_v9  ;;  %v3823_v30 = vsel %vm517_vm8, %v2502_v43, %v2503_v4  ;;  %v1031_v56 = vsel %vm590_vm14, %v2497_v9, %v2498_v53  ;;  %v1043_v21 = vsel %vm590_vm14, %v2498_v53, %v2493_v24  ;;  %2545 = vrot.lane.b32.xlu1 %v2544_v60, %s2891_s29  ;;  %v4498_v60 = vld [vmem:[#allocation18_spill] sm:$0xff] }
 0x291   : > { %2565 = vrot.lane.b32.xlu0 %v2564_v31, %s2892_s10  ;;  %v3836_v45 = vpop.permute.xlu0 %2505  ;;  %v2511_v7 = vpop.permute.xlu1 %2510  ;;  %v1059_v1 = vsel %vm3733_vm0, %v1037_v23, %v3567_v2  ;;  %v3847_v24 = vsel %vm3651_vm12, %v962_v10, %v4496_v57  ;;  %v1060_v59 = vsel %vm3733_vm0, %v1031_v56, %v3603_v47  ;;  %v1061_v48 = vsel %vm3733_vm0, %v1043_v21, %v3608_v61  ;;  %v1520_v21 = vld [vmem:[#allocation9 + $0x98] sm:$0xff] }
 0x292   : > { %v2513_v18 = vunpack.i.h.bf16 %v2511_v7  ;;  %v2512_v5 = vunpack.i.l.bf16 %v2511_v7  ;;  %v2579_v53 = vpack.i.bf16 %v1059_v1, %v1055_v32  ;;  %v2554_v9 = vpack.i.bf16 %v3828_v27, %v3847_v24 }
 0x293   : > { %v970_v10 = vsel %vm517_vm8, %v2488_v0, %v2478_v6  ;;  %v2507_v29 = vunpack.i.l.bf16 %v3836_v45  ;;  %v1053_v61 = vsel %vm3713_vm15, %v1035_v63, %v4497_v3  ;;  %v2584_v31 = vpack.i.bf16 %v1061_v48, %v1060_v59 }
 0x294   : > { %v3855_v2 = vsel %vm590_vm14, %v2512_v5, %v2513_v18  ;;  %2555 = vrot.lane.b32.xlu1 %v2554_v9, %s2892_s10  ;;  %v2569_v17 = vpack.i.bf16 %v1054_v33, %v1053_v61  ;;  %v364_v35 = vand.u32 2, %v4498_v60  ;;  %v3882_v6 = vsel %vm3692_vm13, %v958_v50, %v3394_v38 }
 0x295   : > { %2580 = vrot.lane.b32.xlu0 %v2579_v53, %s2893_s11  ;;  %v3873_v47 = vpop.permute.xlu0 %2515  ;;  %v3887_v8 = vsel %vm3692_vm13, %v970_v10, %v3399_v39  ;;  %v518_v23 = vsel %vm517_vm8, %v2503_v4, %v2507_v29  ;;  %v530_v28 = vsel %vm517_vm8, %v2507_v29, %v2502_v43  ;;  %v377_v39 = vand.u32 4, %v3196_v36 }
 0x296   : > { %v2517_v25 = vunpack.i.l.bf16 %v3873_v47  ;;  %v2574_v38 = vpack.i.bf16 %v3887_v8, %v3882_v6  ;;  %vm3898_vm1 = vcmp.ne.s32.totalorder %v364_v35, 0 }
 0x297   : > { %v3906_v11 = vsel %vm3898_vm1, %v518_v23, %v3590_v52  ;;  %v3911_v4 = vsel %vm3898_vm1, %v530_v28, %v3631_v58  ;;  %vm3920_vm2 = vcmp.ne.s32.totalorder %v377_v39, 0 }
 0x298   : > { %2570 = vrot.lane.b32.xlu1 %v2569_v17, %s2893_s11  ;;  %v592_v43 = vsel %vm590_vm14, %v2513_v18, %v2517_v25  ;;  %v604_v56 = vsel %vm590_vm14, %v2517_v25, %v2512_v5  ;;  %v2589_v36 = vpack.i.bf16 %v3911_v4, %v3906_v11  ;;  %v2521_v18 = vpop.permute.xlu1 %2520 }
 0x299   : > { %2585 = vrot.lane.b32.xlu0 %v2584_v31, %s2893_s11  ;;  %v613_v52 = vsel %vm3920_vm2, %v592_v43, %v3641_v19  ;;  %v614_v58 = vsel %vm3920_vm2, %v604_v56, %v3684_v14  ;;  %v3932_v1 = vpop.permute.xlu0 %2525  ;;  %v2523_v32 = vunpack.i.h.bf16 %v2521_v18  ;;  %v2522_v57 = vunpack.i.l.bf16 %v2521_v18 }
 0x29a   : > { %v2599_v7 = vpack.i.bf16 %v614_v58, %v613_v52  ;;  %v378_v19 = vand.u32 4, %v3199_v37  ;;  %v2518_v14 = vunpack.i.h.bf16 %v3873_v47  ;;  %v2508_v37 = vunpack.i.h.bf16 %v3836_v45 }
 0x29b   : > { %v593_v9 = vsel %vm590_vm14, %v2522_v57, %v2523_v32  ;;  %v2527_v56 = vunpack.i.l.bf16 %v3932_v1 }
 0x29c   : > { %2575 = vrot.lane.b32.xlu1 %v2574_v38, %s2892_s10  ;;  %vm3948_vm3 = vcmp.ne.s32.totalorder %v378_v19, 0  ;;  %v599_v47 = vsel %vm590_vm14, %v2518_v14, %v2522_v57 }
 0x29d   : > { %v616_v3 = vsel %vm3948_vm3, %v593_v9, %v3670_v22  ;;  %v615_v58 = vsel %vm3948_vm3, %v599_v47, %v3665_v54  ;;  %v4005_v54 = vsel %vm3898_vm1, %v3823_v30, %v3580_v12  ;;  %v1504_v47 = vld [vmem:[#allocation9 + $0x18] sm:$0xff] }
 0x2a0   : > { %2590 = vrot.lane.b32.xlu1 %v2589_v36, %s2892_s10  ;;  %v380_v36 = vand.u32 4, %v3225_v49 }
 0x2a2   : > { %vm4017_vm5 = vcmp.ne.s32.totalorder %v380_v36, 0  ;;  %v605_v36 = vsel %vm590_vm14, %v2523_v32, %v2518_v14 }
 0x2a4   : > { %2600 = vrot.lane.b32.xlu1 %v2599_v7, %s2893_s11 }
 0x2f6   : > { %v3934_v5 = vpop.permute.xlu0 %2535 }
 0x2f7   : > { %v2538_v50 = vunpack.i.h.bf16 %v3934_v5  ;;  %v2537_v10 = vunpack.i.l.bf16 %v3934_v5 }
 0x2f9   : > { %v673_v43 = vsel %vm663_vm4, %v2537_v10, %v2538_v50 }
 0x2fa   : > { %v3936_v63 = vpop.permute.xlu0 %2550  ;;  %v3938_v53 = vpop.permute.xlu1 %2530  ;;  %v2619_v5 = vpack.i.bf16 %v673_v43, %v615_v58  ;;  %v2528_v58 = vunpack.i.h.bf16 %v3932_v1 }
 0x2fb   : > { %v2552_v31 = vunpack.i.l.bf16 %v3936_v63  ;;  %v2533_v17 = vunpack.i.h.bf16 %v3938_v53  ;;  %v2532_v35 = vunpack.i.l.bf16 %v3938_v53  ;;  %v1517_v53 = vld [vmem:[#allocation9 + $0x80] sm:$0xff] }
 0x2fd   : > { %v1033_v7 = vsel %vm590_vm14, %v2533_v17, %v2552_v31  ;;  %v607_v18 = vsel %vm590_vm14, %v2532_v35, %v2527_v56 }
 0x2fe   : > { %v3944_v59 = vpop.permute.xlu0 %2560  ;;  %v3946_v48 = vpop.permute.xlu1 %2540  ;;  %v623_v12 = vsel %vm4017_vm5, %v607_v18, %v3770_v20  ;;  %v1047_v30 = vsel %vm3920_vm2, %v1033_v7, %v3763_v44  ;;  %v612_v44 = vsel %vm3920_vm2, %v3855_v2, %v3636_v55 }
 0x2ff   : > { %v2542_v29 = vunpack.i.l.bf16 %v3946_v48  ;;  %v2563_v38 = vunpack.i.h.bf16 %v3944_v59  ;;  %v2543_v39 = vunpack.i.h.bf16 %v3946_v48  ;;  %v2604_v7 = vpack.i.bf16 %v1047_v30, %v612_v44 }
 0x300   : > { %v2562_v14 = vunpack.i.l.bf16 %v3944_v59  ;;  %v617_v59 = vsel %vm3948_vm3, %v605_v36, %v3675_v16  ;;  %v376_v44 = vand.u32 4, %v4498_v60 }
 0x301   : > { %v667_v61 = vsel %vm663_vm4, %v2538_v50, %v2542_v29  ;;  %v681_v19 = vsel %vm663_vm4, %v2563_v38, %v2543_v39  ;;  %v679_v18 = vsel %vm663_vm4, %v2542_v29, %v2537_v10 }
 0x302   : > { %v3969_v28 = vpop.permute.xlu1 %2545  ;;  %v2609_v25 = vpack.i.bf16 %v667_v61, %v616_v3  ;;  %v2629_v43 = vpack.i.bf16 %v681_v19, %v623_v12  ;;  %v2614_v16 = vpack.i.bf16 %v679_v18, %v617_v59  ;;  %v669_v12 = vsel %vm663_vm4, %v2562_v14, %v2563_v38 }
 0x303   : > { %v3967_v23 = vpop.permute.xlu0 %2565  ;;  %v2547_v22 = vunpack.i.l.bf16 %v3969_v28  ;;  %v2548_v9 = vunpack.i.h.bf16 %v3969_v28  ;;  %v601_v18 = vsel %vm590_vm14, %v2527_v56, %v2528_v58  ;;  %v675_v60 = vsel %vm663_vm4, %v2543_v39, %v2562_v14 }
 0x304   : > { %2610 = vrot.lane.b32.xlu1 %v2609_v25, %s2894_s14  ;;  %v2568_v10 = vunpack.i.h.bf16 %v3967_v23  ;;  %vm4118_vm6 = vcmp.ne.s32.totalorder %v376_v44, 0 }
 0x305   : > { %v960_v52 = vsel %vm517_vm8, %v2508_v37, %v2547_v22  ;;  %v954_v32 = vsel %vm517_vm8, %v2547_v22, %v2548_v9 }
 0x306   : > { %v3994_v49 = vpop.permute.xlu1 %2555  ;;  %v3999_v57 = vsel %vm3898_vm1, %v960_v52, %v3625_v41 }
 0x307   : > { %v4012_v50 = vpop.permute.xlu0 %2580  ;;  %v2594_v41 = vpack.i.bf16 %v3999_v57, %v4005_v54  ;;  %v2558_v3 = vunpack.i.h.bf16 %v3994_v49  ;;  %v2557_v61 = vunpack.i.l.bf16 %v3994_v49 }
 0x308   : > { %2620 = vrot.lane.b32.xlu1 %v2619_v5, %s2894_s14  ;;  %v595_v5 = vsel %vm590_vm14, %v2528_v58, %v2532_v35  ;;  %v4070_v35 = vsel %vm3898_vm1, %v954_v32, %v3436_v51 }
 0x309   : > { %2595 = vrot.lane.b32.xlu0 %v2594_v41, %s2892_s10  ;;  %v1034_v55 = vsel %vm590_vm14, %v2557_v61, %v2558_v3  ;;  %v622_v36 = vsel %vm4017_vm5, %v595_v5, %v3699_v46  ;;  %v2896_v5 = vmov 0  }
 0x30a   : > { %v4030_v25 = vpop.permute.xlu1 %2570  ;;  %v1050_v51 = vsel %vm3948_vm3, %v1034_v55, %v3847_v24  ;;  %v2624_v55 = vpack.i.bf16 %v669_v12, %v622_v36  ;;  %1357 = vmatprep.mubr.bf16.mxu0 %v2896_v5  ;;  %2670 = vset.pattern.permute.xlu0 %v2896_v5  ;;  %v2582_v12 = vunpack.i.l.bf16 %v4012_v50  ;;  %v1519_v36 = vld [vmem:[#allocation9 + $0x90] sm:$0xff] }
 0x30b   : > { %v2573_v52 = vunpack.i.h.bf16 %v4030_v25  ;;  %v2572_v20 = vunpack.i.l.bf16 %v4030_v25  ;;  %v4057_v2 = vpop.permute.xlu0 %2585  ;;  %2669 = vset.pattern.permute.xlu1 %v2896_v5  ;;  %v2183_v44 = vpack.c.bf16 %v1520_v21, %v1519_v36 }
 0x30c   : > { %2630 = vrot.lane.b32.xlu1 %v2629_v43, %s2895_s16  ;;  %v2587_v19 = vunpack.i.l.bf16 %v4057_v2 }
 0x30d   : > { %2605 = vrot.lane.b32.xlu0 %v2604_v7, %s2893_s11  ;;  %v1107_v22 = vsel %vm663_vm4, %v2572_v20, %v2573_v52  ;;  %v2583_v7 = vunpack.i.h.bf16 %v4012_v50  ;;  %v1113_v50 = vsel %vm663_vm4, %v2582_v12, %v2572_v20 }
 0x30e   : > { %v4060_v1 = vpop.permute.xlu1 %2575  ;;  %v2639_v43 = vpack.i.bf16 %v1107_v22, %v1050_v51  ;;  %v621_v22 = vsel %vm4017_vm5, %v601_v18, %v3706_v13  ;;  %v966_v51 = vsel %vm517_vm8, %v2548_v9, %v2508_v37  ;;  %v1522_v18 = vld [vmem:[#allocation9 + $0xa8] sm:$0xff]  ;;  %vm809_vm8 = vcmp.lt.s32.totalorder %v3154_v15, 96 }
 0x30f   : > { %v2577_v29 = vunpack.i.l.bf16 %v4060_v1  ;;  %v1109_v46 = vsel %vm663_vm4, %v2583_v7, %v2587_v19  ;;  %v2578_v37 = vunpack.i.h.bf16 %v4060_v1  ;;  %v4165_v9 = vsel %vm3898_vm1, %v966_v51, %v4494_v34  ;;  %v1525_v51 = vld [vmem:[#allocation9 + $0xc0] sm:$0xff] }
 0x310   : > { %1002 = vrot.lane.b32.xlu1 %v4070_v35, %s2892_s10 }
 0x311   : > { %v1036_v41 = vsel %vm590_vm14, %v2568_v10, %v2577_v29  ;;  %2615 = vrot.lane.b32.xlu0 %v2614_v16, %s2894_s14  ;;  %v2567_v16 = vunpack.i.l.bf16 %v3967_v23 }
 0x312   : > { %v4091_v30 = vpop.permute.xlu1 %2590  ;;  %v1056_v38 = vsel %vm4017_vm5, %v1036_v41, %v3807_v42  ;;  %v2553_v42 = vunpack.i.h.bf16 %v3936_v63  ;;  %v2634_v41 = vpack.i.bf16 %v675_v60, %v621_v22  ;;  %v1101_v63 = vsel %vm663_vm4, %v2573_v52, %v2582_v12  ;;  %v1506_v60 = vld [vmem:[#allocation9 + $0x28] sm:$0xff] }
 0x313   : > { %v2593_v32 = vunpack.i.h.bf16 %v4091_v30  ;;  %v2592_v24 = vunpack.i.l.bf16 %v4091_v30  ;;  %v2649_v58 = vpack.i.bf16 %v1109_v46, %v1056_v38  ;;  %v1040_v45 = vsel %vm590_vm14, %v2567_v16, %v2557_v61  ;;  %v1503_v38 = vld [vmem:[#allocation9 + $0x10] sm:$0xff]  ;;  %v1505_v46 = vld [vmem:[#allocation9 + $0x20] sm:$0xff]  ;;  %v1526_v12 = vld [vmem:[#allocation9 + $0xc8] sm:$0xff] }
 0x314   : > { %2640 = vrot.lane.b32.xlu1 %v2639_v43, %s2894_s14  ;;  %v1028_v61 = vsel %vm590_vm14, %v2558_v3, %v2567_v16  ;;  %v1052_v34 = vsel %vm3948_vm3, %v1040_v45, %v3802_v40  ;;  %v2588_v3 = vunpack.i.h.bf16 %v4057_v2  ;;  %v1042_v2 = vsel %vm590_vm14, %v2578_v37, %v2568_v10  ;;  %v1518_v10 = vld [vmem:[#allocation9 + $0x88] sm:$0xff]  ;;  %v1507_v16 = vld [vmem:[#allocation9 + $0x30] sm:$0xff]  ;;  %v1509_v45 = vld [vmem:[#allocation9 + $0x40] sm:$0xff] }
 0x315   : > { %2625 = vrot.lane.b32.xlu0 %v2624_v55, %s2895_s16  ;;  %v591_v48 = vsel %vm590_vm14, %v2592_v24, %v2593_v32  ;;  %v2659_v49 = vpack.i.bf16 %v1113_v50, %v1052_v34  ;;  %v1058_v33 = vsel %vm4017_vm5, %v1042_v2, %v3887_v8  ;;  %v1521_v8 = vld [vmem:[#allocation9 + $0xa0] sm:$0xff]  ;;  %v2185_v55 = vpack.c.bf16 %v1504_v47, %v1503_v38  ;;  %v1512_v34 = vld [vmem:[#allocation9 + $0x58] sm:$0xff] }
 0x316   : > { %v4116_v56 = vpop.permute.xlu1 %2600  ;;  %v610_v43 = vsel %vm4118_vm6, %v591_v48, %v3906_v11  ;;  %v1027_v11 = vsel %vm590_vm14, %v2552_v31, %v2553_v42  ;;  %v1030_v31 = vsel %vm590_vm14, %v2577_v29, %v2578_v37  ;;  %v1103_v52 = vsel %vm663_vm4, %v2587_v19, %v2588_v3  ;;  %v1501_v29 = vld [vmem:[#allocation9] sm:$0xff]  ;;  %v1502_v19 = vld [vmem:[#allocation9 + $0x8] sm:$0xff] }
 0x317   : > { %v2603_v39 = vunpack.i.h.bf16 %v4116_v56  ;;  %v2602_v14 = vunpack.i.l.bf16 %v4116_v56  ;;  %v1048_v0 = vsel %vm3920_vm2, %v1027_v11, %v3753_v62  ;;  %v1051_v62 = vsel %vm3948_vm3, %v1028_v61, %v3828_v27  ;;  %v1510_v37 = vld [vmem:[#allocation9 + $0x48] sm:$0xff]  ;;  %v1528_v11 = vld [vmem:[#allocation9 + $0xd8] sm:$0xff] }
 0x318   : > { %2650 = vrot.lane.b32.xlu1 %v2649_v58, %s2895_s16  ;;  %v2644_v40 = vpack.i.bf16 %v1101_v63, %v1051_v62  ;;  %v1057_v25 = vsel %vm4017_vm5, %v1030_v31, %v3882_v6  ;;  %v1039_v27 = vsel %vm590_vm14, %v2553_v42, %v2533_v17  ;;  %v1115_v23 = vsel %vm663_vm4, %v2588_v3, %v2583_v7  ;;  %v1523_v42 = vld [vmem:[#allocation9 + $0xb0] sm:$0xff]  ;;  %v1524_v58 = vld [vmem:[#allocation9 + $0xb8] sm:$0xff] }
 0x319   : > { %v665_v13 = vsel %vm663_vm4, %v2602_v14, %v2603_v39  ;;  %2635 = vrot.lane.b32.xlu0 %v2634_v41, %s2895_s16  ;;  %v2654_v20 = vpack.i.bf16 %v1103_v52, %v1057_v25  ;;  %v1049_v6 = vsel %vm3920_vm2, %v1039_v27, %v3758_v26  ;;  %v2664_v1 = vpack.i.bf16 %v1115_v23, %v1058_v33  ;;  %v1508_v41 = vld [vmem:[#allocation9 + $0x38] sm:$0xff] }
 0x31a   : > { %v847_v28 = vpack.c.bf16 %v665_v13, %v610_v43  ;;  %v2179_v17 = vpack.c.bf16 %v1518_v10, %v1517_v53  ;;  %v2181_v26 = vpack.c.bf16 %v1502_v19, %v1501_v29  ;;  %v2187_v7 = vpack.c.bf16 %v1522_v18, %v1521_v8 }
 0x31b   : > { %v2189_v48 = vpack.c.bf16 %v1506_v60, %v1505_v46  ;;  %v2191_v22 = vpack.c.bf16 %v1524_v58, %v1523_v42  ;;  %v2193_v43 = vpack.c.bf16 %v1508_v41, %v1507_v16  ;;  %v2195_v13 = vpack.c.bf16 %v1526_v12, %v1525_v51 }
 0x31c   : > { %1014 = vrot.lane.b32.xlu1 %v4165_v9, %s2892_s10  ;;  %1325 = vmatprep.subr.bf16.mxu0 %v847_v28  ;;  %v1527_v28 = vld [vmem:[#allocation9 + $0xd0] sm:$0xff]  ;;  %v2197_v50 = vpack.c.bf16 %v1510_v37, %v1509_v45 }
 0x31d   : > { %1076 = vrot.lane.b32.xlu0 %v1048_v0, %s2893_s11  ;;  %2180 = vmatprep.subr.bf16.mxu1 %v2179_v17  ;;  %v2199_v61 = vpack.c.bf16 %v1528_v11, %v1527_v28  ;;  %v1511_v0 = vld [vmem:[#allocation9 + $0x50] sm:$0xff] }
 0x31e   : > { %2182 = vmatpush3.bf16.msra.mxu1 %v2181_v26  ;;  %v2201_v63 = vpack.c.bf16 %v1512_v34, %v1511_v0 }
 0x31f   : > { %2184 = vmatprep.subr.bf16.mxu1 %v2183_v44 }
 0x320   : > { %2660 = vrot.lane.b32.xlu1 %v2659_v49, %s2894_s14 }
 0x321   : > { %2645 = vrot.lane.b32.xlu0 %v2644_v40, %s2894_s14 }
 0x322   : > { %2186 = vmatpush3.bf16.msra.mxu1 %v2185_v55 }
 0x323   : > { %2188 = vmatprep.subr.bf16.mxu1 %v2187_v7 }
 0x325   : > { %2655 = vrot.lane.b32.xlu0 %v2654_v20, %s2895_s16 }
 0x326   : > { %2190 = vmatpush3.bf16.msra.mxu1 %v2189_v48 }
 0x327   : > { %2192 = vmatprep.subr.bf16.mxu1 %v2191_v22 }
 0x329   : > { %1088 = vrot.lane.b32.xlu0 %v1049_v6, %s2893_s11  ;;  %s2019_s11 = sshll.u32 %s3133_s1, 4 }
 0x32a   : > { %2194 = vmatpush3.bf16.msra.mxu1 %v2193_v43  ;;  %s341_s14 = scalar_lea.vmem [#allocation12], %s2019_s11 }
 0x32b   : > { %2196 = vmatprep.subr.bf16.mxu1 %v2195_v13 }
 0x32d   : > { %2665 = vrot.lane.b32.xlu0 %v2664_v1, %s2895_s16  ;;  %s1904_s16 = sshll.u32 %s341_s14, 4  ;;  %s4379_s16 = int_to_ptr.vmem [resolvable:$true] %s1904_s16 }
 0x32e   : > { %2198 = vmatpush3.bf16.msra.mxu1 %v2197_v50  ;;  %s2803_s15 = scalar_lea.vmem %s4379_s16, 256  ;;  %p2810_p12 = scmp.lt.s32.totalorder %s4379_s16, %s2808_s19 }
 0x32f   : > { %2200 = vmatprep.subr.bf16.mxu1 %v2199_v61  ;;  %v4287_v61 = vld [vmem:[#allocation7] sm:$0xff]   ;;  %p2804_p10 = scmp.ne.s32.totalorder %s4379_s16, %s2803_s15  ;;  %p2811_p2 = scmp.lt.s32.totalorder %s2809_s22, %s2803_s15 }
 0x331   : > { %p2805_p3 = pnand %p2804_p10, %p3085_p5  ;;  %p2812_p1 = por %p2811_p2, %p2810_p12 }
 0x332   : > { %2202 = vmatpush3.bf16.msra.mxu1 %v2201_v63 }
 0x333   : > { %p2806_p7 = pneg %p2805_p3 }
 0x335   : > { %p2813_p4 = pnand %p2812_p1, %p2806_p7 }
 0x376   : > { %v2611_v31 = vpop.permute.xlu1 %2610 }
 0x377   : > { %v2613_v53 = vunpack.i.h.bf16 %v2611_v31  ;;  %v2612_v10 = vunpack.i.l.bf16 %v2611_v31 }
 0x37a   : > { %v4220_v49 = vpop.permute.xlu1 %2620 }
 0x37b   : > { %v4222_v3 = vpop.permute.xlu0 %2595  ;;  %v2623_v27 = vunpack.i.h.bf16 %v4220_v49  ;;  %v2622_v6 = vunpack.i.l.bf16 %v4220_v49 }
 0x37c   : > { %v2597_v62 = vunpack.i.l.bf16 %v4222_v3  ;;  %v2598_v60 = vunpack.i.h.bf16 %v4222_v3 }
 0x37d   : > { %v745_v36 = vsel %vm736_vm7, %v2622_v6, %v2612_v10 }
 0x37e   : > { %v4225_v40 = vpop.permute.xlu1 %2630  ;;  %v597_v52 = vsel %vm590_vm14, %v2597_v62, %v2592_v24  ;;  %v603_v12 = vsel %vm590_vm14, %v2593_v32, %v2597_v62 }
 0x37f   : > { %v4227_v25 = vpop.permute.xlu0 %2605  ;;  %v609_v33 = vsel %vm4118_vm6, %v597_v52, %v4005_v54  ;;  %v746_v54 = vsel %vm736_vm7, %v2623_v27, %v2613_v53  ;;  %v2633_v21 = vunpack.i.h.bf16 %v4225_v40  ;;  %v2632_v38 = vunpack.i.l.bf16 %v4225_v40 }
 0x380   : > { %v2607_v20 = vunpack.i.l.bf16 %v4227_v25  ;;  %v849_v55 = vpack.c.bf16 %v746_v54, %v745_v36  ;;  %v2608_v51 = vunpack.i.h.bf16 %v4227_v25  ;;  %v611_v0 = vsel %vm4118_vm6, %v603_v12, %v3911_v4  ;;  %v1529_v12 = vld [vmem:[#allocation9 + $0xe0] sm:$0xff] }
 0x382   : > { %v4234_v2 = vpop.permute.xlu1 %1002  ;;  %v671_v23 = vsel %vm663_vm4, %v2607_v20, %v2602_v14  ;;  %v677_v37 = vsel %vm663_vm4, %v2603_v39, %v2607_v20 }
 0x383   : > { %v2616_v24 = vpop.permute.xlu0 %2615  ;;  %v846_v1 = vpack.c.bf16 %v671_v23, %v609_v33  ;;  %v1032_v41 = vsel %vm590_vm14, %v2598_v60, %v4234_v2  ;;  %v848_v56 = vpack.c.bf16 %v677_v37, %v611_v0  ;;  %v1535_v0 = vld [vmem:[#allocation9 + $0x110] sm:$0xff] }
 0x384   : > { %v2618_v29 = vunpack.i.h.bf16 %v2616_v24  ;;  %v2617_v17 = vunpack.i.l.bf16 %v2616_v24  ;;  %v1044_v28 = vsel %vm4118_vm6, %v1032_v41, %v3999_v57 }
 0x385   : > { %1326 = vmatpush1.bf16.msra.mxu0 %v846_v1 }
 0x386   : > { %v4246_v19 = vpop.permute.xlu1 %2640  ;;  %v739_v26 = vsel %vm736_vm7, %v2612_v10, %v2617_v17  ;;  %v740_v44 = vsel %vm736_vm7, %v2613_v53, %v2618_v29  ;;  %v752_v39 = vsel %vm736_vm7, %v2618_v29, %v2623_v27  ;;  %v751_v57 = vsel %vm736_vm7, %v2617_v17, %v2622_v6 }
 0x387   : > { %v2626_v14 = vpop.permute.xlu0 %2625  ;;  %v850_v18 = vpack.c.bf16 %v740_v44, %v739_v26  ;;  %v2643_v63 = vunpack.i.h.bf16 %v4246_v19  ;;  %v2642_v31 = vunpack.i.l.bf16 %v4246_v19  ;;  %v851_v40 = vpack.c.bf16 %v752_v39, %v751_v57 }
 0x388   : > { %v2628_v47 = vunpack.i.h.bf16 %v2626_v14  ;;  %v2627_v8 = vunpack.i.l.bf16 %v2626_v14 }
 0x389   : > { %1327 = vmatprep.subr.bf16.mxu0 %v850_v18 }
 0x38a   : > { %v814_v7 = vsel %vm809_vm8, %v2627_v8, %v2632_v38  ;;  %v815_v46 = vsel %vm809_vm8, %v2628_v47, %v2633_v21  ;;  %v4264_v42 = vpop.permute.xlu1 %2650  ;;  %1328 = vmatpush1.bf16.msra.mxu0 %v849_v55 }
 0x38b   : > { %v2636_v58 = vpop.permute.xlu0 %2635  ;;  %v853_v48 = vpack.c.bf16 %v815_v46, %v814_v7  ;;  %v2653_v27 = vunpack.i.h.bf16 %v4264_v42  ;;  %v2652_v6 = vunpack.i.l.bf16 %v4264_v42 }
 0x38c   : > { %v2638_v22 = vunpack.i.h.bf16 %v2636_v58  ;;  %v2637_v16 = vunpack.i.l.bf16 %v2636_v58 }
 0x38d   : > { %1329 = vmatprep.subr.bf16.mxu0 %v853_v48 }
 0x38e   : > { %v820_v13 = vsel %vm809_vm8, %v2637_v16, %v2627_v8  ;;  %v821_v45 = vsel %vm809_vm8, %v2638_v22, %v2628_v47  ;;  %v1015_v11 = vpop.permute.xlu1 %1014  ;;  %v827_v24 = vsel %vm809_vm8, %v2633_v21, %v2638_v22  ;;  %v826_v1 = vsel %vm809_vm8, %v2632_v38, %v2637_v16 }
 0x38f   : > { %v1077_v43 = vpop.permute.xlu0 %1076  ;;  %v852_v32 = vpack.c.bf16 %v821_v45, %v820_v13  ;;  %v1038_v53 = vsel %vm590_vm14, %v1015_v11, %v2598_v60  ;;  %v854_v14 = vpack.c.bf16 %v827_v24, %v826_v1  ;;  %v1026_v21 = vsel %vm590_vm14, %v4234_v2, %v1015_v11  ;;  %v1533_v13 = vld [vmem:[#allocation9 + $0x100] sm:$0xff]  ;;  %v1546_v24 = vld [vmem:[#allocation9 + $0x168] sm:$0xff] }
 0x390   : > { %v1105_v30 = vsel %vm663_vm4, %v2608_v51, %v1077_v43  ;;  %v1046_v26 = vsel %vm4118_vm6, %v1038_v53, %v4165_v9  ;;  %v1045_v2 = vsel %vm4118_vm6, %v1026_v21, %v4070_v35  ;;  %v1547_v53 = vld [vmem:[#allocation9 + $0x170] sm:$0xff] }
 0x391   : > { %v1278_v50 = vpack.c.bf16 %v1105_v30, %v1044_v28  ;;  %1330 = vmatpush1.bf16.msra.mxu0 %v852_v32  ;;  %v1513_v28 = vld [vmem:[#allocation9 + $0x60] sm:$0xff]  ;;  %v1514_v30 = vld [vmem:[#allocation9 + $0x68] sm:$0xff]  ;;  %v1531_v32 = vld [vmem:[#allocation9 + $0xf0] sm:$0xff] }
 0x392   : > { %v2661_v25 = vpop.permute.xlu1 %2660  ;;  %v2205_v11 = vpack.c.bf16 %v1514_v30, %v1513_v28  ;;  %v1707_v28 = vld [vmem:[#allocation10 + $0x10] sm:$0xff] }
 0x393   : > { %v2646_v34 = vpop.permute.xlu0 %2645  ;;  %1368 = vmatprep.subr.bf16.mxu0 %v1278_v50  ;;  %v2663_v10 = vunpack.i.h.bf16 %v2661_v25  ;;  %v2662_v29 = vunpack.i.l.bf16 %v2661_v25  ;;  %v1532_v50 = vld [vmem:[#allocation9 + $0xf8] sm:$0xff]  ;;  %v1541_v25 = vld [vmem:[#allocation9 + $0x140] sm:$0xff] }
 0x394   : > { %v2648_v49 = vunpack.i.h.bf16 %v2646_v34  ;;  %v2647_v3 = vunpack.i.l.bf16 %v2646_v34  ;;  %2022 = vmatmul.mubr.msk.bf16.vlgmr.msra.gmra.mrb[0].mxu0 %vm1321_vm9, %v4287_v61  ;;  %v2207_v39 = vpack.c.bf16 %v1532_v50, %v1531_v32  ;;  %v1515_v34 = vld [vmem:[#allocation9 + $0x70] sm:$0xff]  ;;  %v1708_v32 = vld [vmem:[#allocation10 + $0x18] sm:$0xff]  ;;  %v1709_v50 = vld [vmem:[#allocation10 + $0x20] sm:$0xff] }
 0x395   : > { %1369 = vmatpush1.bf16.msra.mxu0 %v848_v56  ;;  %1400 = vmatprep.mubr.bf16.mxu0 %v2896_v5  ;;  %v1184_v8 = vsel %vm736_vm7, %v2662_v29, %v2642_v31  ;;  %v1185_v18 = vsel %vm736_vm7, %v2663_v10, %v2643_v63  ;;  %v1536_v56 = vld [vmem:[#allocation9 + $0x118] sm:$0xff] }
 0x396   : > { %v1178_v4 = vsel %vm736_vm7, %v2642_v31, %v2647_v3  ;;  %v1179_v62 = vsel %vm736_vm7, %v2643_v63, %v2648_v49  ;;  %v1173_v60 = vsel %vm736_vm7, %v2648_v49, %v2663_v10  ;;  %v1172_v42 = vsel %vm736_vm7, %v2647_v3, %v2662_v29  ;;  %v1537_v31 = vld [vmem:[#allocation9 + $0x120] sm:$0xff]  ;;  %v1538_v49 = vld [vmem:[#allocation9 + $0x128] sm:$0xff]  ;;  %v1548_v10 = vld [vmem:[#allocation9 + $0x178] sm:$0xff] }
 0x397   : > { %v2656_v52 = vpop.permute.xlu0 %2655  ;;  %v1281_v20 = vpack.c.bf16 %v1179_v62, %v1178_v4  ;;  %v1283_v58 = vpack.c.bf16 %v1185_v18, %v1184_v8  ;;  %v1282_v48 = vpack.c.bf16 %v1173_v60, %v1172_v42  ;;  %v2215_v57 = vpack.c.bf16 %v1536_v56, %v1535_v0  ;;  %v1539_v4 = vld [vmem:[#allocation9 + $0x130] sm:$0xff]  ;;  %v1540_v62 = vld [vmem:[#allocation9 + $0x138] sm:$0xff]  ;;  %v1710_v0 = vld [vmem:[#allocation10 + $0x28] sm:$0xff] }
 0x398   : > { %v2658_v33 = vunpack.i.h.bf16 %v2656_v52  ;;  %v2657_v23 = vunpack.i.l.bf16 %v2656_v52  ;;  %v2219_v3 = vpack.c.bf16 %v1538_v49, %v1537_v31  ;;  %v1542_v52 = vld [vmem:[#allocation9 + $0x148] sm:$0xff]  ;;  %v2239_v29 = vpack.c.bf16 %v1548_v10, %v1547_v53  ;;  %v1715_v31 = vld [vmem:[#allocation10 + $0x50] sm:$0xff]  ;;  %v1716_v49 = vld [vmem:[#allocation10 + $0x58] sm:$0xff] }
 0x399   : > { %1370 = vmatprep.subr.bf16.mxu0 %v1281_v20  ;;  %v2227_v20 = vpack.c.bf16 %v1542_v52, %v1541_v25  ;;  %v1473_v18 = vadd.s32 256, %v3154_v15  ;;  %v2251_v56 = vpack.c.bf16 %v1710_v0, %v1709_v50  ;;  %v1719_v25 = vld [vmem:[#allocation10 + $0x70] sm:$0xff]  ;;  %v1720_v52 = vld [vmem:[#allocation10 + $0x78] sm:$0xff]  ;;  %v2899_v53 = vmov 2  }
 0x39a   : > { %1371 = vmatpush1.bf16.msra.mxu0 %v851_v40  ;;  %v1252_v17 = vsel %vm809_vm8, %v2652_v6, %v2657_v23  ;;  %v1253_v19 = vsel %vm809_vm8, %v2653_v27, %v2658_v33  ;;  %v2223_v40 = vpack.c.bf16 %v1540_v62, %v1539_v4  ;;  %v1717_v4 = vld [vmem:[#allocation10 + $0x60] sm:$0xff]  ;;  %v1718_v62 = vld [vmem:[#allocation10 + $0x68] sm:$0xff] }
 0x39b   : > { %v1089_v36 = vpop.permute.xlu0 %1088  ;;  %v1284_v54 = vpack.c.bf16 %v1253_v19, %v1252_v17  ;;  %vm1479_vm11 = vcmp.lt.s32.totalorder %v1473_v18, 276 }
 0x39c   : > { %v1111_v44 = vsel %vm663_vm4, %v1089_v36, %v2608_v51  ;;  %v1099_v38 = vsel %vm663_vm4, %v1077_v43, %v1089_v36  ;;  %v1530_v43 = vld [vmem:[#allocation9 + $0xe8] sm:$0xff] }
 0x39d   : > { %v1280_v47 = vpack.c.bf16 %v1111_v44, %v1046_v26  ;;  %1372 = vmatprep.subr.bf16.mxu0 %v1284_v54  ;;  %v1279_v55 = vpack.c.bf16 %v1099_v38, %v1045_v2  ;;  %v2203_v45 = vpack.c.bf16 %v1530_v43, %v1529_v12 }
 0x39e   : > { %1373 = vmatpush1.bf16.msra.mxu0 %v854_v14 }
 0x39f   : > { %v2666_v9 = vpop.permute.xlu0 %2665  ;;  %1411 = vmatprep.subr.bf16.mxu0 %v1280_v47  ;;  %2204 = vmatprep.subr.bf16.mxu1 %v2203_v45 }
 0x3a0   : > { %v2668_v7 = vunpack.i.h.bf16 %v2666_v9  ;;  %v2667_v46 = vunpack.i.l.bf16 %v2666_v9  ;;  %2206 = vmatpush3.bf16.msra.mxu1 %v2205_v11  ;;  %v2247_v11 = vpack.c.bf16 %v1708_v32, %v1707_v28 }
 0x3a1   : > { %2023 = vmatmul.mubr.msk.bf16.vlgmr.msra.gmra.mrb[4].mxu0 %vm1321_vm9, %v4287_v61  ;;  %2208 = vmatprep.subr.bf16.mxu1 %v2207_v39  ;;  %v1711_v39 = vld [vmem:[#allocation10 + $0x30] sm:$0xff] }
 0x3a2   : > { %1412 = vmatpush1.bf16.msra.mxu0 %v1279_v55  ;;  %v1258_v59 = vsel %vm809_vm8, %v2667_v46, %v2652_v6  ;;  %v1259_v35 = vsel %vm809_vm8, %v2668_v7, %v2653_v27  ;;  %1443 = vmatprep.mubr.bf16.mxu0 %v2896_v5  ;;  %v1246_v22 = vsel %vm809_vm8, %v2657_v23, %v2667_v46  ;;  %v1534_v5 = vld [vmem:[#allocation9 + $0x108] sm:$0xff]  ;;  %v1543_v27 = vld [vmem:[#allocation9 + $0x150] sm:$0xff]  ;;  %v1544_v6 = vld [vmem:[#allocation9 + $0x158] sm:$0xff] }
 0x3a3   : > { %1413 = vmatprep.subr.bf16.mxu0 %v1283_v58  ;;  %v1247_v16 = vsel %vm809_vm8, %v2658_v33, %v2668_v7  ;;  %v1286_v41 = vpack.c.bf16 %v1259_v35, %v1258_v59  ;;  %v2211_v37 = vpack.c.bf16 %v1534_v5, %v1533_v13  ;;  %v2231_v33 = vpack.c.bf16 %v1544_v6, %v1543_v27  ;;  %v1545_v23 = vld [vmem:[#allocation9 + $0x160] sm:$0xff]  ;;  %v1801_v27 = vld [vmem:[%s4434_s6 + $0x8] sm:$0xff]  ;;  %v1800_v6 = vld [vmem:[%s4434_s6] sm:$0xff] }
 0x3a4   : > { %v1285_v51 = vpack.c.bf16 %v1247_v16, %v1246_v22  ;;  %v2235_v1 = vpack.c.bf16 %v1546_v24, %v1545_v23  ;;  %v1705_v5 = vld [vmem:[#allocation10] sm:$0xff]  ;;  %v1802_v23 = vsub.f32 0.0, %v1800_v6  ;;  %v2897_v24 = vmov 1  }
 0x3a6   : > { %1414 = vmatpush1.bf16.msra.mxu0 %v1282_v48  ;;  %1826 = vperm.xlu1 %2669, %v1802_v23  }
 0x3a7   : > { %1415 = vmatprep.subr.bf16.mxu0 %v1286_v41 }
 0x3aa   : > { %1416 = vmatpush1.bf16.msra.mxu0 %v1285_v51 }
 0x3ab   : > { %2212 = vmatprep.subr.bf16.mxu0 %v2211_v37 }
 0x3ad   : > { %2024 = vmatmul.mubr.msk.bf16.vlgmr.msra.gmra.mrb[8].mxu0 %vm1321_vm9, %v4287_v61  ;;  %v1516_v61 = vld [vmem:[#allocation9 + $0x78] sm:$0xff] }
 0x3ae   : > { %2214 = vmatpush3.bf16.msra.mxu0 %v2211_v37  ;;  %v2209_v63 = vpack.c.bf16 %v1516_v61, %v1515_v34  ;;  %v1706_v37 = vld [vmem:[#allocation10 + $0x8] sm:$0xff]  ;;  %v1713_v34 = vld [vmem:[#allocation10 + $0x40] sm:$0xff] }
 0x3af   : > { %2216 = vmatprep.subr.bf16.mxu0 %v2215_v57  ;;  %v2243_v30 = vpack.c.bf16 %v1706_v37, %v1705_v5  ;;  %v1714_v61 = vld [vmem:[#allocation10 + $0x48] sm:$0xff] }
 0x3b0   : > { %2210 = vmatpush3.bf16.msra.mxu1 %v2209_v63  ;;  %v2259_v63 = vpack.c.bf16 %v1714_v61, %v1713_v34 }
 0x3b1   : > { %2244 = vmatprep.subr.bf16.mxu1 %v2243_v30 }
 0x3b2   : > { %2218 = vmatpush3.bf16.msra.mxu0 %v2215_v57  ;;  %v1712_v57 = vld [vmem:[#allocation10 + $0x38] sm:$0xff] }
 0x3b3   : > { %2220 = vmatprep.subr.bf16.mxu0 %v2219_v3  ;;  %v2255_v15 = vpack.c.bf16 %v1712_v57, %v1711_v39 }
 0x3b6   : > { %2222 = vmatpush3.bf16.msra.mxu0 %v2219_v3  ;;  %v2263_v3 = vpack.c.bf16 %v1716_v49, %v1715_v31 }
 0x3b7   : > { %2224 = vmatprep.subr.bf16.mxu0 %v2223_v40 }
 0x3ba   : > { %2226 = vmatpush3.bf16.msra.mxu0 %v2223_v40  ;;  %v2267_v40 = vpack.c.bf16 %v1718_v62, %v1717_v4 }
 0x3bb   : > { %2228 = vmatprep.subr.bf16.mxu0 %v2227_v20 }
 0x3be   : > { %2230 = vmatpush3.bf16.msra.mxu0 %v2227_v20  ;;  %v2271_v20 = vpack.c.bf16 %v1720_v52, %v1719_v25 }
 0x3bf   : > { %2232 = vmatprep.subr.bf16.mxu0 %v2231_v33 }
 0x3c2   : > { %2234 = vmatpush3.bf16.msra.mxu0 %v2231_v33  ;;  %v1803_v33 = vsub.f32 0.0, %v1801_v27 }
 0x3c3   : > { %2236 = vmatprep.subr.bf16.mxu0 %v2235_v1 }
 0x3c4   : > { %1831 = vperm.xlu0 %2670, %v1803_v33  }
 0x3c6   : > { %2238 = vmatpush3.bf16.msra.mxu0 %v2235_v1  ;;  %v2898_v1 = vmov 4  }
 0x3c7   : > { %2240 = vmatprep.subr.bf16.mxu0 %v2239_v29  ;;  %2671 = vset.pattern.permute.xlu1 %v2898_v1 }
 0x3c8   : > { %2672 = vset.pattern.permute.xlu0 %v2897_v24  ;;  %1842 = vperm.xlu1 %2671, %v1800_v6  }
 0x3c9   : > { %1855 = vperm.xlu0 %2672, %v1800_v6  }
 0x3ca   : > { %2242 = vmatpush3.bf16.msra.mxu0 %v2239_v29 }
 0x3cc   : > { %1847 = vperm.xlu1 %2671, %v1801_v27  }
 0x3cd   : > { %2675 = vset.pattern.permute.xlu0 %v2899_v53 }
 0x3ce   : > { %1883 = vperm.xlu0 %2675, %v1801_v27  }
 0x3d0   : > { %2673 = vset.pattern.permute.xlu1 %v2897_v24 }
 0x3d1   : > { %1859 = vperm.xlu1 %2673, %v1801_v27  }
 0x3d5   : > { %2674 = vset.pattern.permute.xlu1 %v2899_v53 }
 0x3d6   : > { %1879 = vperm.xlu1 %2674, %v1800_v6  }
 0x425   : > { %v1827_v32 = vpop.permute.xlu1 %1826 }
 0x443   : > { %v1832_v37 = vpop.permute.xlu0 %1831 }
 0x447   : > { %v1843_v61 = vpop.permute.xlu1 %1842 }
 0x448   : > { %v1856_v25 = vpop.permute.xlu0 %1855 }
 0x44d   : > { %v1884_v24 = vpop.permute.xlu0 %1883 }
 0x467   : > { %v1359_v17 = vpop.f32.mrb[0].mxu0 }
 0x468   : > { %v1454_v19 = vmul.f32 %v1359_v17, %v1359_v17  ;;  %v1361_v36 = vpop.f32.mrb[1].mxu0 }
 0x469   : > { %v1455_v54 = vmul.f32 %v1361_v36, %v1361_v36  ;;  %v1363_v14 = vpop.f32.mrb[2].mxu0 }
 0x46a   : > { %v1460_v21 = vmul.f32 %v1363_v14, %v1363_v14  ;;  %v1365_v26 = vpop.f32.mrb[3].mxu0 }
 0x46b   : > { %v1461_v44 = vmul.f32 %v1365_v26, %v1365_v26 }
 0x46c   : > { %v1466_v38 = vadd.f32 %v1460_v21, %v1454_v19 }
 0x46d   : > { %v1467_v47 = vadd.f32 %v1461_v44, %v1455_v54  ;;  %v1701_v44 = vld [vmem:[%s4433_s5] sm:$0xff] }
 0x46f   : > { %1613 = vmatprep.mubr.f32.mxu1 %v1467_v47 }
 0x470   : > { %2031 = vmatmul.mubr.msk.f32.vlgmr.msra.gmra.mrb[0].mxu1 %vm1474_vm10, %v1466_v38 }
 0x471   : > { %2246 = vmatpush3.bf16.msra.mxu1 %v2243_v30 }
 0x472   : > { %2248 = vmatprep.subr.bf16.mxu1 %v2247_v11 }
 0x474   : > { %v1402_v8 = vpop.f32.mrb[4].mxu0 }
 0x475   : > { %v1456_v2 = vmul.f32 %v1402_v8, %v1402_v8  ;;  %v1404_v9 = vpop.f32.mrb[5].mxu0  ;;  %2250 = vmatpush3.bf16.msra.mxu1 %v2247_v11  ;;  %v1702_v8 = vld [vmem:[%s4433_s5 + $0x8] sm:$0xff] }
 0x476   : > { %v1406_v55 = vpop.f32.mrb[6].mxu0  ;;  %v1457_v60 = vmul.f32 %v1404_v9, %v1404_v9  ;;  %2252 = vmatprep.subr.bf16.mxu1 %v2251_v56 }
 0x477   : > { %v1462_v7 = vmul.f32 %v1406_v55, %v1406_v55  ;;  %v1408_v46 = vpop.f32.mrb[7].mxu0  ;;  %v1797_v55 = vld [vmem:[%s4432_s4 + $0x8] sm:$0xff] }
 0x478   : > { %v1463_v42 = vmul.f32 %v1408_v46, %v1408_v46 }
 0x479   : > { %v1468_v58 = vadd.f32 %v1462_v7, %v1456_v2  ;;  %2254 = vmatpush3.bf16.msra.mxu1 %v2251_v56  ;;  %v1796_v7 = vld [vmem:[%s4432_s4] sm:$0xff] }
 0x47a   : > { %v1469_v59 = vadd.f32 %v1463_v42, %v1457_v60  ;;  %2256 = vmatprep.subr.bf16.mxu1 %v2255_v15 }
 0x47b   : > { %2141 = vmatprep.mubr.msk.f32.mxu0 %vm1479_vm11, %v1468_v58 }
 0x47d   : > { %2258 = vmatpush3.bf16.msra.mxu1 %v2255_v15 }
 0x47e   : > { %2260 = vmatprep.subr.bf16.mxu1 %v2259_v63 }
 0x480   : > { %v1445_v35 = vpop.f32.mrb[8].mxu0 }
 0x481   : > { %v1447_v48 = vpop.f32.mrb[9].mxu0  ;;  %v1458_v16 = vmul.f32 %v1445_v35, %v1445_v35  ;;  %2262 = vmatpush3.bf16.msra.mxu1 %v2259_v63  ;;  %v1848_v63 = vpop.permute.xlu1 %1847 }
 0x482   : > { %v1449_v22 = vpop.f32.mrb[10].mxu0  ;;  %v1459_v12 = vmul.f32 %v1447_v48, %v1447_v48  ;;  %2264 = vmatprep.subr.bf16.mxu1 %v2263_v3 }
 0x483   : > { %v1464_v41 = vmul.f32 %v1449_v22, %v1449_v22  ;;  %v1451_v51 = vpop.f32.mrb[11].mxu0 }
 0x484   : > { %v1465_v43 = vmul.f32 %v1451_v51, %v1451_v51 }
 0x485   : > { %v1470_v13 = vadd.f32 %v1464_v41, %v1458_v16  ;;  %2266 = vmatpush3.bf16.msra.mxu1 %v2263_v3  ;;  %v1860_v62 = vpop.permute.xlu1 %1859 }
 0x486   : > { %v1471_v45 = vadd.f32 %v1465_v43, %v1459_v12  ;;  %2268 = vmatprep.subr.bf16.mxu1 %v2267_v40 }
 0x487   : > { %1618 = vmatprep.mubr.f32.mxu1 %v1470_v13 }
 0x488   : > { %2032 = vmatmul.mubr.msk.f32.gmra.mrb[2].mxu1 %vm1474_vm10, %v1469_v59  ;;  %2142 = vmatmul.mubr.msk.f32.vlgmr.msra.gmra.mrb[12].mxu0 %vm1479_vm11, %v1471_v45 }
 0x489   : > { %2270 = vmatpush3.bf16.msra.mxu1 %v2267_v40 }
 0x48a   : > { %2272 = vmatprep.subr.bf16.mxu1 %v2271_v20 }
 0x48d   : > { %2274 = vmatpush3.bf16.msra.mxu1 %v2271_v20 }
 0x543   : > { %v2067_v10 = vpop.f32.mrb[0].mxu1 }
 0x544   : > { %v2068_v29 = vpop.f32.mrb[1].mxu1 }
 0x545   : > { %v2069_v17 = vadd.f32 %v2068_v29, %v2067_v10  ;;  %v1880_v29 = vpop.permute.xlu1 %1879 }
 0x55b   : > { %v2070_v19 = vpop.f32.mrb[2].mxu1  ;;  %v2143_v36 = vpop.f32.mrb[12].mxu0 }
 0x55c   : > { %v2071_v54 = vpop.f32.mrb[3].mxu1  ;;  %v1690_v14 = vpop.f32.mrb[13].mxu0 }
 0x55d   : > { %v2072_v21 = vadd.f32 %v2071_v54, %v2070_v19  ;;  %v1691_v26 = vadd.f32 %v2069_v17, %v1690_v14 }
 0x55f   : > { %v1696_v38 = vadd.f32 %v2143_v36, %v2072_v21  ;;  %v1699_v47 = vmax.f32 %v1691_v26, 1e-05 }
 0x561   : > { %v1700_v18 = vmax.f32 %v1696_v38, 1e-05  ;;  %v1703_v2 = vmul.f32 %v1701_v44, %v1699_v47 }
 0x563   : > { %v1704_v9 = vmul.f32 %v1702_v8, %v1700_v18  ;;  %2176 = vmatprep.mubr.f32.mxu1 %v1703_v2 }
 0x565   : > { %2177 = vmatmul.mubr.f32.vlgmr.msra.gmra.mrb[4].mxu1 %v1704_v9 }
 0x638   : > { %v2178_v46 = vpop.f32.mrb[4].mxu1 }
 0x639   : > { %v1799_v60 = vmul.f32 %v2178_v46, %v1797_v55  ;;  %v1787_v42 = vpop.f32.mrb[5].mxu1 }
 0x63a   : > { %v1798_v58 = vmul.f32 %v1796_v7, %v1787_v42 }
 0x63b   : > { %v1805_v59 = vmul.f32 1e+12, %v1799_v60 }
 0x63c   : > { %v1804_v35 = vmul.f32 1e+12, %v1798_v58 }
 0x63d   : > { %v1815_v48 = vadd.f32 1.0, %v1805_v59  ;;  %v1818_v16 = vmul.f32 -0.5, %v1805_v59  ;;  %v1821_v12 = vand.u32 2147483647, %v1805_v59 }
 0x63e   : > { %v1806_v22 = vadd.f32 1.0, %v1804_v35  ;;  %v1809_v41 = vmul.f32 -0.5, %v1804_v35  ;;  %v1812_v13 = vand.u32 2147483647, %v1804_v35 }
 0x63f   : > { %2677 = vlog2.f32 %v1815_v48  ;;  %v1819_v51 = vadd.f32 1.0, %v1818_v16  ;;  %vm1822_vm12 = vcmp.lt.f32.partialorder %v1821_v12, 0.0004427343 }
 0x640   : > { %2679 = vlog2.f32 %v1806_v22  ;;  %v1810_v43 = vadd.f32 1.0, %v1809_v41  ;;  %vm1813_vm13 = vcmp.lt.f32.partialorder %v1812_v13, 0.0004427343 }
 0x641   : > { %v1820_v30 = vmul.f32 %v1819_v51, %v1805_v59 }
 0x642   : > { %v1811_v50 = vmul.f32 %v1810_v43, %v1804_v35 }
 0x649   : > { %v2678_v45 = vpop.eup %2677 }
 0x64a   : > { %v2680_v5 = vpop.eup %2679  ;;  %v1817_v28 = vmul.f32 0.6931472, %v2678_v45 }
 0x64b   : > { %v1808_v11 = vmul.f32 0.6931472, %v2680_v5 }
 0x64c   : > { %v1823_v0 = vsel %vm1822_vm12, %v1820_v30, %v1817_v28 }
 0x64d   : > { %v1835_v56 = vmul.f32 %v1832_v37, %v1823_v0  ;;  %v1814_v39 = vsel %vm1813_vm13, %v1811_v50, %v1808_v11 }
 0x64e   : > { %v1834_v57 = vmul.f32 %v1827_v32, %v1814_v39 }
 0x64f   : > { %v1838_v15 = vmul.f32 1.442695, %v1835_v56 }
 0x650   : > { %v1836_v34 = vmul.f32 1.442695, %v1834_v57 }
 0x651   : > { %2681 = vpow2.f32 %v1838_v15 }
 0x652   : > { %2683 = vpow2.f32 %v1836_v34 }
 0x65b   : > { %v2682_v31 = vpop.eup %2681 }
 0x65c   : > { %v2684_v49 = vpop.eup %2683  ;;  %v1851_v3 = vmul.f32 %v2682_v31, %v1848_v63 }
 0x65d   : > { %v1850_v4 = vmul.f32 %v2684_v49, %v1843_v61 }
 0x65e   : > { %v1853_v40 = vmul.f32 %v1851_v3, %v1700_v18 }
 0x65f   : > { %v1852_v52 = vmul.f32 %v1850_v4, %v1699_v47 }
 0x660   : > { %v1863_v20 = vadd.f32 %v1860_v62, %v1853_v40 }
 0x661   : > { %v1862_v27 = vadd.f32 %v1856_v25, %v1852_v52 }
 0x662   : > { %2685 = vrsqrt.f32 %v1863_v20  ;;  %vm1873_vm14 = vcmp.eq.f32.partialorder %v1863_v20, inf  ;;  %v1876_v1 = vand.u32 2147483648, %v1863_v20  ;;  %vm1875_vm15 = vcmp.eq.f32.partialorder %v1863_v20, 0.0 }
 0x663   : > { %2687 = vrsqrt.f32 %v1862_v27  ;;  %vm1866_vm0 = vcmp.eq.f32.partialorder %v1862_v27, inf  ;;  %v1869_v17 = vand.u32 2147483648, %v1862_v27  ;;  %vm1868_vm1 = vcmp.eq.f32.partialorder %v1862_v27, 0.0 }
 0x66c   : > { %v2686_v6 = vpop.eup %2685 }
 0x66d   : > { %v2688_v33 = vpop.eup %2687  ;;  %v1872_v23 = vmul.f32 %v2686_v6, %v1863_v20 }
 0x66e   : > { %v1865_v53 = vmul.f32 %v2688_v33, %v1862_v27 }
 0x66f   : > { %v1874_v10 = vsel %vm1873_vm14, %v1863_v20, %v1872_v23 }
 0x670   : > { %v1877_v19 = vsel %vm1875_vm15, %v1876_v1, %v1874_v10  ;;  %v1867_v36 = vsel %vm1866_vm0, %v1862_v27, %v1865_v53 }
 0x671   : > { %v1887_v54 = vsub.f32 %v1877_v19, %v1884_v24  ;;  %v1870_v14 = vsel %vm1868_vm1, %v1869_v17, %v1867_v36 }
 0x672   : > { %v1886_v21 = vsub.f32 %v1870_v14, %v1880_v29 }
 0x673   : > { %1889 = vst [vmem:[%s341_s14 + $0x8] sm:$0xff] %v1887_v54 }
 0x674   : > { %1888 = vst [vmem:[%s341_s14] sm:$0xff] %v1886_v21 }
 0x675   : > { %2816 = shalt.err (!%p2813_p4)
}
 0x676   : > { %s2817_s30 = scalar_lea.hbm %s4384_s28, 256  ;;  %s2821_s10 = scalar_lea.hbm %s4435_s7, 512 }
 0x677   : > { %p2818_p9 = scmp.ne.s32.totalorder %s4384_s28, %s2817_s30  ;;  %p2822_p11 = scmp.lt.u32.totalorder %s4384_s28, %s4435_s7 }
 0x678   : > { %p2823_p13 = scmp.lt.u32.totalorder %s2821_s10, %s2817_s30  ;;  %p2825_p10 = scmp.lt.u32.totalorder %s2817_s30, %s4384_s28 }
 0x679   : > { %p2819_p0 = pnand %p2818_p9, %p3085_p5 }
 0x67a   : > { %p2824_p6 = por %p2823_p13, %p2822_p11 }
 0x67b   : > { %p2820_p8 = pneg %p2819_p0 }
 0x67c   : > { %p2826_p3 = por %p2825_p10, %p2824_p6 }
 0x67e   : > { %p2827_p7 = pnand %p2826_p3, %p2820_p8 }
 0x680   : > { %2830 = shalt.err (!%p2827_p7)
}
 0x681   : > { %s2901_s21 = smov 128   ;;  %s2902_s23 = smov 8  }
 0x682   : > { %2292 = dma.vmem_to_hbm [thread:$0]  (%p3085_p5), %s4379_s16, 256, %s4384_s28, %s1891_s13, %s2901_s21, %s2901_s21, %s2902_s23  }
 0x683 PF: > { %s4509_s17 = sld [smem:[#allocation17_spill]]  ;;  %s1919_s15 = sand.u32 1, %s2865_s24  }
 0x684   : > { %p4511_p2 = scmp.ge.s32.totalorder %s2877_s27, 2  ;;  %s1920_s8 = scalar_lea.sflag [#allocation6], %s1919_s15 }
 0x689   : > { %p4510_p12 = scmp.ne.s32.totalorder %s4509_s17, 0 }
 0x68b   : > { %p2309_p1 = pnand %p4511_p2, %p4510_p12 }
 0x68d   : > { %2860 = dma.done.wait (!%p2309_p1), %s1920_s8, 256  }
 0x68e   : > { %2862 = vsyncadd (!%p2309_p1), %s1920_s8, 4294967040  ;;  %p22_p4 = scmp.ge.s32.totalorder %s3053_s18, 4   ;;  %s4512_s24 = smov %s2869_s25 }
 0x68f   : > { %s4513_s25 = smov %s2873_s26  ;;  %s4514_s26 = smov %s3081_s12 }
 0x690   : > { %s4515_s27 = smov %s3053_s18  ;;  %24 = sbr.rel (!%p22_p4) target bundleno = 9 (0x9), region = 106 }
 0x697   :  { %1925 = vsyncpa [#allocation5], 1 }
 0x698   :  { %1927 = vsyncpa [#allocation5 + $0x1], 1 }
 0x699   :  { %1928 = vsyncpa [#allocation8], 1 }
 0x69a   :  { %1929 = vsyncpa [#allocation11], 1 }
 0x69b   :  { %1930 = vsyncpa [#allocation6], 1 }
 0x69c   :  { %1932 = vsyncpa [#allocation6 + $0x1], 1 }

// kernel: tpu_custom_call.1
= control target key start
LH: loop header
LB: loop body
LE: loop exit
PB: predicated region body
PF: predicated region fallthrough
CT: control target
= control target key end

     0   :  { %s4428_s0 = inlined_call_operand.hbm [shape: f32[4,1,384], index: 0, kind: input, shape index: {}]   ;;  %s4429_s1 = inlined_call_operand.hbm [shape: bf16[16,48], index: 1, kind: input, shape index: {}]   ;;  %s4430_s2 = inlined_call_operand.hbm [shape: f32[384,128], index: 2, kind: input, shape index: {}]   ;;  %s4431_s3 = inlined_call_operand.hbm [shape: f32[128,128], index: 3, kind: input, shape index: {}]   ;;  %s4432_s4 = inlined_call_operand.vmem [shape: f32[16,128], index: 4, kind: input, shape index: {}]   ;;  %s4433_s5 = inlined_call_operand.vmem [shape: f32[16,128], index: 5, kind: input, shape index: {}]   ;;  %s4434_s6 = inlined_call_operand.vmem [shape: f32[16,8], index: 6, kind: input, shape index: {}]   ;;  %s4435_s7 = inlined_call_operand.hbm [shape: f32[32,128], index: 7, kind: output, shape index: {}]  }
   0x1   :  { %4446 = sst [smem:[#allocation23_spill]] %s4429_s1 }
   0x2   :  { %12 = vsyncpa [#allocation5], 0 }
   0x3   :  { %14 = vsyncpa [#allocation5 + $0x1], 0 }
   0x4   :  { %15 = vsyncpa [#allocation8], 0 }
   0x5   :  { %16 = vsyncpa [#allocation11], 0 }
   0x6   :  { %17 = vsyncpa [#allocation6], 0 }
   0x7   :  { %19 = vsyncpa [#allocation6 + $0x1], 0  ;;  %s2943_s24 = smov 0   ;;  %s2945_s25 = smov 0  }
   0x8   :  { %s2947_s26 = smov 0   ;;  %s2949_s27 = smov 0  }
   0x9 LB: > { %s2964_s28 = sadd.s32 4294967295, %s2877_s27   ;;  %s2006_s29 = sadd.s32 4294967294, %s2877_s27   ;;  %s2877_s27 = sphi %s2949_s27, %s4515_s27   ;;  %s2873_s26 = sphi %s2947_s26, %s4514_s26   ;;  %s2869_s25 = sphi %s2945_s25, %s4513_s25   ;;  %s2865_s24 = sphi %s2943_s24, %s4512_s24  }
   0xa   : > { %p45_p0 = scmp.ne.s32.totalorder %s2869_s25, %s2865_s24  ;;  %p4436_p1 = scmp.eq.s32.totalorder %s2964_s28, 0 }
   0xb   : > { %p201_p3 = scmp.eq.s32.totalorder %s2006_s29, 1  ;;  %p2007_p5 = scmp.ge.s32.totalorder %s2877_s27, 1 }
   0xc   : > { %p2973_p4 = por %p4436_p1, %p45_p0  ;;  %p208_p7 = scmp.lt.s32.totalorder %s2877_s27, 3 }
   0xd   : > { %p2978_p6 = por %p201_p3, %p45_p0  ;;  %s2879_s10 = smov [#allocation7]  }
   0xe   : > { %s4447_s30 = scalar_select %p2973_p4, 1, 0 }
   0xf   : > { %s4448_s8 = scalar_select %p2978_p6, 1, 0 }
  0x10   : > { %p2983_p8 = pnand %p2007_p5, %p208_p7  ;;  %s220_s11 = sshll.u32 %s2879_s10, 4  ;;  %s2987_s11 = int_to_ptr.vmem [resolvable:$true] %s220_s11 }
  0x11   : > { %4449 = sst [smem:[#allocation17_spill]] %s4448_s8  ;;  %s2880_s13 = smov [#allocation9]  }
  0x12   : > { %s4450_s9 = scalar_select %p2983_p8, 1, 0 }
  0x13   : > { %p2294_p9 = pneg %p2983_p8  ;;  %s233_s14 = sshll.u32 %s2880_s13, 4  ;;  %s2998_s14 = int_to_ptr.vmem [resolvable:$true] %s233_s14 }
  0x14   : > { %s4452_s1 = sld [smem:[#allocation23_spill]] }
  0x15   : > { %p2994_p11 = pnand %p2294_p9, %p4436_p1 }
  0x17   : > { %p3008_p13 = pneg %p2994_p11 }
  0x1a   : > { %s2689_s17 = scalar_lea.hbm %s4452_s1, 128 }
  0x1b   : > { %p2690_p12 = scmp.ne.s32.totalorder %s4452_s1, %s2689_s17  ;;  %p2696_p5 = scmp.lt.u32.totalorder %s2689_s17, %s4452_s1 }
  0x1d   : > { %p2692_p0 = pnand %p3008_p13, %p2690_p12 }
  0x1f   : > { %p2693_p3 = pneg %p2692_p0 }
  0x21   : > { %p2698_p7 = pnand %p2696_p5, %p2693_p3 }
  0x23   : > { %2701 = shalt.err (!%p2698_p7)
}
  0x24   : > { %s2702_s23 = scalar_lea.vmem %s2987_s11, 128  ;;  %p2710_p2 = scmp.lt.s32.totalorder %s2987_s11, %s2987_s11 }
  0x25   : > { %p2703_p9 = scmp.ne.s32.totalorder %s2987_s11, %s2702_s23  ;;  %p2711_p6 = scmp.lt.s32.totalorder %s2702_s23, %s2702_s23 }
  0x27   : > { %p2705_p10 = pnand %p2703_p9, %p3008_p13  ;;  %p2712_p12 = por %p2711_p6, %p2710_p2 }
  0x29   : > { %p2706_p1 = pneg %p2705_p10 }
  0x2b   : > { %p2713_p0 = pnand %p2712_p12, %p2706_p1 }
  0x2d   : > { %2716 = shalt.err (!%p2713_p0)
}
  0x2e   : > { %s2881_s29 = smov 64   ;;  %s2882_s10 = smov 4  }
  0x2f   : > { %2297 = dma.hbm_to_vmem [thread:$0]  (!%p2994_p11), %s4452_s1, 128, %s2987_s11, [#allocation8], %s2881_s29, %s2881_s29, %s2882_s10  }
  0x30   : > { %s2717_s18 = scalar_lea.hbm %s4430_s2, 6144 }
  0x31   : > { %p2718_p2 = scmp.ne.s32.totalorder %s4430_s2, %s2717_s18  ;;  %p2724_p10 = scmp.lt.u32.totalorder %s2717_s18, %s4430_s2 }
  0x33   : > { %p2720_p1 = pnand %p2718_p2, %p3008_p13 }
  0x35   : > { %p2721_p6 = pneg %p2720_p1 }
  0x37   : > { %p2726_p3 = pnand %p2724_p10, %p2721_p6 }
  0x39   : > { %2729 = shalt.err (!%p2726_p3)
}
  0x3a   : > { %s2730_s11 = scalar_lea.vmem %s2998_s14, 6144  ;;  %p2738_p12 = scmp.lt.s32.totalorder %s2998_s14, %s2998_s14 }
  0x3b   : > { %p2731_p5 = scmp.ne.s32.totalorder %s2998_s14, %s2730_s11  ;;  %p2739_p0 = scmp.lt.s32.totalorder %s2730_s11, %s2730_s11 }
  0x3d   : > { %p2733_p7 = pnand %p2731_p5, %p3008_p13  ;;  %p2740_p2 = por %p2739_p0, %p2738_p12 }
  0x3f   : > { %p2734_p9 = pneg %p2733_p7 }
  0x41   : > { %p2741_p1 = pnand %p2740_p2, %p2734_p9 }
  0x43   : > { %2744 = shalt.err (!%p2741_p1)
}
  0x44   : > { %s2883_s29 = smov 128   ;;  %s2884_s10 = smov 8  }
  0x45   : > { %2300 = dma.hbm_to_vmem [thread:$0]  (!%p2994_p11), %s4430_s2, 6144, %s2998_s14, [#allocation8], %s2883_s29, %s2883_s29, %s2884_s10  }
  0x46   : > { %s2885_s16 = smov [#allocation10]   ;;  %s3053_s18 = sadd.s32 1, %s2877_s27  }
  0x47   : > { %s246_s17 = sshll.u32 %s2885_s16, 4  ;;  %s2745_s22 = scalar_lea.hbm %s4431_s3, 2048  ;;  %s247_s17 = int_to_ptr.vmem [resolvable:$true] %s246_s17 }
  0x48   : > { %p2746_p6 = scmp.ne.s32.totalorder %s4431_s3, %s2745_s22  ;;  %p2752_p5 = scmp.lt.u32.totalorder %s2745_s22, %s4431_s3 }
  0x4a   : > { %p2748_p10 = pnand %p2746_p6, %p3008_p13 }
  0x4c   : > { %p2749_p3 = pneg %p2748_p10 }
  0x4e   : > { %p2754_p7 = pnand %p2752_p5, %p2749_p3 }
  0x50   : > { %2757 = shalt.err (!%p2754_p7)
}
  0x51   : > { %s2758_s14 = scalar_lea.vmem %s247_s17, 2048  ;;  %p2766_p2 = scmp.lt.s32.totalorder %s247_s17, %s247_s17 }
  0x52   : > { %p2759_p9 = scmp.ne.s32.totalorder %s247_s17, %s2758_s14  ;;  %p2767_p1 = scmp.lt.s32.totalorder %s2758_s14, %s2758_s14 }
  0x54   : > { %p2761_p12 = pnand %p2759_p9, %p3008_p13  ;;  %p2768_p4 = por %p2767_p1, %p2766_p2 }
  0x56   : > { %p2762_p0 = pneg %p2761_p12 }
  0x58   : > { %p2769_p8 = pnand %p2768_p4, %p2762_p0 }
  0x5a   : > { %2772 = shalt.err (!%p2769_p8)
}
  0x5b   : > { %2303 = dma.hbm_to_vmem [thread:$0]  (!%p2994_p11), %s4431_s3, 2048, %s247_s17, [#allocation11], %s2883_s29, %s2883_s29, %s2884_s10  }
  0x5c   : > { %s29_s1 = ssub.s32 %s2877_s27, %s3053_s18  ;;  %s32_s8 = sadd.s32 1, %s2873_s26 }
  0x5d   : > { %p30_p4 = scmp.eq.s32.totalorder %s29_s1, 0  ;;  %p39_p8 = scmp.ne.s32.totalorder %s2873_s26, %s2869_s25 }
  0x5e   : > { %p40_p13 = scmp.eq.s32.totalorder %s2877_s27, 0  ;;  %p2315_p6 = scmp.lt.s32.totalorder %s2877_s27, 2 }
  0x5f   : > { %s3081_s12 = scalar_select %p30_p4, %s2873_s26, %s32_s8  }
  0x60   : > { %p41_p10 = por %p40_p13, %p39_p8  ;;  %p4454_p3 = scmp.eq.s32.totalorder %s2964_s28, 1 }
  0x61   : > { %s269_s16 = sand.u32 1, %s2873_s26   ;;  %s2276_s19 = smul.u32 96, %s2877_s27 }
  0x62   : > { %p3085_p5 = por %p4454_p3, %p39_p8  ;;  %s2275_s21 = smul.u32 6, %s269_s16 }
  0x63   : > { %s3094_s29 = scalar_lea.hbm %s4428_s0, %s2276_s19  ;;  %p3096_p11 = pnand %p2315_p6, %p41_p10 }
  0x64   : > { %s273_s17 = scalar_lea.vmem [#allocation4], %s2275_s21  ;;  %s3102_s14 = scalar_lea.sflag [#allocation5], %s269_s16 }
  0x65   : > { %s281_s11 = sshll.u32 %s273_s17, 4  ;;  %s2773_s13 = scalar_lea.hbm %s3094_s29, 96  ;;  %s3100_s11 = int_to_ptr.vmem [resolvable:$true] %s281_s11 }
  0x66   : > { %p2774_p7 = scmp.ne.s32.totalorder %s3094_s29, %s2773_s13  ;;  %p2775_p9 = pneg %p3096_p11 }
  0x67   : > { %s2778_s8 = scalar_lea.hbm %s4428_s0, 192  ;;  %p2779_p2 = scmp.lt.u32.totalorder %s3094_s29, %s4428_s0 }
  0x68   : > { %p2776_p12 = pnand %p2775_p9, %p2774_p7  ;;  %p2780_p1 = scmp.lt.u32.totalorder %s2778_s8, %s2773_s13 }
  0x69   : > { %p2782_p8 = scmp.lt.u32.totalorder %s2773_s13, %s3094_s29 }
  0x6a   : > { %p2777_p0 = pneg %p2776_p12  ;;  %p2781_p4 = por %p2780_p1, %p2779_p2 }
  0x6c   : > { %p2783_p13 = por %p2782_p8, %p2781_p4 }
  0x6e   : > { %p2784_p6 = pnand %p2783_p13, %p2777_p0 }
  0x70   : > { %2787 = shalt.err (!%p2784_p6)
}
  0x71   : > { %s2788_s16 = scalar_lea.vmem %s3100_s11, 96  ;;  %s2886_s21 = smov [#allocation4]  }
  0x72   : > { %p2789_p10 = scmp.ne.s32.totalorder %s3100_s11, %s2788_s16  ;;  %s2793_s23 = sshll.u32 %s2886_s21, 4  ;;  %s2794_s23 = int_to_ptr.vmem [resolvable:$false] %s2793_s23 }
  0x73   : > { %s2795_s17 = scalar_lea.vmem %s2794_s23, 192  ;;  %p2796_p12 = scmp.lt.s32.totalorder %s3100_s11, %s2794_s23 }
  0x74   : > { %p2791_p3 = pnand %p2789_p10, %p2775_p9  ;;  %p2797_p2 = scmp.lt.s32.totalorder %s2795_s17, %s2788_s16 }
  0x76   : > { %p2792_p7 = pneg %p2791_p3  ;;  %p2798_p1 = por %p2797_p2, %p2796_p12 }
  0x78   : > { %p2799_p4 = pnand %p2798_p1, %p2792_p7 }
  0x7a   : > { %2802 = shalt.err (!%p2799_p4)
}
  0x7b   : > { %s2887_s13 = smov 48   ;;  %s2888_s15 = smov 3  }
  0x7c   : > { %2307 = dma.hbm_to_vmem [thread:$0]  (!%p3096_p11), %s3094_s29, 96, %s3100_s11, %s3102_s14, %s2887_s13, %s2887_s13, %s2888_s15  }
  0x7d   : > { %p4457_p9 = scmp.ne.s32.totalorder %s4450_s9, 0 }
  0x7f   : > { %293 = sbr.rel (%p4457_p9) target bundleno = 1667 (0x683), region = 48 }
  0x86   : > { %s3133_s1 = sand.u32 1, %s2869_s25   ;;  %p4458_p0 = scmp.ne.s32.totalorder %s4447_s30, 0 }
  0x87   : > { %s2277_s8 = smul.u32 6, %s3133_s1  ;;  %s296_s19 = scalar_lea.sflag [#allocation5], %s3133_s1 }
  0x89   : > { %s299_s22 = scalar_lea.vmem [#allocation4], %s2277_s8 }
  0x8a   : > { %2848 = dma.done.wait (%p4458_p0), %s296_s19, 96  }
  0x8b   : > { %2850 = vsyncadd (%p4458_p0), %s296_s19, 4294967200  ;;  %p4459_p8 = scmp.eq.s32.totalorder %s2964_s28, 0 }
  0x8d   : > { %2852 = dma.done.wait (%p4459_p8), [#allocation8], 6272   ;;  %p4460_p11 = pmov %p4459_p8 }
  0x8e   : > { %p4461_p13 = pmov %p4459_p8 }
  0x8f   : > { %2854 = vsyncadd (%p4460_p11), [#allocation8], 4294961024 }
  0x90   : > { %2856 = dma.done.wait (%p4461_p13), [#allocation11], 2048   ;;  %p4462_p6 = pmov %p4459_p8 }
  0x91   : > { %v345_v0 = vlaneseq  ;;  %v424_v5 = vld [vmem:[%s299_s22] sm:$0x7]  ;;  %v2020_v6 = vld [vmem:[%s299_s22 + $0x3] sm:$0x7]  ;;  %s2889_s30 = smov 20   ;;  %s2890_s9 = smov 127  }
  0x92   : > { %2858 = vsyncadd (%p4462_p6), [#allocation11], 4294965248  ;;  %s2891_s29 = smov 126   ;;  %s2892_s10 = smov 124  }
  0x93   : > { %v3149_v1 = vshrl.u32 %v345_v0, 7  ;;  %v3154_v15 = vand.u32 127, %v345_v0  ;;  %s2893_s11 = smov 120   ;;  %s2894_s14 = smov 112  }
  0x94   : > { %s2895_s16 = smov 96   ;;  %s2030_s21 = sshll.u32 %s2964_s28, 8 }
  0x95   : > { %4463 = vst [vmem:[#allocation18_spill] sm:$0xff] %v3149_v1  ;;  %v428_v2 = vsub.s32 0, %v3149_v1  ;;  %v432_v3 = vsub.s32 1, %v3149_v1  ;;  %v436_v4 = vsub.s32 2, %v3149_v1  ;;  %vm449_vm0 = vcmp.lt.s32.totalorder %v3154_v15, 20  ;;  %s4384_s28 = scalar_lea.hbm %s4435_s7, %s2030_s21  ;;  %s1891_s13 = scalar_lea.sflag [#allocation6], %s3133_s1 }
  0x96   : > { %v3188_v32 = vadd.s32 24, %v3149_v1  ;;  %v3191_v33 = vadd.s32 40, %v3149_v1  ;;  %v3196_v36 = vadd.s32 8, %v3149_v1  ;;  %v3199_v37 = vadd.s32 16, %v3149_v1  ;;  %s2900_s8 = smov [#allocation12]  }
  0x97   : > { %v429_v7 = vrot.slane %v424_v5, %v428_v2  ;;  %v433_v8 = vrot.slane %v424_v5, %v432_v3  ;;  %v870_v9 = vrot.slane %v2020_v6, %v428_v2  ;;  %v874_v10 = vrot.slane %v2020_v6, %v432_v3  ;;  %s2807_s19 = sshll.u32 %s2900_s8, 4  ;;  %s2808_s19 = int_to_ptr.vmem [resolvable:$false] %s2807_s19 }
  0x98   : > { %v437_v13 = vrot.slane %v424_v5, %v436_v4  ;;  %v878_v14 = vrot.slane %v2020_v6, %v436_v4  ;;  %v355_v34 = vand.u32 1, %v3188_v32  ;;  %v357_v35 = vand.u32 1, %v3191_v33  ;;  %s2809_s22 = scalar_lea.vmem %s2808_s19, 512 }
  0x99   : > { %v2374_v11 = vpack.i.bf16 %v433_v8, %v429_v7  ;;  %v2379_v12 = vpack.i.bf16 %v874_v10, %v870_v9  ;;  %vm459_vm1 = vcmp.lt.s32.totalorder %v3154_v15, 127  ;;  %v353_v44 = vand.u32 1, %v3196_v36 }
  0x9a   : > { %vm3202_vm2 = vcmp.ne.s32.totalorder %v355_v34, 0  ;;  %vm3206_vm3 = vcmp.ne.s32.totalorder %v357_v35, 0  ;;  %v354_v45 = vand.u32 1, %v3199_v37  ;;  %v3225_v49 = vadd.s32 32, %v3149_v1 }
  0x9b   : > { %2375 = vrot.lane.b32.xlu0 %v2374_v11, %s2889_s30  ;;  %2380 = vrot.lane.b32.xlu1 %v2379_v12, %s2889_s30  ;;  %vm3293_vm4 = vcmp.ne.s32.totalorder %v353_v44, 0  ;;  %vm517_vm8 = vcmp.lt.s32.totalorder %v3154_v15, 126  ;;  %vm590_vm14 = vcmp.lt.s32.totalorder %v3154_v15, 124 }
  0x9c   : > { %v356_v4 = vand.u32 1, %v3225_v49  ;;  %vm3297_vm5 = vcmp.ne.s32.totalorder %v354_v45, 0 }
  0x9e   : > { %vm3336_vm6 = vcmp.ne.s32.totalorder %v356_v4, 0 }
  0x9f   : > { %445 = vrot.lane.b32.xlu0 %v437_v13, %s2889_s30  ;;  %886 = vrot.lane.b32.xlu1 %v878_v14, %s2889_s30 }
 0x10d   : > { %v2376_v16 = vpop.permute.xlu0 %2375  ;;  %v2381_v17 = vpop.permute.xlu1 %2380 }
 0x10e   : > { %v2378_v18 = vunpack.i.h.bf16 %v2376_v16  ;;  %v2377_v19 = vunpack.i.l.bf16 %v2376_v16  ;;  %v2383_v20 = vunpack.i.h.bf16 %v2381_v17  ;;  %v2382_v21 = vunpack.i.l.bf16 %v2381_v17 }
 0x10f   : > { %v352_v17 = vand.u32 1, %v3149_v1  ;;  %v369_v16 = vand.u32 2, %v3191_v33 }
 0x110   : > { %v3159_v22 = vsel %vm449_vm0, %v2377_v19, %v2378_v18  ;;  %v3163_v25 = vsel %vm449_vm0, %v2382_v21, %v2383_v20 }
 0x111   : > { %v446_v23 = vpop.permute.xlu0 %445  ;;  %v887_v24 = vpop.permute.xlu1 %886  ;;  %vm3401_vm7 = vcmp.ne.s32.totalorder %v352_v17, 0  ;;  %vm3487_vm10 = vcmp.ne.s32.totalorder %v369_v16, 0 }
 0x112   : > { %v3167_v26 = vsel %vm449_vm0, %v2378_v18, %v446_v23  ;;  %v3171_v27 = vsel %vm449_vm0, %v446_v23, %v2377_v19  ;;  %v3175_v28 = vsel %vm449_vm0, %v887_v24, %v2382_v21  ;;  %v3182_v30 = vsel %vm449_vm0, %v2383_v20, %v887_v24 }
 0x113   : > { %457 = vrot.lane.b32.xlu1 %v3167_v26, %s2890_s9  ;;  %v2384_v29 = vpack.i.bf16 %v3159_v22, %v3171_v27  ;;  %v2389_v31 = vpack.i.bf16 %v3163_v25, %v3175_v28 }
 0x115   : > { %2385 = vrot.lane.b32.xlu0 %v2384_v29, %s2890_s9 }
 0x117   : > { %895 = vrot.lane.b32.xlu1 %v3182_v30, %s2890_s9 }
 0x119   : > { %2390 = vrot.lane.b32.xlu0 %v2389_v31, %s2890_s9 }
 0x185   : > { %v458_v38 = vpop.permute.xlu1 %457 }
 0x187   : > { %v2386_v39 = vpop.permute.xlu0 %2385 }
 0x188   : > { %v2388_v40 = vunpack.i.h.bf16 %v2386_v39  ;;  %v2387_v41 = vunpack.i.l.bf16 %v2386_v39 }
 0x189   : > { %v896_v51 = vpop.permute.xlu1 %895 }
 0x18a   : > { %v3214_v46 = vsel %vm459_vm1, %v2388_v40, %v458_v38  ;;  %v3218_v47 = vsel %vm459_vm1, %v2387_v41, %v2388_v40  ;;  %v3222_v48 = vsel %vm459_vm1, %v458_v38, %v2387_v41 }
 0x18b   : > { %v2391_v50 = vpop.permute.xlu0 %2390  ;;  %v3231_v52 = vsel %vm3202_vm2, %v3222_v48, %v3167_v26  ;;  %v3237_v53 = vsel %vm3206_vm3, %v3218_v47, %v3171_v27  ;;  %v3243_v54 = vsel %vm3202_vm2, %v3218_v47, %v3171_v27  ;;  %v3249_v55 = vsel %vm3202_vm2, %v3214_v46, %v3159_v22 }
 0x18c   : > { %v2393_v56 = vunpack.i.h.bf16 %v2391_v50  ;;  %v2392_v57 = vunpack.i.l.bf16 %v2391_v50  ;;  %v2399_v58 = vpack.i.bf16 %v3237_v53, %v3231_v52  ;;  %v2394_v59 = vpack.i.bf16 %v3249_v55, %v3243_v54 }
 0x18d   : > { %v3259_v60 = vsel %vm3206_vm3, %v3214_v46, %v3159_v22  ;;  %v3265_v61 = vsel %vm3206_vm3, %v3222_v48, %v3167_v26  ;;  %v3328_v13 = vsel %vm3293_vm4, %v3222_v48, %v3167_v26  ;;  %v3334_v14 = vsel %vm3297_vm5, %v3218_v47, %v3171_v27 }
 0x18e   : > { %v3269_v62 = vsel %vm459_vm1, %v2392_v57, %v2393_v56  ;;  %v897_v63 = vsel %vm459_vm1, %v2393_v56, %v896_v51  ;;  %v899_v0 = vsel %vm459_vm1, %v896_v51, %v2392_v57  ;;  %2400 = vrot.lane.b32.xlu1 %v2399_v58, %s2891_s29  ;;  %2395 = vrot.lane.b32.xlu0 %v2394_v59, %s2891_s29 }
 0x18f   : > { %v3281_v2 = vsel %vm3202_vm2, %v3269_v62, %v3175_v28  ;;  %v3286_v3 = vsel %vm3202_vm2, %v897_v63, %v3163_v25  ;;  %v2404_v6 = vpack.i.bf16 %v3265_v61, %v3259_v60  ;;  %v3304_v9 = vsel %vm3206_vm3, %v897_v63, %v3163_v25 }
 0x190   : > { %v2409_v5 = vpack.i.bf16 %v3286_v3, %v3281_v2  ;;  %v3309_v10 = vsel %vm3206_vm3, %v899_v0, %v3182_v30  ;;  %v3314_v11 = vsel %vm3202_vm2, %v899_v0, %v3182_v30  ;;  %v3320_v12 = vsel %vm3206_vm3, %v3269_v62, %v3175_v28 }
 0x191   : > { %v2419_v18 = vpack.i.bf16 %v3309_v10, %v3304_v9  ;;  %v2414_v19 = vpack.i.bf16 %v3320_v12, %v3314_v11  ;;  %v3349_v20 = vsel %vm3293_vm4, %v3218_v47, %v3171_v27  ;;  %v3355_v21 = vsel %vm3297_vm5, %v3269_v62, %v3175_v28 }
 0x192   : > { %2410 = vrot.lane.b32.xlu1 %v2409_v5, %s2891_s29  ;;  %2405 = vrot.lane.b32.xlu0 %v2404_v6, %s2891_s29  ;;  %4474 = vst [vmem:[#allocation19_spill] sm:$0xff] %v3355_v21  ;;  %v3361_v23 = vsel %vm3293_vm4, %v3214_v46, %v3159_v22  ;;  %v3366_v24 = vsel %vm3297_vm5, %v897_v63, %v3163_v25 }
 0x193   : > { %4475 = vst [vmem:[#allocation20_spill] sm:$0xff] %v3366_v24  ;;  %v3371_v29 = vsel %vm3293_vm4, %v897_v63, %v3163_v25  ;;  %v3376_v31 = vsel %vm3293_vm4, %v899_v0, %v3182_v30  ;;  %v3383_v34 = vsel %vm3297_vm5, %v899_v0, %v3182_v30  ;;  %v3389_v35 = vsel %vm3336_vm6, %v3269_v62, %v3175_v28 }
 0x194   : > { %v3394_v38 = vsel %vm3336_vm6, %v897_v63, %v3163_v25  ;;  %v3399_v39 = vsel %vm3336_vm6, %v899_v0, %v3182_v30  ;;  %v2429_v41 = vpack.i.bf16 %v3334_v14, %v3328_v13  ;;  %v2424_v42 = vpack.i.bf16 %v3361_v23, %v3349_v20 }
 0x195   : > { %v3413_v43 = vsel %vm3336_vm6, %v3218_v47, %v3171_v27  ;;  %v3419_v44 = vsel %vm3336_vm6, %v3214_v46, %v3159_v22  ;;  %v3425_v45 = vsel %vm3297_vm5, %v3214_v46, %v3159_v22  ;;  %v3431_v50 = vsel %vm3297_vm5, %v3222_v48, %v3167_v26 }
 0x196   : > { %2420 = vrot.lane.b32.xlu1 %v2419_v18, %s2891_s29  ;;  %2415 = vrot.lane.b32.xlu0 %v2414_v19, %s2891_s29  ;;  %v3436_v51 = vsel %vm3401_vm7, %v897_v63, %v3163_v25  ;;  %v3441_v56 = vsel %vm3401_vm7, %v899_v0, %v3182_v30  ;;  %v2439_v57 = vpack.i.bf16 %v3419_v44, %v3413_v43  ;;  %v367_v63 = vand.u32 2, %v3188_v32 }
 0x197   : > { %4478 = vst [vmem:[#allocation21_spill] sm:$0xff] %v3441_v56  ;;  %v2434_v58 = vpack.i.bf16 %v3431_v50, %v3425_v45  ;;  %v3453_v25 = vsel %vm3293_vm4, %v3269_v62, %v3175_v28  ;;  %v3461_v30 = vsel %vm3336_vm6, %v3222_v48, %v3167_v26  ;;  %vm663_vm4 = vcmp.lt.s32.totalorder %v3154_v15, 120 }
 0x198   : > { %v2444_v59 = vpack.i.bf16 %v3453_v25, %v3461_v30  ;;  %vm3468_vm9 = vcmp.ne.s32.totalorder %v367_v63, 0 }
 0x19a   : > { %2430 = vrot.lane.b32.xlu1 %v2429_v41, %s2891_s29  ;;  %2425 = vrot.lane.b32.xlu0 %v2424_v42, %s2891_s29 }
 0x19e   : > { %2440 = vrot.lane.b32.xlu1 %v2439_v57, %s2891_s29  ;;  %2435 = vrot.lane.b32.xlu0 %v2434_v58, %s2891_s29 }
 0x1a2   : > { %2445 = vrot.lane.b32.xlu0 %v2444_v59, %s2891_s29 }
 0x200   : > { %v2401_v0 = vpop.permute.xlu1 %2400  ;;  %v2396_v4 = vpop.permute.xlu0 %2395 }
 0x201   : > { %v2402_v6 = vunpack.i.l.bf16 %v2401_v0  ;;  %v2398_v7 = vunpack.i.h.bf16 %v2396_v4  ;;  %v2397_v8 = vunpack.i.l.bf16 %v2396_v4  ;;  %v2403_v58 = vunpack.i.h.bf16 %v2401_v0 }
 0x203   : > { %v521_v17 = vsel %vm517_vm8, %v2398_v7, %v2402_v6  ;;  %v527_v18 = vsel %vm517_vm8, %v2397_v8, %v2398_v7  ;;  %v533_v7 = vsel %vm517_vm8, %v2402_v6, %v2397_v8 }
 0x204   : > { %v2411_v19 = vpop.permute.xlu1 %2410  ;;  %v2406_v41 = vpop.permute.xlu0 %2405  ;;  %v3480_v42 = vsel %vm3468_vm9, %v527_v18, %v3243_v54  ;;  %v3485_v57 = vsel %vm3468_vm9, %v521_v17, %v3249_v55 }
 0x205   : > { %v2408_v59 = vunpack.i.h.bf16 %v2406_v41  ;;  %v2407_v63 = vunpack.i.l.bf16 %v2406_v41  ;;  %v2449_v1 = vpack.i.bf16 %v3485_v57, %v3480_v42 }
 0x207   : > { %v535_v54 = vsel %vm517_vm8, %v2408_v59, %v2403_v58  ;;  %v523_v55 = vsel %vm517_vm8, %v2407_v63, %v2408_v59  ;;  %v529_v0 = vsel %vm517_vm8, %v2403_v58, %v2407_v63  ;;  %2450 = vrot.lane.b32.xlu1 %v2449_v1, %s2892_s10  ;;  %v3520_v1 = vsel %vm3468_vm9, %v533_v7, %v3231_v52 }
 0x208   : > { %v2421_v16 = vpop.permute.xlu1 %2420  ;;  %v2416_v17 = vpop.permute.xlu0 %2415  ;;  %v3505_v6 = vsel %vm3487_vm10, %v523_v55, %v3259_v60  ;;  %v3510_v8 = vsel %vm3487_vm10, %v535_v54, %v3265_v61  ;;  %v3515_v18 = vsel %vm3487_vm10, %v529_v0, %v3237_v53  ;;  %v2413_v58 = vunpack.i.h.bf16 %v2411_v19 }
 0x209   : > { %v2417_v41 = vunpack.i.l.bf16 %v2416_v17  ;;  %v2412_v59 = vunpack.i.l.bf16 %v2411_v19  ;;  %v2464_v60 = vpack.i.bf16 %v3510_v8, %v3505_v6  ;;  %v2454_v61 = vpack.i.bf16 %v3515_v18, %v3520_v1 }
 0x20a   : > { %v2422_v63 = vunpack.i.l.bf16 %v2421_v16  ;;  %v2418_v54 = vunpack.i.h.bf16 %v2416_v17  ;;  %v2469_v7 = vpack.i.bf16 %v3366_v24, %v3355_v21  ;;  %v2459_v0 = vpack.i.bf16 %v3376_v31, %v3371_v29 }
 0x20b   : > { %v957_v53 = vsel %vm517_vm8, %v2413_v58, %v2417_v41  ;;  %2465 = vrot.lane.b32.xlu1 %v2464_v60, %s2892_s10  ;;  %2455 = vrot.lane.b32.xlu0 %v2454_v61, %s2892_s10  ;;  %v963_v19 = vsel %vm517_vm8, %v2412_v59, %v2413_v58  ;;  %v2423_v56 = vunpack.i.h.bf16 %v2421_v16  ;;  %v969_v61 = vsel %vm517_vm8, %v2417_v41, %v2412_v59 }
 0x20c   : > { %v2431_v55 = vpop.permute.xlu1 %2430  ;;  %v2426_v52 = vpop.permute.xlu0 %2425  ;;  %v3539_v17 = vsel %vm3468_vm9, %v957_v53, %v3286_v3  ;;  %v965_v60 = vsel %vm517_vm8, %v2418_v54, %v2422_v63  ;;  %v3550_v16 = vsel %vm3468_vm9, %v963_v19, %v3281_v2  ;;  %v2474_v53 = vpack.i.bf16 %v3389_v35, %v3383_v34 }
 0x20d   : > { %4483 = vst [vmem:[#allocation22_spill] sm:$0xff] %v3550_v16  ;;  %v2479_v3 = vpack.i.bf16 %v3539_v17, %v3550_v16  ;;  %v365_v24 = vand.u32 2, %v3196_v36  ;;  %v959_v41 = vsel %vm517_vm8, %v2422_v63, %v2423_v56  ;;  %v3562_v59 = vsel %vm3468_vm9, %v969_v61, %v3314_v11 }
 0x20e   : > { %v3567_v2 = vsel %vm3487_vm10, %v965_v60, %v3320_v12  ;;  %v971_v19 = vsel %vm517_vm8, %v2423_v56, %v2418_v54  ;;  %v2427_v16 = vunpack.i.l.bf16 %v2426_v52  ;;  %v3580_v12 = vsel %vm3401_vm7, %v3218_v47, %v3171_v27 }
 0x20f   : > { %2470 = vrot.lane.b32.xlu1 %v2469_v7, %s2891_s29  ;;  %2460 = vrot.lane.b32.xlu0 %v2459_v0, %s2891_s29  ;;  %v2432_v7 = vunpack.i.l.bf16 %v2431_v55  ;;  %v2428_v0 = vunpack.i.h.bf16 %v2426_v52  ;;  %v2484_v56 = vpack.i.bf16 %v3399_v39, %v3394_v38  ;;  %v2489_v54 = vpack.i.bf16 %v3567_v2, %v3562_v59 }
 0x210   : > { %v2436_v58 = vpop.permute.xlu0 %2435  ;;  %v2441_v21 = vpop.permute.xlu1 %2440  ;;  %v3590_v52 = vsel %vm3401_vm7, %v3214_v46, %v3159_v22  ;;  %vm3592_vm11 = vcmp.ne.s32.totalorder %v365_v24, 0  ;;  %v3603_v47 = vsel %vm3487_vm10, %v959_v41, %v3304_v9  ;;  %v3608_v61 = vsel %vm3487_vm10, %v971_v19, %v3309_v10 }
 0x211   : > { %v2442_v5 = vunpack.i.l.bf16 %v2441_v21  ;;  %v366_v22 = vand.u32 2, %v3199_v37  ;;  %v519_v46 = vsel %vm517_vm8, %v2428_v0, %v2432_v7  ;;  %v525_v24 = vsel %vm517_vm8, %v2427_v16, %v2428_v0 }
 0x212   : > { %v2433_v9 = vunpack.i.h.bf16 %v2431_v55  ;;  %v2494_v4 = vpack.i.bf16 %v3608_v61, %v3603_v47  ;;  %v2499_v10 = vpack.i.bf16 %v3590_v52, %v3580_v12  ;;  %v3625_v41 = vsel %vm3401_vm7, %v3269_v62, %v3175_v28 }
 0x213   : > { %2480 = vrot.lane.b32.xlu1 %v2479_v3, %s2892_s10  ;;  %2475 = vrot.lane.b32.xlu0 %v2474_v53, %s2891_s29  ;;  %v2438_v3 = vunpack.i.h.bf16 %v2436_v58  ;;  %v2437_v53 = vunpack.i.l.bf16 %v2436_v58  ;;  %v3631_v58 = vsel %vm3401_vm7, %v3222_v48, %v3167_v26  ;;  %v3636_v55 = vsel %vm3592_vm11, %v525_v24, %v3349_v20 }
 0x214   : > { %v3573_v63 = vpop.permute.xlu0 %2445  ;;  %v3641_v19 = vsel %vm3592_vm11, %v519_v46, %v3361_v23  ;;  %vm3651_vm12 = vcmp.ne.s32.totalorder %v366_v22, 0  ;;  %v2504_v20 = vpack.i.bf16 %v3625_v41, %v3631_v58  ;;  %v531_v23 = vsel %vm517_vm8, %v2432_v7, %v2427_v16 }
 0x215   : > { %v2447_v11 = vunpack.i.l.bf16 %v3573_v63  ;;  %v532_v28 = vsel %vm517_vm8, %v2438_v3, %v2433_v9  ;;  %v520_v62 = vsel %vm517_vm8, %v2437_v53, %v2438_v3  ;;  %v526_v26 = vsel %vm517_vm8, %v2433_v9, %v2437_v53 }
 0x216   : > { %v2443_v40 = vunpack.i.h.bf16 %v2441_v21  ;;  %v2509_v0 = vpack.i.bf16 %v3641_v19, %v3636_v55  ;;  %v3670_v22 = vsel %vm3651_vm12, %v520_v62, %v3425_v45  ;;  %v3675_v16 = vsel %vm3651_vm12, %v532_v28, %v3431_v50 }
 0x217   : > { %v3598_v27 = vsel %vm517_vm8, %v2447_v11, %v2442_v5  ;;  %2485 = vrot.lane.b32.xlu1 %v2484_v56, %s2891_s29  ;;  %2490 = vrot.lane.b32.xlu0 %v2489_v54, %s2892_s10  ;;  %v368_v56 = vand.u32 2, %v3225_v49  ;;  %v3665_v54 = vsel %vm3651_vm12, %v526_v26, %v3334_v14  ;;  %v3684_v14 = vsel %vm3592_vm11, %v531_v23, %v3328_v13 }
 0x218   : > { %v522_v21 = vsel %vm517_vm8, %v2443_v40, %v2447_v11  ;;  %v528_v45 = vsel %vm517_vm8, %v2442_v5, %v2443_v40  ;;  %v2514_v7 = vpack.i.bf16 %v3665_v54, %v3684_v14  ;;  %v2519_v50 = vpack.i.bf16 %v3675_v16, %v3670_v22 }
 0x219   : > { %vm3692_vm13 = vcmp.ne.s32.totalorder %v368_v56, 0  ;;  %v379_v3 = vand.u32 4, %v3188_v32  ;;  %vm736_vm7 = vcmp.lt.s32.totalorder %v3154_v15, 112  ;;  %vm1321_vm9 = vcmask 392192  }
 0x21a   : > { %v3699_v46 = vsel %vm3692_vm13, %v522_v21, %v3419_v44  ;;  %v3706_v13 = vsel %vm3692_vm13, %v528_v45, %v3413_v43  ;;  %v381_v43 = vand.u32 4, %v3191_v33  ;;  %v2448_v21 = vunpack.i.h.bf16 %v3573_v63 }
 0x21b   : > { %2495 = vrot.lane.b32.xlu0 %v2494_v4, %s2892_s10  ;;  %2500 = vrot.lane.b32.xlu1 %v2499_v10, %s2891_s29  ;;  %v2524_v5 = vpack.i.bf16 %v3699_v46, %v3706_v13  ;;  %vm3713_vm15 = vcmp.ne.s32.totalorder %v379_v3, 0  ;;  %v4497_v3 = vld [vmem:[#allocation22_spill] sm:$0xff]  ;;  %vm1474_vm10 = vcmp.ge.s32.totalorder %v3154_v15, 20 }
 0x21c   : > { %vm3733_vm0 = vcmp.ne.s32.totalorder %v381_v43, 0 }
 0x21f   : > { %2505 = vrot.lane.b32.xlu0 %v2504_v20, %s2891_s29  ;;  %2510 = vrot.lane.b32.xlu1 %v2509_v0, %s2892_s10 }
 0x223   : > { %2515 = vrot.lane.b32.xlu0 %v2514_v7, %s2892_s10  ;;  %2520 = vrot.lane.b32.xlu1 %v2519_v50, %s2892_s10 }
 0x227   : > { %2525 = vrot.lane.b32.xlu0 %v2524_v5, %s2892_s10 }
 0x279   : > { %v2451_v24 = vpop.permute.xlu1 %2450 }
 0x27a   : > { %v2453_v53 = vunpack.i.h.bf16 %v2451_v24  ;;  %v2452_v44 = vunpack.i.l.bf16 %v2451_v24 }
 0x27c   : > { %v600_v62 = vsel %vm590_vm14, %v2452_v44, %v2453_v53 }
 0x27d   : > { %v2466_v9 = vpop.permute.xlu1 %2465  ;;  %v2456_v4 = vpop.permute.xlu0 %2455  ;;  %v618_v33 = vsel %vm3713_vm15, %v600_v62, %v3480_v42 }
 0x27e   : > { %v2457_v10 = vunpack.i.l.bf16 %v2456_v4  ;;  %v2468_v26 = vunpack.i.h.bf16 %v2466_v9  ;;  %v2467_v20 = vunpack.i.l.bf16 %v2466_v9  ;;  %v2458_v23 = vunpack.i.h.bf16 %v2456_v4 }
 0x280   : > { %v594_v32 = vsel %vm590_vm14, %v2453_v53, %v2457_v10  ;;  %v596_v50 = vsel %vm590_vm14, %v2467_v20, %v2468_v26  ;;  %v602_v5 = vsel %vm590_vm14, %v2458_v23, %v2467_v20  ;;  %v606_v9 = vsel %vm590_vm14, %v2457_v10, %v2452_v44 }
 0x281   : > { %v2471_v40 = vpop.permute.xlu1 %2470  ;;  %v2461_v0 = vpop.permute.xlu0 %2460  ;;  %v619_v56 = vsel %vm3713_vm15, %v594_v32, %v3485_v57  ;;  %v608_v57 = vsel %vm590_vm14, %v2468_v26, %v2458_v23  ;;  %v3770_v20 = vsel %vm3692_vm13, %v3598_v27, %v3461_v30  ;;  %v625_v60 = vsel %vm3733_vm0, %v596_v50, %v3505_v6 }
 0x282   : > { %v2463_v45 = vunpack.i.h.bf16 %v2461_v0  ;;  %v2462_v7 = vunpack.i.l.bf16 %v2461_v0  ;;  %v2534_v24 = vpack.i.bf16 %v619_v56, %v618_v33  ;;  %v626_v23 = vsel %vm3733_vm0, %v608_v57, %v3510_v8 }
 0x283   : > { %v620_v30 = vsel %vm3713_vm15, %v606_v9, %v3520_v1  ;;  %v624_v27 = vsel %vm3733_vm0, %v602_v5, %v3515_v18 }
 0x284   : > { %v955_v63 = vsel %vm517_vm8, %v2462_v7, %v2463_v45  ;;  %v961_v42 = vsel %vm517_vm8, %v2448_v21, %v2462_v7  ;;  %v967_v53 = vsel %vm517_vm8, %v2463_v45, %v2448_v21  ;;  %2535 = vrot.lane.b32.xlu0 %v2534_v24, %s2893_s11  ;;  %v2473_v21 = vunpack.i.h.bf16 %v2471_v40 }
 0x285   : > { %v2481_v4 = vpop.permute.xlu1 %2480  ;;  %v3748_v43 = vpop.permute.xlu0 %2475  ;;  %v3753_v62 = vsel %vm3592_vm11, %v955_v63, %v3371_v29  ;;  %v3758_v26 = vsel %vm3592_vm11, %v967_v53, %v3376_v31  ;;  %v3763_v44 = vsel %vm3592_vm11, %v961_v42, %v3453_v25  ;;  %v2472_v25 = vunpack.i.l.bf16 %v2471_v40 }
 0x286   : > { %v2477_v10 = vunpack.i.l.bf16 %v3748_v43  ;;  %v2549_v29 = vpack.i.bf16 %v3758_v26, %v3753_v62  ;;  %v2529_v31 = vpack.i.bf16 %v3763_v44, %v3770_v20  ;;  %v2478_v6 = vunpack.i.h.bf16 %v3748_v43 }
 0x287   : > { %v2559_v7 = vpack.i.bf16 %v626_v23, %v625_v60  ;;  %v2539_v1 = vpack.i.bf16 %v624_v27, %v620_v30  ;;  %v2483_v33 = vunpack.i.h.bf16 %v2481_v4  ;;  %v2482_v50 = vunpack.i.l.bf16 %v2481_v4 }
 0x288   : > { %2550 = vrot.lane.b32.xlu0 %v2549_v29, %s2892_s10  ;;  %2530 = vrot.lane.b32.xlu1 %v2529_v31, %s2892_s10  ;;  %v968_v56 = vsel %vm517_vm8, %v2477_v10, %v2472_v25  ;;  %v956_v5 = vsel %vm517_vm8, %v2473_v21, %v2477_v10  ;;  %v962_v10 = vsel %vm517_vm8, %v2472_v25, %v2473_v21  ;;  %v4495_v25 = vld [vmem:[#allocation20_spill] sm:$0xff] }
 0x289   : > { %v2486_v32 = vpop.permute.xlu1 %2485  ;;  %v2491_v0 = vpop.permute.xlu0 %2490  ;;  %v3802_v40 = vsel %vm3651_vm12, %v968_v56, %v3383_v34  ;;  %v4494_v34 = vld [vmem:[#allocation21_spill] sm:$0xff]  ;;  %v3828_v27 = vsel %vm3651_vm12, %v956_v5, %v4495_v25 }
 0x28a   : > { %v2487_v8 = vunpack.i.l.bf16 %v2486_v32  ;;  %v2492_v45 = vunpack.i.l.bf16 %v2491_v0  ;;  %v2493_v24 = vunpack.i.h.bf16 %v2491_v0  ;;  %v2544_v60 = vpack.i.bf16 %v4494_v34, %v3436_v51 }
 0x28b   : > { %v2488_v0 = vunpack.i.h.bf16 %v2486_v32 }
 0x28c   : > { %v964_v18 = vsel %vm517_vm8, %v2478_v6, %v2487_v8  ;;  %2560 = vrot.lane.b32.xlu0 %v2559_v7, %s2893_s11  ;;  %2540 = vrot.lane.b32.xlu1 %v2539_v1, %s2893_s11  ;;  %v1041_v29 = vsel %vm590_vm14, %v2492_v45, %v2482_v50 }
 0x28d   : > { %v2496_v57 = vpop.permute.xlu0 %2495  ;;  %v2501_v63 = vpop.permute.xlu1 %2500  ;;  %v3807_v42 = vsel %vm3692_vm13, %v964_v18, %v3389_v35  ;;  %v1029_v35 = vsel %vm590_vm14, %v2483_v33, %v2492_v45  ;;  %v1055_v32 = vsel %vm3713_vm15, %v1041_v29, %v3562_v59 }
 0x28e   : > { %v2498_v53 = vunpack.i.h.bf16 %v2496_v57  ;;  %v2497_v9 = vunpack.i.l.bf16 %v2496_v57  ;;  %v2503_v4 = vunpack.i.h.bf16 %v2501_v63  ;;  %v2502_v43 = vunpack.i.l.bf16 %v2501_v63  ;;  %v4496_v57 = vld [vmem:[#allocation19_spill] sm:$0xff] }
 0x28f   : > { %v2564_v31 = vpack.i.bf16 %v3807_v42, %v3802_v40  ;;  %v1035_v63 = vsel %vm590_vm14, %v2482_v50, %v2483_v33  ;;  %v1054_v33 = vsel %vm3713_vm15, %v1029_v35, %v3539_v17  ;;  %v958_v50 = vsel %vm517_vm8, %v2487_v8, %v2488_v0 }
 0x290   : > { %v1037_v23 = vsel %vm590_vm14, %v2493_v24, %v2497_v9  ;;  %v3823_v30 = vsel %vm517_vm8, %v2502_v43, %v2503_v4  ;;  %v1031_v56 = vsel %vm590_vm14, %v2497_v9, %v2498_v53  ;;  %v1043_v21 = vsel %vm590_vm14, %v2498_v53, %v2493_v24  ;;  %2545 = vrot.lane.b32.xlu1 %v2544_v60, %s2891_s29  ;;  %v4498_v60 = vld [vmem:[#allocation18_spill] sm:$0xff] }
 0x291   : > { %2565 = vrot.lane.b32.xlu0 %v2564_v31, %s2892_s10  ;;  %v3836_v45 = vpop.permute.xlu0 %2505  ;;  %v2511_v7 = vpop.permute.xlu1 %2510  ;;  %v1059_v1 = vsel %vm3733_vm0, %v1037_v23, %v3567_v2  ;;  %v3847_v24 = vsel %vm3651_vm12, %v962_v10, %v4496_v57  ;;  %v1060_v59 = vsel %vm3733_vm0, %v1031_v56, %v3603_v47  ;;  %v1061_v48 = vsel %vm3733_vm0, %v1043_v21, %v3608_v61  ;;  %v1520_v21 = vld [vmem:[#allocation9 + $0x98] sm:$0xff] }
 0x292   : > { %v2513_v18 = vunpack.i.h.bf16 %v2511_v7  ;;  %v2512_v5 = vunpack.i.l.bf16 %v2511_v7  ;;  %v2579_v53 = vpack.i.bf16 %v1059_v1, %v1055_v32  ;;  %v2554_v9 = vpack.i.bf16 %v3828_v27, %v3847_v24 }
 0x293   : > { %v970_v10 = vsel %vm517_vm8, %v2488_v0, %v2478_v6  ;;  %v2507_v29 = vunpack.i.l.bf16 %v3836_v45  ;;  %v1053_v61 = vsel %vm3713_vm15, %v1035_v63, %v4497_v3  ;;  %v2584_v31 = vpack.i.bf16 %v1061_v48, %v1060_v59 }
 0x294   : > { %v3855_v2 = vsel %vm590_vm14, %v2512_v5, %v2513_v18  ;;  %2555 = vrot.lane.b32.xlu1 %v2554_v9, %s2892_s10  ;;  %v2569_v17 = vpack.i.bf16 %v1054_v33, %v1053_v61  ;;  %v364_v35 = vand.u32 2, %v4498_v60  ;;  %v3882_v6 = vsel %vm3692_vm13, %v958_v50, %v3394_v38 }
 0x295   : > { %2580 = vrot.lane.b32.xlu0 %v2579_v53, %s2893_s11  ;;  %v3873_v47 = vpop.permute.xlu0 %2515  ;;  %v3887_v8 = vsel %vm3692_vm13, %v970_v10, %v3399_v39  ;;  %v518_v23 = vsel %vm517_vm8, %v2503_v4, %v2507_v29  ;;  %v530_v28 = vsel %vm517_vm8, %v2507_v29, %v2502_v43  ;;  %v377_v39 = vand.u32 4, %v3196_v36 }
 0x296   : > { %v2517_v25 = vunpack.i.l.bf16 %v3873_v47  ;;  %v2574_v38 = vpack.i.bf16 %v3887_v8, %v3882_v6  ;;  %vm3898_vm1 = vcmp.ne.s32.totalorder %v364_v35, 0 }
 0x297   : > { %v3906_v11 = vsel %vm3898_vm1, %v518_v23, %v3590_v52  ;;  %v3911_v4 = vsel %vm3898_vm1, %v530_v28, %v3631_v58  ;;  %vm3920_vm2 = vcmp.ne.s32.totalorder %v377_v39, 0 }
 0x298   : > { %2570 = vrot.lane.b32.xlu1 %v2569_v17, %s2893_s11  ;;  %v592_v43 = vsel %vm590_vm14, %v2513_v18, %v2517_v25  ;;  %v604_v56 = vsel %vm590_vm14, %v2517_v25, %v2512_v5  ;;  %v2589_v36 = vpack.i.bf16 %v3911_v4, %v3906_v11  ;;  %v2521_v18 = vpop.permute.xlu1 %2520 }
 0x299   : > { %2585 = vrot.lane.b32.xlu0 %v2584_v31, %s2893_s11  ;;  %v613_v52 = vsel %vm3920_vm2, %v592_v43, %v3641_v19  ;;  %v614_v58 = vsel %vm3920_vm2, %v604_v56, %v3684_v14  ;;  %v3932_v1 = vpop.permute.xlu0 %2525  ;;  %v2523_v32 = vunpack.i.h.bf16 %v2521_v18  ;;  %v2522_v57 = vunpack.i.l.bf16 %v2521_v18 }
 0x29a   : > { %v2599_v7 = vpack.i.bf16 %v614_v58, %v613_v52  ;;  %v378_v19 = vand.u32 4, %v3199_v37  ;;  %v2518_v14 = vunpack.i.h.bf16 %v3873_v47  ;;  %v2508_v37 = vunpack.i.h.bf16 %v3836_v45 }
 0x29b   : > { %v593_v9 = vsel %vm590_vm14, %v2522_v57, %v2523_v32  ;;  %v2527_v56 = vunpack.i.l.bf16 %v3932_v1 }
 0x29c   : > { %2575 = vrot.lane.b32.xlu1 %v2574_v38, %s2892_s10  ;;  %vm3948_vm3 = vcmp.ne.s32.totalorder %v378_v19, 0  ;;  %v599_v47 = vsel %vm590_vm14, %v2518_v14, %v2522_v57 }
 0x29d   : > { %v616_v3 = vsel %vm3948_vm3, %v593_v9, %v3670_v22  ;;  %v615_v58 = vsel %vm3948_vm3, %v599_v47, %v3665_v54  ;;  %v4005_v54 = vsel %vm3898_vm1, %v3823_v30, %v3580_v12  ;;  %v1504_v47 = vld [vmem:[#allocation9 + $0x18] sm:$0xff] }
 0x2a0   : > { %2590 = vrot.lane.b32.xlu1 %v2589_v36, %s2892_s10  ;;  %v380_v36 = vand.u32 4, %v3225_v49 }
 0x2a2   : > { %vm4017_vm5 = vcmp.ne.s32.totalorder %v380_v36, 0  ;;  %v605_v36 = vsel %vm590_vm14, %v2523_v32, %v2518_v14 }
 0x2a4   : > { %2600 = vrot.lane.b32.xlu1 %v2599_v7, %s2893_s11 }
 0x2f6   : > { %v3934_v5 = vpop.permute.xlu0 %2535 }
 0x2f7   : > { %v2538_v50 = vunpack.i.h.bf16 %v3934_v5  ;;  %v2537_v10 = vunpack.i.l.bf16 %v3934_v5 }
 0x2f9   : > { %v673_v43 = vsel %vm663_vm4, %v2537_v10, %v2538_v50 }
 0x2fa   : > { %v3936_v63 = vpop.permute.xlu0 %2550  ;;  %v3938_v53 = vpop.permute.xlu1 %2530  ;;  %v2619_v5 = vpack.i.bf16 %v673_v43, %v615_v58  ;;  %v2528_v58 = vunpack.i.h.bf16 %v3932_v1 }
 0x2fb   : > { %v2552_v31 = vunpack.i.l.bf16 %v3936_v63  ;;  %v2533_v17 = vunpack.i.h.bf16 %v3938_v53  ;;  %v2532_v35 = vunpack.i.l.bf16 %v3938_v53  ;;  %v1517_v53 = vld [vmem:[#allocation9 + $0x80] sm:$0xff] }
 0x2fd   : > { %v1033_v7 = vsel %vm590_vm14, %v2533_v17, %v2552_v31  ;;  %v607_v18 = vsel %vm590_vm14, %v2532_v35, %v2527_v56 }
 0x2fe   : > { %v3944_v59 = vpop.permute.xlu0 %2560  ;;  %v3946_v48 = vpop.permute.xlu1 %2540  ;;  %v623_v12 = vsel %vm4017_vm5, %v607_v18, %v3770_v20  ;;  %v1047_v30 = vsel %vm3920_vm2, %v1033_v7, %v3763_v44  ;;  %v612_v44 = vsel %vm3920_vm2, %v3855_v2, %v3636_v55 }
 0x2ff   : > { %v2542_v29 = vunpack.i.l.bf16 %v3946_v48  ;;  %v2563_v38 = vunpack.i.h.bf16 %v3944_v59  ;;  %v2543_v39 = vunpack.i.h.bf16 %v3946_v48  ;;  %v2604_v7 = vpack.i.bf16 %v1047_v30, %v612_v44 }
 0x300   : > { %v2562_v14 = vunpack.i.l.bf16 %v3944_v59  ;;  %v617_v59 = vsel %vm3948_vm3, %v605_v36, %v3675_v16  ;;  %v376_v44 = vand.u32 4, %v4498_v60 }
 0x301   : > { %v667_v61 = vsel %vm663_vm4, %v2538_v50, %v2542_v29  ;;  %v681_v19 = vsel %vm663_vm4, %v2563_v38, %v2543_v39  ;;  %v679_v18 = vsel %vm663_vm4, %v2542_v29, %v2537_v10 }
 0x302   : > { %v3969_v28 = vpop.permute.xlu1 %2545  ;;  %v2609_v25 = vpack.i.bf16 %v667_v61, %v616_v3  ;;  %v2629_v43 = vpack.i.bf16 %v681_v19, %v623_v12  ;;  %v2614_v16 = vpack.i.bf16 %v679_v18, %v617_v59  ;;  %v669_v12 = vsel %vm663_vm4, %v2562_v14, %v2563_v38 }
 0x303   : > { %v3967_v23 = vpop.permute.xlu0 %2565  ;;  %v2547_v22 = vunpack.i.l.bf16 %v3969_v28  ;;  %v2548_v9 = vunpack.i.h.bf16 %v3969_v28  ;;  %v601_v18 = vsel %vm590_vm14, %v2527_v56, %v2528_v58  ;;  %v675_v60 = vsel %vm663_vm4, %v2543_v39, %v2562_v14 }
 0x304   : > { %2610 = vrot.lane.b32.xlu1 %v2609_v25, %s2894_s14  ;;  %v2568_v10 = vunpack.i.h.bf16 %v3967_v23  ;;  %vm4118_vm6 = vcmp.ne.s32.totalorder %v376_v44, 0 }
 0x305   : > { %v960_v52 = vsel %vm517_vm8, %v2508_v37, %v2547_v22  ;;  %v954_v32 = vsel %vm517_vm8, %v2547_v22, %v2548_v9 }
 0x306   : > { %v3994_v49 = vpop.permute.xlu1 %2555  ;;  %v3999_v57 = vsel %vm3898_vm1, %v960_v52, %v3625_v41 }
 0x307   : > { %v4012_v50 = vpop.permute.xlu0 %2580  ;;  %v2594_v41 = vpack.i.bf16 %v3999_v57, %v4005_v54  ;;  %v2558_v3 = vunpack.i.h.bf16 %v3994_v49  ;;  %v2557_v61 = vunpack.i.l.bf16 %v3994_v49 }
 0x308   : > { %2620 = vrot.lane.b32.xlu1 %v2619_v5, %s2894_s14  ;;  %v595_v5 = vsel %vm590_vm14, %v2528_v58, %v2532_v35  ;;  %v4070_v35 = vsel %vm3898_vm1, %v954_v32, %v3436_v51 }
 0x309   : > { %2595 = vrot.lane.b32.xlu0 %v2594_v41, %s2892_s10  ;;  %v1034_v55 = vsel %vm590_vm14, %v2557_v61, %v2558_v3  ;;  %v622_v36 = vsel %vm4017_vm5, %v595_v5, %v3699_v46  ;;  %v2896_v5 = vmov 0  }
 0x30a   : > { %v4030_v25 = vpop.permute.xlu1 %2570  ;;  %v1050_v51 = vsel %vm3948_vm3, %v1034_v55, %v3847_v24  ;;  %v2624_v55 = vpack.i.bf16 %v669_v12, %v622_v36  ;;  %1357 = vmatprep.mubr.bf16.mxu0 %v2896_v5  ;;  %2670 = vset.pattern.permute.xlu0 %v2896_v5  ;;  %v2582_v12 = vunpack.i.l.bf16 %v4012_v50  ;;  %v1519_v36 = vld [vmem:[#allocation9 + $0x90] sm:$0xff] }
 0x30b   : > { %v2573_v52 = vunpack.i.h.bf16 %v4030_v25  ;;  %v2572_v20 = vunpack.i.l.bf16 %v4030_v25  ;;  %v4057_v2 = vpop.permute.xlu0 %2585  ;;  %2669 = vset.pattern.permute.xlu1 %v2896_v5  ;;  %v2183_v44 = vpack.c.bf16 %v1520_v21, %v1519_v36 }
 0x30c   : > { %2630 = vrot.lane.b32.xlu1 %v2629_v43, %s2895_s16  ;;  %v2587_v19 = vunpack.i.l.bf16 %v4057_v2 }
 0x30d   : > { %2605 = vrot.lane.b32.xlu0 %v2604_v7, %s2893_s11  ;;  %v1107_v22 = vsel %vm663_vm4, %v2572_v20, %v2573_v52  ;;  %v2583_v7 = vunpack.i.h.bf16 %v4012_v50  ;;  %v1113_v50 = vsel %vm663_vm4, %v2582_v12, %v2572_v20 }
 0x30e   : > { %v4060_v1 = vpop.permute.xlu1 %2575  ;;  %v2639_v43 = vpack.i.bf16 %v1107_v22, %v1050_v51  ;;  %v621_v22 = vsel %vm4017_vm5, %v601_v18, %v3706_v13  ;;  %v966_v51 = vsel %vm517_vm8, %v2548_v9, %v2508_v37  ;;  %v1522_v18 = vld [vmem:[#allocation9 + $0xa8] sm:$0xff]  ;;  %vm809_vm8 = vcmp.lt.s32.totalorder %v3154_v15, 96 }
 0x30f   : > { %v2577_v29 = vunpack.i.l.bf16 %v4060_v1  ;;  %v1109_v46 = vsel %vm663_vm4, %v2583_v7, %v2587_v19  ;;  %v2578_v37 = vunpack.i.h.bf16 %v4060_v1  ;;  %v4165_v9 = vsel %vm3898_vm1, %v966_v51, %v4494_v34  ;;  %v1525_v51 = vld [vmem:[#allocation9 + $0xc0] sm:$0xff] }
 0x310   : > { %1002 = vrot.lane.b32.xlu1 %v4070_v35, %s2892_s10 }
 0x311   : > { %v1036_v41 = vsel %vm590_vm14, %v2568_v10, %v2577_v29  ;;  %2615 = vrot.lane.b32.xlu0 %v2614_v16, %s2894_s14  ;;  %v2567_v16 = vunpack.i.l.bf16 %v3967_v23 }
 0x312   : > { %v4091_v30 = vpop.permute.xlu1 %2590  ;;  %v1056_v38 = vsel %vm4017_vm5, %v1036_v41, %v3807_v42  ;;  %v2553_v42 = vunpack.i.h.bf16 %v3936_v63  ;;  %v2634_v41 = vpack.i.bf16 %v675_v60, %v621_v22  ;;  %v1101_v63 = vsel %vm663_vm4, %v2573_v52, %v2582_v12  ;;  %v1506_v60 = vld [vmem:[#allocation9 + $0x28] sm:$0xff] }
 0x313   : > { %v2593_v32 = vunpack.i.h.bf16 %v4091_v30  ;;  %v2592_v24 = vunpack.i.l.bf16 %v4091_v30  ;;  %v2649_v58 = vpack.i.bf16 %v1109_v46, %v1056_v38  ;;  %v1040_v45 = vsel %vm590_vm14, %v2567_v16, %v2557_v61  ;;  %v1503_v38 = vld [vmem:[#allocation9 + $0x10] sm:$0xff]  ;;  %v1505_v46 = vld [vmem:[#allocation9 + $0x20] sm:$0xff]  ;;  %v1526_v12 = vld [vmem:[#allocation9 + $0xc8] sm:$0xff] }
 0x314   : > { %2640 = vrot.lane.b32.xlu1 %v2639_v43, %s2894_s14  ;;  %v1028_v61 = vsel %vm590_vm14, %v2558_v3, %v2567_v16  ;;  %v1052_v34 = vsel %vm3948_vm3, %v1040_v45, %v3802_v40  ;;  %v2588_v3 = vunpack.i.h.bf16 %v4057_v2  ;;  %v1042_v2 = vsel %vm590_vm14, %v2578_v37, %v2568_v10  ;;  %v1518_v10 = vld [vmem:[#allocation9 + $0x88] sm:$0xff]  ;;  %v1507_v16 = vld [vmem:[#allocation9 + $0x30] sm:$0xff]  ;;  %v1509_v45 = vld [vmem:[#allocation9 + $0x40] sm:$0xff] }
 0x315   : > { %2625 = vrot.lane.b32.xlu0 %v2624_v55, %s2895_s16  ;;  %v591_v48 = vsel %vm590_vm14, %v2592_v24, %v2593_v32  ;;  %v2659_v49 = vpack.i.bf16 %v1113_v50, %v1052_v34  ;;  %v1058_v33 = vsel %vm4017_vm5, %v1042_v2, %v3887_v8  ;;  %v1521_v8 = vld [vmem:[#allocation9 + $0xa0] sm:$0xff]  ;;  %v2185_v55 = vpack.c.bf16 %v1504_v47, %v1503_v38  ;;  %v1512_v34 = vld [vmem:[#allocation9 + $0x58] sm:$0xff] }
 0x316   : > { %v4116_v56 = vpop.permute.xlu1 %2600  ;;  %v610_v43 = vsel %vm4118_vm6, %v591_v48, %v3906_v11  ;;  %v1027_v11 = vsel %vm590_vm14, %v2552_v31, %v2553_v42  ;;  %v1030_v31 = vsel %vm590_vm14, %v2577_v29, %v2578_v37  ;;  %v1103_v52 = vsel %vm663_vm4, %v2587_v19, %v2588_v3  ;;  %v1501_v29 = vld [vmem:[#allocation9] sm:$0xff]  ;;  %v1502_v19 = vld [vmem:[#allocation9 + $0x8] sm:$0xff] }
 0x317   : > { %v2603_v39 = vunpack.i.h.bf16 %v4116_v56  ;;  %v2602_v14 = vunpack.i.l.bf16 %v4116_v56  ;;  %v1048_v0 = vsel %vm3920_vm2, %v1027_v11, %v3753_v62  ;;  %v1051_v62 = vsel %vm3948_vm3, %v1028_v61, %v3828_v27  ;;  %v1510_v37 = vld [vmem:[#allocation9 + $0x48] sm:$0xff]  ;;  %v1528_v11 = vld [vmem:[#allocation9 + $0xd8] sm:$0xff] }
 0x318   : > { %2650 = vrot.lane.b32.xlu1 %v2649_v58, %s2895_s16  ;;  %v2644_v40 = vpack.i.bf16 %v1101_v63, %v1051_v62  ;;  %v1057_v25 = vsel %vm4017_vm5, %v1030_v31, %v3882_v6  ;;  %v1039_v27 = vsel %vm590_vm14, %v2553_v42, %v2533_v17  ;;  %v1115_v23 = vsel %vm663_vm4, %v2588_v3, %v2583_v7  ;;  %v1523_v42 = vld [vmem:[#allocation9 + $0xb0] sm:$0xff]  ;;  %v1524_v58 = vld [vmem:[#allocation9 + $0xb8] sm:$0xff] }
 0x319   : > { %v665_v13 = vsel %vm663_vm4, %v2602_v14, %v2603_v39  ;;  %2635 = vrot.lane.b32.xlu0 %v2634_v41, %s2895_s16  ;;  %v2654_v20 = vpack.i.bf16 %v1103_v52, %v1057_v25  ;;  %v1049_v6 = vsel %vm3920_vm2, %v1039_v27, %v3758_v26  ;;  %v2664_v1 = vpack.i.bf16 %v1115_v23, %v1058_v33  ;;  %v1508_v41 = vld [vmem:[#allocation9 + $0x38] sm:$0xff] }
 0x31a   : > { %v847_v28 = vpack.c.bf16 %v665_v13, %v610_v43  ;;  %v2179_v17 = vpack.c.bf16 %v1518_v10, %v1517_v53  ;;  %v2181_v26 = vpack.c.bf16 %v1502_v19, %v1501_v29  ;;  %v2187_v7 = vpack.c.bf16 %v1522_v18, %v1521_v8 }
 0x31b   : > { %v2189_v48 = vpack.c.bf16 %v1506_v60, %v1505_v46  ;;  %v2191_v22 = vpack.c.bf16 %v1524_v58, %v1523_v42  ;;  %v2193_v43 = vpack.c.bf16 %v1508_v41, %v1507_v16  ;;  %v2195_v13 = vpack.c.bf16 %v1526_v12, %v1525_v51 }
 0x31c   : > { %1014 = vrot.lane.b32.xlu1 %v4165_v9, %s2892_s10  ;;  %1325 = vmatprep.subr.bf16.mxu0 %v847_v28  ;;  %v1527_v28 = vld [vmem:[#allocation9 + $0xd0] sm:$0xff]  ;;  %v2197_v50 = vpack.c.bf16 %v1510_v37, %v1509_v45 }
 0x31d   : > { %1076 = vrot.lane.b32.xlu0 %v1048_v0, %s2893_s11  ;;  %2180 = vmatprep.subr.bf16.mxu1 %v2179_v17  ;;  %v2199_v61 = vpack.c.bf16 %v1528_v11, %v1527_v28  ;;  %v1511_v0 = vld [vmem:[#allocation9 + $0x50] sm:$0xff] }
 0x31e   : > { %2182 = vmatpush3.bf16.msra.mxu1 %v2181_v26  ;;  %v2201_v63 = vpack.c.bf16 %v1512_v34, %v1511_v0 }
 0x31f   : > { %2184 = vmatprep.subr.bf16.mxu1 %v2183_v44 }
 0x320   : > { %2660 = vrot.lane.b32.xlu1 %v2659_v49, %s2894_s14 }
 0x321   : > { %2645 = vrot.lane.b32.xlu0 %v2644_v40, %s2894_s14 }
 0x322   : > { %2186 = vmatpush3.bf16.msra.mxu1 %v2185_v55 }
 0x323   : > { %2188 = vmatprep.subr.bf16.mxu1 %v2187_v7 }
 0x325   : > { %2655 = vrot.lane.b32.xlu0 %v2654_v20, %s2895_s16 }
 0x326   : > { %2190 = vmatpush3.bf16.msra.mxu1 %v2189_v48 }
 0x327   : > { %2192 = vmatprep.subr.bf16.mxu1 %v2191_v22 }
 0x329   : > { %1088 = vrot.lane.b32.xlu0 %v1049_v6, %s2893_s11  ;;  %s2019_s11 = sshll.u32 %s3133_s1, 4 }
 0x32a   : > { %2194 = vmatpush3.bf16.msra.mxu1 %v2193_v43  ;;  %s341_s14 = scalar_lea.vmem [#allocation12], %s2019_s11 }
 0x32b   : > { %2196 = vmatprep.subr.bf16.mxu1 %v2195_v13 }
 0x32d   : > { %2665 = vrot.lane.b32.xlu0 %v2664_v1, %s2895_s16  ;;  %s1904_s16 = sshll.u32 %s341_s14, 4  ;;  %s4379_s16 = int_to_ptr.vmem [resolvable:$true] %s1904_s16 }
 0x32e   : > { %2198 = vmatpush3.bf16.msra.mxu1 %v2197_v50  ;;  %s2803_s15 = scalar_lea.vmem %s4379_s16, 256  ;;  %p2810_p12 = scmp.lt.s32.totalorder %s4379_s16, %s2808_s19 }
 0x32f   : > { %2200 = vmatprep.subr.bf16.mxu1 %v2199_v61  ;;  %v4287_v61 = vld [vmem:[#allocation7] sm:$0xff]   ;;  %p2804_p10 = scmp.ne.s32.totalorder %s4379_s16, %s2803_s15  ;;  %p2811_p2 = scmp.lt.s32.totalorder %s2809_s22, %s2803_s15 }
 0x331   : > { %p2805_p3 = pnand %p2804_p10, %p3085_p5  ;;  %p2812_p1 = por %p2811_p2, %p2810_p12 }
 0x332   : > { %2202 = vmatpush3.bf16.msra.mxu1 %v2201_v63 }
 0x333   : > { %p2806_p7 = pneg %p2805_p3 }
 0x335   : > { %p2813_p4 = pnand %p2812_p1, %p2806_p7 }
 0x376   : > { %v2611_v31 = vpop.permute.xlu1 %2610 }
 0x377   : > { %v2613_v53 = vunpack.i.h.bf16 %v2611_v31  ;;  %v2612_v10 = vunpack.i.l.bf16 %v2611_v31 }
 0x37a   : > { %v4220_v49 = vpop.permute.xlu1 %2620 }
 0x37b   : > { %v4222_v3 = vpop.permute.xlu0 %2595  ;;  %v2623_v27 = vunpack.i.h.bf16 %v4220_v49  ;;  %v2622_v6 = vunpack.i.l.bf16 %v4220_v49 }
 0x37c   : > { %v2597_v62 = vunpack.i.l.bf16 %v4222_v3  ;;  %v2598_v60 = vunpack.i.h.bf16 %v4222_v3 }
 0x37d   : > { %v745_v36 = vsel %vm736_vm7, %v2622_v6, %v2612_v10 }
 0x37e   : > { %v4225_v40 = vpop.permute.xlu1 %2630  ;;  %v597_v52 = vsel %vm590_vm14, %v2597_v62, %v2592_v24  ;;  %v603_v12 = vsel %vm590_vm14, %v2593_v32, %v2597_v62 }
 0x37f   : > { %v4227_v25 = vpop.permute.xlu0 %2605  ;;  %v609_v33 = vsel %vm4118_vm6, %v597_v52, %v4005_v54  ;;  %v746_v54 = vsel %vm736_vm7, %v2623_v27, %v2613_v53  ;;  %v2633_v21 = vunpack.i.h.bf16 %v4225_v40  ;;  %v2632_v38 = vunpack.i.l.bf16 %v4225_v40 }
 0x380   : > { %v2607_v20 = vunpack.i.l.bf16 %v4227_v25  ;;  %v849_v55 = vpack.c.bf16 %v746_v54, %v745_v36  ;;  %v2608_v51 = vunpack.i.h.bf16 %v4227_v25  ;;  %v611_v0 = vsel %vm4118_vm6, %v603_v12, %v3911_v4  ;;  %v1529_v12 = vld [vmem:[#allocation9 + $0xe0] sm:$0xff] }
 0x382   : > { %v4234_v2 = vpop.permute.xlu1 %1002  ;;  %v671_v23 = vsel %vm663_vm4, %v2607_v20, %v2602_v14  ;;  %v677_v37 = vsel %vm663_vm4, %v2603_v39, %v2607_v20 }
 0x383   : > { %v2616_v24 = vpop.permute.xlu0 %2615  ;;  %v846_v1 = vpack.c.bf16 %v671_v23, %v609_v33  ;;  %v1032_v41 = vsel %vm590_vm14, %v2598_v60, %v4234_v2  ;;  %v848_v56 = vpack.c.bf16 %v677_v37, %v611_v0  ;;  %v1535_v0 = vld [vmem:[#allocation9 + $0x110] sm:$0xff] }
 0x384   : > { %v2618_v29 = vunpack.i.h.bf16 %v2616_v24  ;;  %v2617_v17 = vunpack.i.l.bf16 %v2616_v24  ;;  %v1044_v28 = vsel %vm4118_vm6, %v1032_v41, %v3999_v57 }
 0x385   : > { %1326 = vmatpush1.bf16.msra.mxu0 %v846_v1 }
 0x386   : > { %v4246_v19 = vpop.permute.xlu1 %2640  ;;  %v739_v26 = vsel %vm736_vm7, %v2612_v10, %v2617_v17  ;;  %v740_v44 = vsel %vm736_vm7, %v2613_v53, %v2618_v29  ;;  %v752_v39 = vsel %vm736_vm7, %v2618_v29, %v2623_v27  ;;  %v751_v57 = vsel %vm736_vm7, %v2617_v17, %v2622_v6 }
 0x387   : > { %v2626_v14 = vpop.permute.xlu0 %2625  ;;  %v850_v18 = vpack.c.bf16 %v740_v44, %v739_v26  ;;  %v2643_v63 = vunpack.i.h.bf16 %v4246_v19  ;;  %v2642_v31 = vunpack.i.l.bf16 %v4246_v19  ;;  %v851_v40 = vpack.c.bf16 %v752_v39, %v751_v57 }
 0x388   : > { %v2628_v47 = vunpack.i.h.bf16 %v2626_v14  ;;  %v2627_v8 = vunpack.i.l.bf16 %v2626_v14 }
 0x389   : > { %1327 = vmatprep.subr.bf16.mxu0 %v850_v18 }
 0x38a   : > { %v814_v7 = vsel %vm809_vm8, %v2627_v8, %v2632_v38  ;;  %v815_v46 = vsel %vm809_vm8, %v2628_v47, %v2633_v21  ;;  %v4264_v42 = vpop.permute.xlu1 %2650  ;;  %1328 = vmatpush1.bf16.msra.mxu0 %v849_v55 }
 0x38b   : > { %v2636_v58 = vpop.permute.xlu0 %2635  ;;  %v853_v48 = vpack.c.bf16 %v815_v46, %v814_v7  ;;  %v2653_v27 = vunpack.i.h.bf16 %v4264_v42  ;;  %v2652_v6 = vunpack.i.l.bf16 %v4264_v42 }
 0x38c   : > { %v2638_v22 = vunpack.i.h.bf16 %v2636_v58  ;;  %v2637_v16 = vunpack.i.l.bf16 %v2636_v58 }
 0x38d   : > { %1329 = vmatprep.subr.bf16.mxu0 %v853_v48 }
 0x38e   : > { %v820_v13 = vsel %vm809_vm8, %v2637_v16, %v2627_v8  ;;  %v821_v45 = vsel %vm809_vm8, %v2638_v22, %v2628_v47  ;;  %v1015_v11 = vpop.permute.xlu1 %1014  ;;  %v827_v24 = vsel %vm809_vm8, %v2633_v21, %v2638_v22  ;;  %v826_v1 = vsel %vm809_vm8, %v2632_v38, %v2637_v16 }
 0x38f   : > { %v1077_v43 = vpop.permute.xlu0 %1076  ;;  %v852_v32 = vpack.c.bf16 %v821_v45, %v820_v13  ;;  %v1038_v53 = vsel %vm590_vm14, %v1015_v11, %v2598_v60  ;;  %v854_v14 = vpack.c.bf16 %v827_v24, %v826_v1  ;;  %v1026_v21 = vsel %vm590_vm14, %v4234_v2, %v1015_v11  ;;  %v1533_v13 = vld [vmem:[#allocation9 + $0x100] sm:$0xff]  ;;  %v1546_v24 = vld [vmem:[#allocation9 + $0x168] sm:$0xff] }
 0x390   : > { %v1105_v30 = vsel %vm663_vm4, %v2608_v51, %v1077_v43  ;;  %v1046_v26 = vsel %vm4118_vm6, %v1038_v53, %v4165_v9  ;;  %v1045_v2 = vsel %vm4118_vm6, %v1026_v21, %v4070_v35  ;;  %v1547_v53 = vld [vmem:[#allocation9 + $0x170] sm:$0xff] }
 0x391   : > { %v1278_v50 = vpack.c.bf16 %v1105_v30, %v1044_v28  ;;  %1330 = vmatpush1.bf16.msra.mxu0 %v852_v32  ;;  %v1513_v28 = vld [vmem:[#allocation9 + $0x60] sm:$0xff]  ;;  %v1514_v30 = vld [vmem:[#allocation9 + $0x68] sm:$0xff]  ;;  %v1531_v32 = vld [vmem:[#allocation9 + $0xf0] sm:$0xff] }
 0x392   : > { %v2661_v25 = vpop.permute.xlu1 %2660  ;;  %v2205_v11 = vpack.c.bf16 %v1514_v30, %v1513_v28  ;;  %v1707_v28 = vld [vmem:[#allocation10 + $0x10] sm:$0xff] }
 0x393   : > { %v2646_v34 = vpop.permute.xlu0 %2645  ;;  %1368 = vmatprep.subr.bf16.mxu0 %v1278_v50  ;;  %v2663_v10 = vunpack.i.h.bf16 %v2661_v25  ;;  %v2662_v29 = vunpack.i.l.bf16 %v2661_v25  ;;  %v1532_v50 = vld [vmem:[#allocation9 + $0xf8] sm:$0xff]  ;;  %v1541_v25 = vld [vmem:[#allocation9 + $0x140] sm:$0xff] }
 0x394   : > { %v2648_v49 = vunpack.i.h.bf16 %v2646_v34  ;;  %v2647_v3 = vunpack.i.l.bf16 %v2646_v34  ;;  %2022 = vmatmul.mubr.msk.bf16.vlgmr.msra.gmra.mrb[0].mxu0 %vm1321_vm9, %v4287_v61  ;;  %v2207_v39 = vpack.c.bf16 %v1532_v50, %v1531_v32  ;;  %v1515_v34 = vld [vmem:[#allocation9 + $0x70] sm:$0xff]  ;;  %v1708_v32 = vld [vmem:[#allocation10 + $0x18] sm:$0xff]  ;;  %v1709_v50 = vld [vmem:[#allocation10 + $0x20] sm:$0xff] }
 0x395   : > { %1369 = vmatpush1.bf16.msra.mxu0 %v848_v56  ;;  %1400 = vmatprep.mubr.bf16.mxu0 %v2896_v5  ;;  %v1184_v8 = vsel %vm736_vm7, %v2662_v29, %v2642_v31  ;;  %v1185_v18 = vsel %vm736_vm7, %v2663_v10, %v2643_v63  ;;  %v1536_v56 = vld [vmem:[#allocation9 + $0x118] sm:$0xff] }
 0x396   : > { %v1178_v4 = vsel %vm736_vm7, %v2642_v31, %v2647_v3  ;;  %v1179_v62 = vsel %vm736_vm7, %v2643_v63, %v2648_v49  ;;  %v1173_v60 = vsel %vm736_vm7, %v2648_v49, %v2663_v10  ;;  %v1172_v42 = vsel %vm736_vm7, %v2647_v3, %v2662_v29  ;;  %v1537_v31 = vld [vmem:[#allocation9 + $0x120] sm:$0xff]  ;;  %v1538_v49 = vld [vmem:[#allocation9 + $0x128] sm:$0xff]  ;;  %v1548_v10 = vld [vmem:[#allocation9 + $0x178] sm:$0xff] }
 0x397   : > { %v2656_v52 = vpop.permute.xlu0 %2655  ;;  %v1281_v20 = vpack.c.bf16 %v1179_v62, %v1178_v4  ;;  %v1283_v58 = vpack.c.bf16 %v1185_v18, %v1184_v8  ;;  %v1282_v48 = vpack.c.bf16 %v1173_v60, %v1172_v42  ;;  %v2215_v57 = vpack.c.bf16 %v1536_v56, %v1535_v0  ;;  %v1539_v4 = vld [vmem:[#allocation9 + $0x130] sm:$0xff]  ;;  %v1540_v62 = vld [vmem:[#allocation9 + $0x138] sm:$0xff]  ;;  %v1710_v0 = vld [vmem:[#allocation10 + $0x28] sm:$0xff] }
 0x398   : > { %v2658_v33 = vunpack.i.h.bf16 %v2656_v52  ;;  %v2657_v23 = vunpack.i.l.bf16 %v2656_v52  ;;  %v2219_v3 = vpack.c.bf16 %v1538_v49, %v1537_v31  ;;  %v1542_v52 = vld [vmem:[#allocation9 + $0x148] sm:$0xff]  ;;  %v2239_v29 = vpack.c.bf16 %v1548_v10, %v1547_v53  ;;  %v1715_v31 = vld [vmem:[#allocation10 + $0x50] sm:$0xff]  ;;  %v1716_v49 = vld [vmem:[#allocation10 + $0x58] sm:$0xff] }
 0x399   : > { %1370 = vmatprep.subr.bf16.mxu0 %v1281_v20  ;;  %v2227_v20 = vpack.c.bf16 %v1542_v52, %v1541_v25  ;;  %v1473_v18 = vadd.s32 256, %v3154_v15  ;;  %v2251_v56 = vpack.c.bf16 %v1710_v0, %v1709_v50  ;;  %v1719_v25 = vld [vmem:[#allocation10 + $0x70] sm:$0xff]  ;;  %v1720_v52 = vld [vmem:[#allocation10 + $0x78] sm:$0xff]  ;;  %v2899_v53 = vmov 2  }
 0x39a   : > { %1371 = vmatpush1.bf16.msra.mxu0 %v851_v40  ;;  %v1252_v17 = vsel %vm809_vm8, %v2652_v6, %v2657_v23  ;;  %v1253_v19 = vsel %vm809_vm8, %v2653_v27, %v2658_v33  ;;  %v2223_v40 = vpack.c.bf16 %v1540_v62, %v1539_v4  ;;  %v1717_v4 = vld [vmem:[#allocation10 + $0x60] sm:$0xff]  ;;  %v1718_v62 = vld [vmem:[#allocation10 + $0x68] sm:$0xff] }
 0x39b   : > { %v1089_v36 = vpop.permute.xlu0 %1088  ;;  %v1284_v54 = vpack.c.bf16 %v1253_v19, %v1252_v17  ;;  %vm1479_vm11 = vcmp.lt.s32.totalorder %v1473_v18, 276 }
 0x39c   : > { %v1111_v44 = vsel %vm663_vm4, %v1089_v36, %v2608_v51  ;;  %v1099_v38 = vsel %vm663_vm4, %v1077_v43, %v1089_v36  ;;  %v1530_v43 = vld [vmem:[#allocation9 + $0xe8] sm:$0xff] }
 0x39d   : > { %v1280_v47 = vpack.c.bf16 %v1111_v44, %v1046_v26  ;;  %1372 = vmatprep.subr.bf16.mxu0 %v1284_v54  ;;  %v1279_v55 = vpack.c.bf16 %v1099_v38, %v1045_v2  ;;  %v2203_v45 = vpack.c.bf16 %v1530_v43, %v1529_v12 }
 0x39e   : > { %1373 = vmatpush1.bf16.msra.mxu0 %v854_v14 }
 0x39f   : > { %v2666_v9 = vpop.permute.xlu0 %2665  ;;  %1411 = vmatprep.subr.bf16.mxu0 %v1280_v47  ;;  %2204 = vmatprep.subr.bf16.mxu1 %v2203_v45 }
 0x3a0   : > { %v2668_v7 = vunpack.i.h.bf16 %v2666_v9  ;;  %v2667_v46 = vunpack.i.l.bf16 %v2666_v9  ;;  %2206 = vmatpush3.bf16.msra.mxu1 %v2205_v11  ;;  %v2247_v11 = vpack.c.bf16 %v1708_v32, %v1707_v28 }
 0x3a1   : > { %2023 = vmatmul.mubr.msk.bf16.vlgmr.msra.gmra.mrb[4].mxu0 %vm1321_vm9, %v4287_v61  ;;  %2208 = vmatprep.subr.bf16.mxu1 %v2207_v39  ;;  %v1711_v39 = vld [vmem:[#allocation10 + $0x30] sm:$0xff] }
 0x3a2   : > { %1412 = vmatpush1.bf16.msra.mxu0 %v1279_v55  ;;  %v1258_v59 = vsel %vm809_vm8, %v2667_v46, %v2652_v6  ;;  %v1259_v35 = vsel %vm809_vm8, %v2668_v7, %v2653_v27  ;;  %1443 = vmatprep.mubr.bf16.mxu0 %v2896_v5  ;;  %v1246_v22 = vsel %vm809_vm8, %v2657_v23, %v2667_v46  ;;  %v1534_v5 = vld [vmem:[#allocation9 + $0x108] sm:$0xff]  ;;  %v1543_v27 = vld [vmem:[#allocation9 + $0x150] sm:$0xff]  ;;  %v1544_v6 = vld [vmem:[#allocation9 + $0x158] sm:$0xff] }
 0x3a3   : > { %1413 = vmatprep.subr.bf16.mxu0 %v1283_v58  ;;  %v1247_v16 = vsel %vm809_vm8, %v2658_v33, %v2668_v7  ;;  %v1286_v41 = vpack.c.bf16 %v1259_v35, %v1258_v59  ;;  %v2211_v37 = vpack.c.bf16 %v1534_v5, %v1533_v13  ;;  %v2231_v33 = vpack.c.bf16 %v1544_v6, %v1543_v27  ;;  %v1545_v23 = vld [vmem:[#allocation9 + $0x160] sm:$0xff]  ;;  %v1801_v27 = vld [vmem:[%s4434_s6 + $0x8] sm:$0xff]  ;;  %v1800_v6 = vld [vmem:[%s4434_s6] sm:$0xff] }
 0x3a4   : > { %v1285_v51 = vpack.c.bf16 %v1247_v16, %v1246_v22  ;;  %v2235_v1 = vpack.c.bf16 %v1546_v24, %v1545_v23  ;;  %v1705_v5 = vld [vmem:[#allocation10] sm:$0xff]  ;;  %v1802_v23 = vsub.f32 0.0, %v1800_v6  ;;  %v2897_v24 = vmov 1  }
 0x3a6   : > { %1414 = vmatpush1.bf16.msra.mxu0 %v1282_v48  ;;  %1826 = vperm.xlu1 %2669, %v1802_v23  }
 0x3a7   : > { %1415 = vmatprep.subr.bf16.mxu0 %v1286_v41 }
 0x3aa   : > { %1416 = vmatpush1.bf16.msra.mxu0 %v1285_v51 }
 0x3ab   : > { %2212 = vmatprep.subr.bf16.mxu0 %v2211_v37 }
 0x3ad   : > { %2024 = vmatmul.mubr.msk.bf16.vlgmr.msra.gmra.mrb[8].mxu0 %vm1321_vm9, %v4287_v61  ;;  %v1516_v61 = vld [vmem:[#allocation9 + $0x78] sm:$0xff] }
 0x3ae   : > { %2214 = vmatpush3.bf16.msra.mxu0 %v2211_v37  ;;  %v2209_v63 = vpack.c.bf16 %v1516_v61, %v1515_v34  ;;  %v1706_v37 = vld [vmem:[#allocation10 + $0x8] sm:$0xff]  ;;  %v1713_v34 = vld [vmem:[#allocation10 + $0x40] sm:$0xff] }
 0x3af   : > { %2216 = vmatprep.subr.bf16.mxu0 %v2215_v57  ;;  %v2243_v30 = vpack.c.bf16 %v1706_v37, %v1705_v5  ;;  %v1714_v61 = vld [vmem:[#allocation10 + $0x48] sm:$0xff] }
 0x3b0   : > { %2210 = vmatpush3.bf16.msra.mxu1 %v2209_v63  ;;  %v2259_v63 = vpack.c.bf16 %v1714_v61, %v1713_v34 }
 0x3b1   : > { %2244 = vmatprep.subr.bf16.mxu1 %v2243_v30 }
 0x3b2   : > { %2218 = vmatpush3.bf16.msra.mxu0 %v2215_v57  ;;  %v1712_v57 = vld [vmem:[#allocation10 + $0x38] sm:$0xff] }
 0x3b3   : > { %2220 = vmatprep.subr.bf16.mxu0 %v2219_v3  ;;  %v2255_v15 = vpack.c.bf16 %v1712_v57, %v1711_v39 }
 0x3b6   : > { %2222 = vmatpush3.bf16.msra.mxu0 %v2219_v3  ;;  %v2263_v3 = vpack.c.bf16 %v1716_v49, %v1715_v31 }
 0x3b7   : > { %2224 = vmatprep.subr.bf16.mxu0 %v2223_v40 }
 0x3ba   : > { %2226 = vmatpush3.bf16.msra.mxu0 %v2223_v40  ;;  %v2267_v40 = vpack.c.bf16 %v1718_v62, %v1717_v4 }
 0x3bb   : > { %2228 = vmatprep.subr.bf16.mxu0 %v2227_v20 }
 0x3be   : > { %2230 = vmatpush3.bf16.msra.mxu0 %v2227_v20  ;;  %v2271_v20 = vpack.c.bf16 %v1720_v52, %v1719_v25 }
 0x3bf   : > { %2232 = vmatprep.subr.bf16.mxu0 %v2231_v33 }
 0x3c2   : > { %2234 = vmatpush3.bf16.msra.mxu0 %v2231_v33  ;;  %v1803_v33 = vsub.f32 0.0, %v1801_v27 }
 0x3c3   : > { %2236 = vmatprep.subr.bf16.mxu0 %v2235_v1 }
 0x3c4   : > { %1831 = vperm.xlu0 %2670, %v1803_v33  }
 0x3c6   : > { %2238 = vmatpush3.bf16.msra.mxu0 %v2235_v1  ;;  %v2898_v1 = vmov 4  }
 0x3c7   : > { %2240 = vmatprep.subr.bf16.mxu0 %v2239_v29  ;;  %2671 = vset.pattern.permute.xlu1 %v2898_v1 }
 0x3c8   : > { %2672 = vset.pattern.permute.xlu0 %v2897_v24  ;;  %1842 = vperm.xlu1 %2671, %v1800_v6  }
 0x3c9   : > { %1855 = vperm.xlu0 %2672, %v1800_v6  }
 0x3ca   : > { %2242 = vmatpush3.bf16.msra.mxu0 %v2239_v29 }
 0x3cc   : > { %1847 = vperm.xlu1 %2671, %v1801_v27  }
 0x3cd   : > { %2675 = vset.pattern.permute.xlu0 %v2899_v53 }
 0x3ce   : > { %1883 = vperm.xlu0 %2675, %v1801_v27  }
 0x3d0   : > { %2673 = vset.pattern.permute.xlu1 %v2897_v24 }
 0x3d1   : > { %1859 = vperm.xlu1 %2673, %v1801_v27  }
 0x3d5   : > { %2674 = vset.pattern.permute.xlu1 %v2899_v53 }
 0x3d6   : > { %1879 = vperm.xlu1 %2674, %v1800_v6  }
 0x425   : > { %v1827_v32 = vpop.permute.xlu1 %1826 }
 0x443   : > { %v1832_v37 = vpop.permute.xlu0 %1831 }
 0x447   : > { %v1843_v61 = vpop.permute.xlu1 %1842 }
 0x448   : > { %v1856_v25 = vpop.permute.xlu0 %1855 }
 0x44d   : > { %v1884_v24 = vpop.permute.xlu0 %1883 }
 0x467   : > { %v1359_v17 = vpop.f32.mrb[0].mxu0 }
 0x468   : > { %v1454_v19 = vmul.f32 %v1359_v17, %v1359_v17  ;;  %v1361_v36 = vpop.f32.mrb[1].mxu0 }
 0x469   : > { %v1455_v54 = vmul.f32 %v1361_v36, %v1361_v36  ;;  %v1363_v14 = vpop.f32.mrb[2].mxu0 }
 0x46a   : > { %v1460_v21 = vmul.f32 %v1363_v14, %v1363_v14  ;;  %v1365_v26 = vpop.f32.mrb[3].mxu0 }
 0x46b   : > { %v1461_v44 = vmul.f32 %v1365_v26, %v1365_v26 }
 0x46c   : > { %v1466_v38 = vadd.f32 %v1460_v21, %v1454_v19 }
 0x46d   : > { %v1467_v47 = vadd.f32 %v1461_v44, %v1455_v54  ;;  %v1701_v44 = vld [vmem:[%s4433_s5] sm:$0xff] }
 0x46f   : > { %1613 = vmatprep.mubr.f32.mxu1 %v1467_v47 }
 0x470   : > { %2031 = vmatmul.mubr.msk.f32.vlgmr.msra.gmra.mrb[0].mxu1 %vm1474_vm10, %v1466_v38 }
 0x471   : > { %2246 = vmatpush3.bf16.msra.mxu1 %v2243_v30 }
 0x472   : > { %2248 = vmatprep.subr.bf16.mxu1 %v2247_v11 }
 0x474   : > { %v1402_v8 = vpop.f32.mrb[4].mxu0 }
 0x475   : > { %v1456_v2 = vmul.f32 %v1402_v8, %v1402_v8  ;;  %v1404_v9 = vpop.f32.mrb[5].mxu0  ;;  %2250 = vmatpush3.bf16.msra.mxu1 %v2247_v11  ;;  %v1702_v8 = vld [vmem:[%s4433_s5 + $0x8] sm:$0xff] }
 0x476   : > { %v1406_v55 = vpop.f32.mrb[6].mxu0  ;;  %v1457_v60 = vmul.f32 %v1404_v9, %v1404_v9  ;;  %2252 = vmatprep.subr.bf16.mxu1 %v2251_v56 }
 0x477   : > { %v1462_v7 = vmul.f32 %v1406_v55, %v1406_v55  ;;  %v1408_v46 = vpop.f32.mrb[7].mxu0  ;;  %v1797_v55 = vld [vmem:[%s4432_s4 + $0x8] sm:$0xff] }
 0x478   : > { %v1463_v42 = vmul.f32 %v1408_v46, %v1408_v46 }
 0x479   : > { %v1468_v58 = vadd.f32 %v1462_v7, %v1456_v2  ;;  %2254 = vmatpush3.bf16.msra.mxu1 %v2251_v56  ;;  %v1796_v7 = vld [vmem:[%s4432_s4] sm:$0xff] }
 0x47a   : > { %v1469_v59 = vadd.f32 %v1463_v42, %v1457_v60  ;;  %2256 = vmatprep.subr.bf16.mxu1 %v2255_v15 }
 0x47b   : > { %2141 = vmatprep.mubr.msk.f32.mxu0 %vm1479_vm11, %v1468_v58 }
 0x47d   : > { %2258 = vmatpush3.bf16.msra.mxu1 %v2255_v15 }
 0x47e   : > { %2260 = vmatprep.subr.bf16.mxu1 %v2259_v63 }
 0x480   : > { %v1445_v35 = vpop.f32.mrb[8].mxu0 }
 0x481   : > { %v1447_v48 = vpop.f32.mrb[9].mxu0  ;;  %v1458_v16 = vmul.f32 %v1445_v35, %v1445_v35  ;;  %2262 = vmatpush3.bf16.msra.mxu1 %v2259_v63  ;;  %v1848_v63 = vpop.permute.xlu1 %1847 }
 0x482   : > { %v1449_v22 = vpop.f32.mrb[10].mxu0  ;;  %v1459_v12 = vmul.f32 %v1447_v48, %v1447_v48  ;;  %2264 = vmatprep.subr.bf16.mxu1 %v2263_v3 }
 0x483   : > { %v1464_v41 = vmul.f32 %v1449_v22, %v1449_v22  ;;  %v1451_v51 = vpop.f32.mrb[11].mxu0 }
 0x484   : > { %v1465_v43 = vmul.f32 %v1451_v51, %v1451_v51 }
 0x485   : > { %v1470_v13 = vadd.f32 %v1464_v41, %v1458_v16  ;;  %2266 = vmatpush3.bf16.msra.mxu1 %v2263_v3  ;;  %v1860_v62 = vpop.permute.xlu1 %1859 }
 0x486   : > { %v1471_v45 = vadd.f32 %v1465_v43, %v1459_v12  ;;  %2268 = vmatprep.subr.bf16.mxu1 %v2267_v40 }
 0x487   : > { %1618 = vmatprep.mubr.f32.mxu1 %v1470_v13 }
 0x488   : > { %2032 = vmatmul.mubr.msk.f32.gmra.mrb[2].mxu1 %vm1474_vm10, %v1469_v59  ;;  %2142 = vmatmul.mubr.msk.f32.vlgmr.msra.gmra.mrb[12].mxu0 %vm1479_vm11, %v1471_v45 }
 0x489   : > { %2270 = vmatpush3.bf16.msra.mxu1 %v2267_v40 }
 0x48a   : > { %2272 = vmatprep.subr.bf16.mxu1 %v2271_v20 }
 0x48d   : > { %2274 = vmatpush3.bf16.msra.mxu1 %v2271_v20 }
 0x543   : > { %v2067_v10 = vpop.f32.mrb[0].mxu1 }
 0x544   : > { %v2068_v29 = vpop.f32.mrb[1].mxu1 }
 0x545   : > { %v2069_v17 = vadd.f32 %v2068_v29, %v2067_v10  ;;  %v1880_v29 = vpop.permute.xlu1 %1879 }
 0x55b   : > { %v2070_v19 = vpop.f32.mrb[2].mxu1  ;;  %v2143_v36 = vpop.f32.mrb[12].mxu0 }
 0x55c   : > { %v2071_v54 = vpop.f32.mrb[3].mxu1  ;;  %v1690_v14 = vpop.f32.mrb[13].mxu0 }
 0x55d   : > { %v2072_v21 = vadd.f32 %v2071_v54, %v2070_v19  ;;  %v1691_v26 = vadd.f32 %v2069_v17, %v1690_v14 }
 0x55f   : > { %v1696_v38 = vadd.f32 %v2143_v36, %v2072_v21  ;;  %v1699_v47 = vmax.f32 %v1691_v26, 1e-05 }
 0x561   : > { %v1700_v18 = vmax.f32 %v1696_v38, 1e-05  ;;  %v1703_v2 = vmul.f32 %v1701_v44, %v1699_v47 }
 0x563   : > { %v1704_v9 = vmul.f32 %v1702_v8, %v1700_v18  ;;  %2176 = vmatprep.mubr.f32.mxu1 %v1703_v2 }
 0x565   : > { %2177 = vmatmul.mubr.f32.vlgmr.msra.gmra.mrb[4].mxu1 %v1704_v9 }
 0x638   : > { %v2178_v46 = vpop.f32.mrb[4].mxu1 }
 0x639   : > { %v1799_v60 = vmul.f32 %v2178_v46, %v1797_v55  ;;  %v1787_v42 = vpop.f32.mrb[5].mxu1 }
 0x63a   : > { %v1798_v58 = vmul.f32 %v1796_v7, %v1787_v42 }
 0x63b   : > { %v1805_v59 = vmul.f32 1e+12, %v1799_v60 }
 0x63c   : > { %v1804_v35 = vmul.f32 1e+12, %v1798_v58 }
 0x63d   : > { %v1815_v48 = vadd.f32 1.0, %v1805_v59  ;;  %v1818_v16 = vmul.f32 -0.5, %v1805_v59  ;;  %v1821_v12 = vand.u32 2147483647, %v1805_v59 }
 0x63e   : > { %v1806_v22 = vadd.f32 1.0, %v1804_v35  ;;  %v1809_v41 = vmul.f32 -0.5, %v1804_v35  ;;  %v1812_v13 = vand.u32 2147483647, %v1804_v35 }
 0x63f   : > { %2677 = vlog2.f32 %v1815_v48  ;;  %v1819_v51 = vadd.f32 1.0, %v1818_v16  ;;  %vm1822_vm12 = vcmp.lt.f32.partialorder %v1821_v12, 0.0004427343 }
 0x640   : > { %2679 = vlog2.f32 %v1806_v22  ;;  %v1810_v43 = vadd.f32 1.0, %v1809_v41  ;;  %vm1813_vm13 = vcmp.lt.f32.partialorder %v1812_v13, 0.0004427343 }
 0x641   : > { %v1820_v30 = vmul.f32 %v1819_v51, %v1805_v59 }
 0x642   : > { %v1811_v50 = vmul.f32 %v1810_v43, %v1804_v35 }
 0x649   : > { %v2678_v45 = vpop.eup %2677 }
 0x64a   : > { %v2680_v5 = vpop.eup %2679  ;;  %v1817_v28 = vmul.f32 0.6931472, %v2678_v45 }
 0x64b   : > { %v1808_v11 = vmul.f32 0.6931472, %v2680_v5 }
 0x64c   : > { %v1823_v0 = vsel %vm1822_vm12, %v1820_v30, %v1817_v28 }
 0x64d   : > { %v1835_v56 = vmul.f32 %v1832_v37, %v1823_v0  ;;  %v1814_v39 = vsel %vm1813_vm13, %v1811_v50, %v1808_v11 }
 0x64e   : > { %v1834_v57 = vmul.f32 %v1827_v32, %v1814_v39 }
 0x64f   : > { %v1838_v15 = vmul.f32 1.442695, %v1835_v56 }
 0x650   : > { %v1836_v34 = vmul.f32 1.442695, %v1834_v57 }
 0x651   : > { %2681 = vpow2.f32 %v1838_v15 }
 0x652   : > { %2683 = vpow2.f32 %v1836_v34 }
 0x65b   : > { %v2682_v31 = vpop.eup %2681 }
 0x65c   : > { %v2684_v49 = vpop.eup %2683  ;;  %v1851_v3 = vmul.f32 %v2682_v31, %v1848_v63 }
 0x65d   : > { %v1850_v4 = vmul.f32 %v2684_v49, %v1843_v61 }
 0x65e   : > { %v1853_v40 = vmul.f32 %v1851_v3, %v1700_v18 }
 0x65f   : > { %v1852_v52 = vmul.f32 %v1850_v4, %v1699_v47 }
 0x660   : > { %v1863_v20 = vadd.f32 %v1860_v62, %v1853_v40 }
 0x661   : > { %v1862_v27 = vadd.f32 %v1856_v25, %v1852_v52 }
 0x662   : > { %2685 = vrsqrt.f32 %v1863_v20  ;;  %vm1873_vm14 = vcmp.eq.f32.partialorder %v1863_v20, inf  ;;  %v1876_v1 = vand.u32 2147483648, %v1863_v20  ;;  %vm1875_vm15 = vcmp.eq.f32.partialorder %v1863_v20, 0.0 }
 0x663   : > { %2687 = vrsqrt.f32 %v1862_v27  ;;  %vm1866_vm0 = vcmp.eq.f32.partialorder %v1862_v27, inf  ;;  %v1869_v17 = vand.u32 2147483648, %v1862_v27  ;;  %vm1868_vm1 = vcmp.eq.f32.partialorder %v1862_v27, 0.0 }
 0x66c   : > { %v2686_v6 = vpop.eup %2685 }
 0x66d   : > { %v2688_v33 = vpop.eup %2687  ;;  %v1872_v23 = vmul.f32 %v2686_v6, %v1863_v20 }
 0x66e   : > { %v1865_v53 = vmul.f32 %v2688_v33, %v1862_v27 }
 0x66f   : > { %v1874_v10 = vsel %vm1873_vm14, %v1863_v20, %v1872_v23 }
 0x670   : > { %v1877_v19 = vsel %vm1875_vm15, %v1876_v1, %v1874_v10  ;;  %v1867_v36 = vsel %vm1866_vm0, %v1862_v27, %v1865_v53 }
 0x671   : > { %v1887_v54 = vsub.f32 %v1877_v19, %v1884_v24  ;;  %v1870_v14 = vsel %vm1868_vm1, %v1869_v17, %v1867_v36 }
 0x672   : > { %v1886_v21 = vsub.f32 %v1870_v14, %v1880_v29 }
 0x673   : > { %1889 = vst [vmem:[%s341_s14 + $0x8] sm:$0xff] %v1887_v54 }
 0x674   : > { %1888 = vst [vmem:[%s341_s14] sm:$0xff] %v1886_v21 }
 0x675   : > { %2816 = shalt.err (!%p2813_p4)
}
 0x676   : > { %s2817_s30 = scalar_lea.hbm %s4384_s28, 256  ;;  %s2821_s10 = scalar_lea.hbm %s4435_s7, 512 }
 0x677   : > { %p2818_p9 = scmp.ne.s32.totalorder %s4384_s28, %s2817_s30  ;;  %p2822_p11 = scmp.lt.u32.totalorder %s4384_s28, %s4435_s7 }
 0x678   : > { %p2823_p13 = scmp.lt.u32.totalorder %s2821_s10, %s2817_s30  ;;  %p2825_p10 = scmp.lt.u32.totalorder %s2817_s30, %s4384_s28 }
 0x679   : > { %p2819_p0 = pnand %p2818_p9, %p3085_p5 }
 0x67a   : > { %p2824_p6 = por %p2823_p13, %p2822_p11 }
 0x67b   : > { %p2820_p8 = pneg %p2819_p0 }
 0x67c   : > { %p2826_p3 = por %p2825_p10, %p2824_p6 }
 0x67e   : > { %p2827_p7 = pnand %p2826_p3, %p2820_p8 }
 0x680   : > { %2830 = shalt.err (!%p2827_p7)
}
 0x681   : > { %s2901_s21 = smov 128   ;;  %s2902_s23 = smov 8  }
 0x682   : > { %2292 = dma.vmem_to_hbm [thread:$0]  (%p3085_p5), %s4379_s16, 256, %s4384_s28, %s1891_s13, %s2901_s21, %s2901_s21, %s2902_s23  }
 0x683 PF: > { %s4509_s17 = sld [smem:[#allocation17_spill]]  ;;  %s1919_s15 = sand.u32 1, %s2865_s24  }
 0x684   : > { %p4511_p2 = scmp.ge.s32.totalorder %s2877_s27, 2  ;;  %s1920_s8 = scalar_lea.sflag [#allocation6], %s1919_s15 }
 0x689   : > { %p4510_p12 = scmp.ne.s32.totalorder %s4509_s17, 0 }
 0x68b   : > { %p2309_p1 = pnand %p4511_p2, %p4510_p12 }
 0x68d   : > { %2860 = dma.done.wait (!%p2309_p1), %s1920_s8, 256  }
 0x68e   : > { %2862 = vsyncadd (!%p2309_p1), %s1920_s8, 4294967040  ;;  %p22_p4 = scmp.ge.s32.totalorder %s3053_s18, 4   ;;  %s4512_s24 = smov %s2869_s25 }
 0x68f   : > { %s4513_s25 = smov %s2873_s26  ;;  %s4514_s26 = smov %s3081_s12 }
 0x690   : > { %s4515_s27 = smov %s3053_s18  ;;  %24 = sbr.rel (!%p22_p4) target bundleno = 9 (0x9), region = 106 }
 0x697   :  { %1925 = vsyncpa [#allocation5], 1 }
 0x698   :  { %1927 = vsyncpa [#allocation5 + $0x1], 1 }
 0x699   :  { %1928 = vsyncpa [#allocation8], 1 }
 0x69a   :  { %1929 = vsyncpa [#allocation11], 1 }
 0x69b   :  { %1930 = vsyncpa [#allocation6], 1 }
 0x69c   :  { %1932 = vsyncpa [#allocation6 + $0x1], 1 }

</bundles_post_ra>
